<compile_context>
chip_gen: v7x
topology: tpu7x:2x2x1
jax: 0.10.0
libtpu: 0.0.40
codegen_flags: <defaults>
</compile_context>

<pallas_src>
import functools

import jax
import jax.numpy as jnp
from jax.experimental import pallas as pl
from jax.experimental.pallas import tpu as pltpu


LANE = 128


def _round_up(n, m):
    return ((n + m - 1) // m) * m


# ------------------------------- fused kernel --------------------------------

def _cvae_fused_kernel(
    # activations
    x_ref, y_ref, eps_ref,
    # encoder weights
    fx1_w, fx1_b, fx2_w, fx2_b, fx3_w, fx3_b,
    fy_w, fy_b,
    fall_wa, fall_wb, fall_b,
    ml_w, ml_b,
    # decoder weights
    dz_w, dz_b, dy_w, dy_b,
    dec1_wa, dec1_wb, dec1_b,
    dec2_w, dec2_b, dec3_w, dec3_b,
    # outputs
    mu_ref, logvar_ref, out_ref,
    *, zp, transform,
):
    def lin(a, w_ref, b_ref, relu=True):
        # act(a @ W + b), f32 accumulation on the MXU.
        acc = jnp.dot(a, w_ref[...], preferred_element_type=jnp.float32)
        acc = acc + b_ref[...]
        if relu:
            acc = jnp.maximum(acc, 0.0)
        return acc

    def lin_cat(a, wa_ref, b, wb_ref, bias_ref, relu=True):
        # act(cat([a, b], 1) @ W + bias) == act(a @ W[:Ka] + b @ W[Ka:] + bias)
        acc = jnp.dot(a, wa_ref[...], preferred_element_type=jnp.float32)
        acc = acc + jnp.dot(b, wb_ref[...], preferred_element_type=jnp.float32)
        acc = acc + bias_ref[...]
        if relu:
            acc = jnp.maximum(acc, 0.0)
        return acc

    bf = lambda v: v.astype(jnp.bfloat16)

    x = x_ref[...]          # bf16 [B, XP]
    y = y_ref[...]          # bf16 [B, YP]

    # ------------------------------ encoder -------------------------------
    h = bf(lin(x, fx1_w, fx1_b))
    h = bf(lin(h, fx2_w, fx2_b))
    feat_x = bf(lin(h, fx3_w, fx3_b))
    feat_y = bf(lin(y, fy_w, fy_b))
    feat = bf(lin_cat(feat_x, fall_wa, feat_y, fall_wb, fall_b))

    # Fused mu|logvar projection: one [512, 2*zp] matmul.
    ml = lin(feat, ml_w, ml_b, relu=False)        # f32 [B, 2*zp]
    mu = ml[:, :zp]
    logvar = ml[:, zp:]
    mu_ref[...] = mu
    logvar_ref[...] = logvar

    # -------------------------- reparameterize ----------------------------
    # z = eps * exp(0.5 * logvar) + mu   (exp lowers to the EUP slot)
    z = eps_ref[...] * jnp.exp(0.5 * logvar) + mu

    # ------------------------------ decoder -------------------------------
    dec_z = bf(lin(bf(z), dz_w, dz_b))
    dec_y = bf(lin(y, dy_w, dy_b))
    h = bf(lin_cat(dec_z, dec1_wa, dec_y, dec1_wb, dec1_b))
    h = bf(lin(h, dec2_w, dec2_b))
    out = lin(h, dec3_w, dec3_b, relu=False)      # f32 [B, XP]

    if transform == "exp":
        out = jnp.exp(out)
    elif transform == "sigmoid":
        out = jax.nn.sigmoid(out)
    elif transform == "relu":
        out = jnp.maximum(out, 0.0)
    # transform == 'none' is a no-op.
    # TODO(synk): the module's 'tahn' branch is a typo (torch.tahn) and would
    # raise in PyTorch; it is intentionally not reproduced.
    out_ref[...] = out


_VMEM = pl.BlockSpec(memory_space=pltpu.MemorySpace.VMEM)

_WEIGHT_ARG_NAMES = (
    "fx1_w", "fx1_b", "fx2_w", "fx2_b", "fx3_w", "fx3_b",
    "fy_w", "fy_b", "fall_wa", "fall_wb", "fall_b",
    "ml_w", "ml_b", "dz_w", "dz_b", "dy_w", "dy_b",
    "dec1_wa", "dec1_wb", "dec1_b", "dec2_w", "dec2_b", "dec3_w", "dec3_b",
)


# --------------------------------- wrapper -----------------------------------

def cvae_forward(params, x, y, eps, *, x_dim, y_dim, z_dim, transform="none"):
    B = x.shape[0]
    xp = params["fx1_w"].shape[0]
    yp = params["fy_w"].shape[0]
    zp = params["dz_w"].shape[0]

    def pad_lanes(a, width, dtype):
        buf = jnp.zeros((B, width), dtype)
        return buf.at[:, : a.shape[1]].set(a.astype(dtype))

    x_p = pad_lanes(x, xp, jnp.bfloat16)
    y_p = pad_lanes(y, yp, jnp.bfloat16)
    eps_p = pad_lanes(eps, zp, jnp.float32)

    weight_args = [params[n] for n in _WEIGHT_ARG_NAMES]
    n_in = 3 + len(weight_args)

    kernel = functools.partial(_cvae_fused_kernel, zp=zp, transform=transform)

    # TODO(synk): at large batch, add a grid over B with
    # dimension_semantics=("parallel",) so v7x's two TensorCores split the
    # batch; at B=8 a single un-gridded call is optimal.
    mu_p, logvar_p, out_p = pl.pallas_call(
        kernel,
        out_shape=(
            jax.ShapeDtypeStruct((B, zp), jnp.float32),
            jax.ShapeDtypeStruct((B, zp), jnp.float32),
            jax.ShapeDtypeStruct((B, xp), jnp.float32),
        ),
        in_specs=[_VMEM] * n_in,
        out_specs=(_VMEM, _VMEM, _VMEM),
        compiler_params=pltpu.CompilerParams(
            vmem_limit_bytes=32 * 1024 * 1024,
        ),
    )(x_p, y_p, eps_p, *weight_args)

    return mu_p[:, :z_dim], logvar_p[:, :z_dim], out_p[:, :x_dim]


# ------------------------------ parameter setup -------------------------------

def _init_linear(key, fan_in, fan_out):
    # Deterministic init mimicking nn.Linear's default U(-1/sqrt(fan_in), +...).
    kw, kb = jax.random.split(key)
    bound = 1.0 / (fan_in ** 0.5)
    w = jax.random.uniform(kw, (fan_in, fan_out), jnp.float32, -bound, bound)
    b = jax.random.uniform(kb, (fan_out,), jnp.float32, -bound, bound)
    return w, b


def _pad_w(w, rows, cols):
    return jnp.zeros((rows, cols), w.dtype).at[: w.shape[0], : w.shape[1]].set(w)


def _pad_b(b, cols):
    return jnp.zeros((1, cols), b.dtype).at[0, : b.shape[0]].set(b)


def init_cvae_params(key, x_dim, y_dim, z_dim):
    """Build lane-padded, bf16-weight parameters for the fused kernel."""
    xp = _round_up(max(x_dim, 1), LANE)
    yp = _round_up(max(y_dim, 1), LANE)
    zp = _round_up(max(z_dim, 1), LANE)
    h1, h1p = 1000, _round_up(1000, LANE)           # 1000 -> 1024

    keys = jax.random.split(key, 12)
    raw = {
        "fx1": _init_linear(keys[0], x_dim, h1),
        "fx2": _init_linear(keys[1], h1, 512),
        "fx3": _init_linear(keys[2], 512, 256),
        "fy": _init_linear(keys[3], y_dim, 256),
        "fall": _init_linear(keys[4], 512, 512),     # acts on cat(256|256)
        "mu": _init_linear(keys[5], 512, z_dim),
        "logvar": _init_linear(keys[6], 512, z_dim),
        "dz": _init_linear(keys[7], z_dim, 256),
        "dy": _init_linear(keys[8], y_dim, 256),
        "dec1": _init_linear(keys[9], 512, 512),     # acts on cat(256|256)
        "dec2": _init_linear(keys[10], 512, h1),
        "dec3": _init_linear(keys[11], h1, x_dim),
    }

    bf16 = jnp.bfloat16
    p = {}
    w, b = raw["fx1"]
    p["fx1_w"] = _pad_w(w, xp, h1p).astype(bf16); p["fx1_b"] = _pad_b(b, h1p)
    w, b = raw["fx2"]
    p["fx2_w"] = _pad_w(w, h1p, 512).astype(bf16); p["fx2_b"] = _pad_b(b, 512)
    w, b = raw["fx3"]
    p["fx3_w"] = w.astype(bf16); p["fx3_b"] = _pad_b(b, 256)
    w, b = raw["fy"]
    p["fy_w"] = _pad_w(w, yp, 256).astype(bf16); p["fy_b"] = _pad_b(b, 256)
    w, b = raw["fall"]
    p["fall_wa"] = w[:256].astype(bf16); p["fall_wb"] = w[256:].astype(bf16)
    p["fall_b"] = _pad_b(b, 512)
    (wm, bm), (wl, bl) = raw["mu"], raw["logvar"]
    p["ml_w"] = jnp.concatenate(
        [_pad_w(wm, 512, zp), _pad_w(wl, 512, zp)], axis=1).astype(bf16)
    p["ml_b"] = jnp.concatenate([_pad_b(bm, zp), _pad_b(bl, zp)], axis=1)
    w, b = raw["dz"]
    p["dz_w"] = _pad_w(w, zp, 256).astype(bf16); p["dz_b"] = _pad_b(b, 256)
    w, b = raw["dy"]
    p["dy_w"] = _pad_w(w, yp, 256).astype(bf16); p["dy_b"] = _pad_b(b, 256)
    w, b = raw["dec1"]
    p["dec1_wa"] = w[:256].astype(bf16); p["dec1_wb"] = w[256:].astype(bf16)
    p["dec1_b"] = _pad_b(b, 512)
    w, b = raw["dec2"]
    p["dec2_w"] = _pad_w(w, 512, h1p).astype(bf16); p["dec2_b"] = _pad_b(b, h1p)
    w, b = raw["dec3"]
    p["dec3_w"] = _pad_w(w, h1p, xp).astype(bf16); p["dec3_b"] = _pad_b(b, xp)
    return p


# ----------------------------- pure-JAX reference -----------------------------

def _ref_forward(params, x_p, y_p, eps_p, zp, transform="none"):
    # Same (bf16-rounded) weights, f32 activations throughout.
    f32 = lambda v: v.astype(jnp.float32)

    def lin(a, w, b, relu=True):
        o = f32(a) @ f32(w) + b
        return jnp.maximum(o, 0.0) if relu else o

    h = lin(x_p, params["fx1_w"], params["fx1_b"])
    h = lin(h, params["fx2_w"], params["fx2_b"])
    feat_x = lin(h, params["fx3_w"], params["fx3_b"])
    feat_y = lin(y_p, params["fy_w"], params["fy_b"])
    wcat = jnp.concatenate([f32(params["fall_wa"]), f32(params["fall_wb"])], axis=0)
    feat = jnp.maximum(
        jnp.concatenate([feat_x, feat_y], axis=1) @ wcat + params["fall_b"], 0.0)
    ml = lin(feat, params["ml_w"], params["ml_b"], relu=False)
    mu = ml[:, :zp]
    logvar = ml[:, zp:]
    z = eps_p * jnp.exp(0.5 * logvar) + mu
    dec_z = lin(z, params["dz_w"], params["dz_b"])
    dec_y = lin(y_p, params["dy_w"], params["dy_b"])
    wcat2 = jnp.concatenate([f32(params["dec1_wa"]), f32(params["dec1_wb"])], axis=0)
    h = jnp.maximum(
        jnp.concatenate([dec_z, dec_y], axis=1) @ wcat2 + params["dec1_b"], 0.0)
    h = lin(h, params["dec2_w"], params["dec2_b"])
    out = lin(h, params["dec3_w"], params["dec3_b"], relu=False)
    if transform == "exp":
        out = jnp.exp(out)
    elif transform == "sigmoid":
        out = jax.nn.sigmoid(out)
    elif transform == "relu":
        out = jnp.maximum(out, 0.0)
    return mu, logvar, out


# ----------------------------------- main -------------------------------------

if __name__ == "__main__":
    B, X_DIM, Y_DIM, Z_DIM = 8, 32, 10, 16

    key = jax.random.PRNGKey(0)
    k_params, k_x, k_y, k_eps = jax.random.split(key, 4)

    params = init_cvae_params(k_params, X_DIM, Y_DIM, Z_DIM)
    x = jax.random.normal(k_x, (B, X_DIM), jnp.float32)
    # y as one-hot conditioning (float), like one_hot_embedding in the module.
    labels = jax.random.randint(k_y, (B,), 0, Y_DIM)
    y = jax.nn.one_hot(labels, Y_DIM, dtype=jnp.float32)
    # eps corresponds to torch.randn_like(std); drawn deterministically here.
    eps = jax.random.normal(k_eps, (B, Z_DIM), jnp.float32)

    fwd = jax.jit(functools.partial(
        cvae_forward, x_dim=X_DIM, y_dim=Y_DIM, z_dim=Z_DIM, transform="none"))
    mu, logvar, rec = jax.block_until_ready(fwd(params, x, y, eps))

    # Reference with identical bf16-rounded weights/inputs, f32 activations.
    xp = params["fx1_w"].shape[0]
    yp = params["fy_w"].shape[0]
    zp = params["dz_w"].shape[0]
    x_p = jnp.zeros((B, xp), jnp.bfloat16).at[:, :X_DIM].set(x.astype(jnp.bfloat16))
    y_p = jnp.zeros((B, yp), jnp.bfloat16).at[:, :Y_DIM].set(y.astype(jnp.bfloat16))
    eps_p = jnp.zeros((B, zp), jnp.float32).at[:, :Z_DIM].set(eps)
    mu_r, logvar_r, rec_r = _ref_forward(params, x_p, y_p, eps_p, zp)
    mu_r = mu_r[:, :Z_DIM]
    logvar_r = logvar_r[:, :Z_DIM]
    rec_r = rec_r[:, :X_DIM]

    assert mu.shape == (B, Z_DIM) and logvar.shape == (B, Z_DIM)
    assert rec.shape == (B, X_DIM)
    # bf16 activations between layers => loose-ish tolerance vs f32 reference.
    assert jnp.allclose(mu, mu_r, atol=3e-2, rtol=3e-2)
    assert jnp.allclose(logvar, logvar_r, atol=3e-2, rtol=3e-2)
    assert jnp.allclose(rec, rec_r, atol=5e-2, rtol=5e-2)

    print("KERNEL_OK")
</pallas_src>

<mosaic_0001>
module attributes {stable_mosaic.version = 11 : i64} {
  func.func @_cvae_fused_kernel(%arg0: memref<8x128xbf16, #tpu.memory_space<vmem>>, %arg1: memref<8x128xbf16, #tpu.memory_space<vmem>>, %arg2: memref<8x128xf32, #tpu.memory_space<vmem>>, %arg3: memref<128x1024xbf16, #tpu.memory_space<vmem>>, %arg4: memref<1x1024xf32, #tpu.memory_space<vmem>>, %arg5: memref<1024x512xbf16, #tpu.memory_space<vmem>>, %arg6: memref<1x512xf32, #tpu.memory_space<vmem>>, %arg7: memref<512x256xbf16, #tpu.memory_space<vmem>>, %arg8: memref<1x256xf32, #tpu.memory_space<vmem>>, %arg9: memref<128x256xbf16, #tpu.memory_space<vmem>>, %arg10: memref<1x256xf32, #tpu.memory_space<vmem>>, %arg11: memref<256x512xbf16, #tpu.memory_space<vmem>>, %arg12: memref<256x512xbf16, #tpu.memory_space<vmem>>, %arg13: memref<1x512xf32, #tpu.memory_space<vmem>>, %arg14: memref<512x256xbf16, #tpu.memory_space<vmem>>, %arg15: memref<1x256xf32, #tpu.memory_space<vmem>>, %arg16: memref<128x256xbf16, #tpu.memory_space<vmem>>, %arg17: memref<1x256xf32, #tpu.memory_space<vmem>>, %arg18: memref<128x256xbf16, #tpu.memory_space<vmem>>, %arg19: memref<1x256xf32, #tpu.memory_space<vmem>>, %arg20: memref<256x512xbf16, #tpu.memory_space<vmem>>, %arg21: memref<256x512xbf16, #tpu.memory_space<vmem>>, %arg22: memref<1x512xf32, #tpu.memory_space<vmem>>, %arg23: memref<512x1024xbf16, #tpu.memory_space<vmem>>, %arg24: memref<1x1024xf32, #tpu.memory_space<vmem>>, %arg25: memref<1024x128xbf16, #tpu.memory_space<vmem>>, %arg26: memref<1x128xf32, #tpu.memory_space<vmem>>, %arg27: memref<8x128xf32, #tpu.memory_space<vmem>>, %arg28: memref<8x128xf32, #tpu.memory_space<vmem>>, %arg29: memref<8x128xf32, #tpu.memory_space<vmem>>) attributes {dimension_semantics = [], scalar_prefetch = 0 : i64, scratch_operands = 0 : i64, tpu.core_type = #tpu.core_type<tc>} {
    %c0 = arith.constant 0 : index
    %c0_0 = arith.constant 0 : index
    %0 = vector.load %arg0[%c0, %c0_0] : memref<8x128xbf16, #tpu.memory_space<vmem>>, vector<8x128xbf16>
    %c0_1 = arith.constant 0 : index
    %c0_2 = arith.constant 0 : index
    %1 = vector.load %arg1[%c0_1, %c0_2] : memref<8x128xbf16, #tpu.memory_space<vmem>>, vector<8x128xbf16>
    %c0_3 = arith.constant 0 : index
    %c0_4 = arith.constant 0 : index
    %2 = vector.load %arg3[%c0_3, %c0_4] : memref<128x1024xbf16, #tpu.memory_space<vmem>>, vector<128x1024xbf16>
    %cst = arith.constant dense<0.000000e+00> : vector<8x1024xf32>
    %3 = tpu.matmul %0, %2, %cst {dimension_numbers = #tpu.dot_dimension_numbers<[1], [0], [0], [1], [0, 0, 1, 1], [], []>} : vector<8x128xbf16>, vector<128x1024xbf16>, vector<8x1024xf32> -> vector<8x1024xf32>
    %c0_5 = arith.constant 0 : index
    %c0_6 = arith.constant 0 : index
    %4 = vector.load %arg4[%c0_5, %c0_6] : memref<1x1024xf32, #tpu.memory_space<vmem>>, vector<1x1024xf32>
    %5 = vector.broadcast %4 : vector<1x1024xf32> to vector<8x1024xf32>
    %6 = arith.addf %3, %5 : vector<8x1024xf32>
    %cst_7 = arith.constant 0.000000e+00 : f32
    %7 = vector.broadcast %cst_7 : f32 to vector<8x1024xf32>
    %8 = arith.maximumf %6, %7 : vector<8x1024xf32>
    %9 = arith.truncf %8 : vector<8x1024xf32> to vector<8x1024xbf16>
    %c0_8 = arith.constant 0 : index
    %c0_9 = arith.constant 0 : index
    %10 = vector.load %arg5[%c0_8, %c0_9] : memref<1024x512xbf16, #tpu.memory_space<vmem>>, vector<1024x512xbf16>
    %cst_10 = arith.constant dense<0.000000e+00> : vector<8x512xf32>
    %11 = tpu.matmul %9, %10, %cst_10 {dimension_numbers = #tpu.dot_dimension_numbers<[1], [0], [0], [1], [0, 0, 1, 1], [], []>} : vector<8x1024xbf16>, vector<1024x512xbf16>, vector<8x512xf32> -> vector<8x512xf32>
    %c0_11 = arith.constant 0 : index
    %c0_12 = arith.constant 0 : index
    %12 = vector.load %arg6[%c0_11, %c0_12] : memref<1x512xf32, #tpu.memory_space<vmem>>, vector<1x512xf32>
    %13 = vector.broadcast %12 : vector<1x512xf32> to vector<8x512xf32>
    %14 = arith.addf %11, %13 : vector<8x512xf32>
    %cst_13 = arith.constant 0.000000e+00 : f32
    %15 = vector.broadcast %cst_13 : f32 to vector<8x512xf32>
    %16 = arith.maximumf %14, %15 : vector<8x512xf32>
    %17 = arith.truncf %16 : vector<8x512xf32> to vector<8x512xbf16>
    %c0_14 = arith.constant 0 : index
    %c0_15 = arith.constant 0 : index
    %18 = vector.load %arg7[%c0_14, %c0_15] : memref<512x256xbf16, #tpu.memory_space<vmem>>, vector<512x256xbf16>
    %cst_16 = arith.constant dense<0.000000e+00> : vector<8x256xf32>
    %19 = tpu.matmul %17, %18, %cst_16 {dimension_numbers = #tpu.dot_dimension_numbers<[1], [0], [0], [1], [0, 0, 1, 1], [], []>} : vector<8x512xbf16>, vector<512x256xbf16>, vector<8x256xf32> -> vector<8x256xf32>
    %c0_17 = arith.constant 0 : index
    %c0_18 = arith.constant 0 : index
    %20 = vector.load %arg8[%c0_17, %c0_18] : memref<1x256xf32, #tpu.memory_space<vmem>>, vector<1x256xf32>
    %21 = vector.broadcast %20 : vector<1x256xf32> to vector<8x256xf32>
    %22 = arith.addf %19, %21 : vector<8x256xf32>
    %cst_19 = arith.constant 0.000000e+00 : f32
    %23 = vector.broadcast %cst_19 : f32 to vector<8x256xf32>
    %24 = arith.maximumf %22, %23 : vector<8x256xf32>
    %25 = arith.truncf %24 : vector<8x256xf32> to vector<8x256xbf16>
    %c0_20 = arith.constant 0 : index
    %c0_21 = arith.constant 0 : index
    %26 = vector.load %arg9[%c0_20, %c0_21] : memref<128x256xbf16, #tpu.memory_space<vmem>>, vector<128x256xbf16>
    %cst_22 = arith.constant dense<0.000000e+00> : vector<8x256xf32>
    %27 = tpu.matmul %1, %26, %cst_22 {dimension_numbers = #tpu.dot_dimension_numbers<[1], [0], [0], [1], [0, 0, 1, 1], [], []>} : vector<8x128xbf16>, vector<128x256xbf16>, vector<8x256xf32> -> vector<8x256xf32>
    %c0_23 = arith.constant 0 : index
    %c0_24 = arith.constant 0 : index
    %28 = vector.load %arg10[%c0_23, %c0_24] : memref<1x256xf32, #tpu.memory_space<vmem>>, vector<1x256xf32>
    %29 = vector.broadcast %28 : vector<1x256xf32> to vector<8x256xf32>
    %30 = arith.addf %27, %29 : vector<8x256xf32>
    %cst_25 = arith.constant 0.000000e+00 : f32
    %31 = vector.broadcast %cst_25 : f32 to vector<8x256xf32>
    %32 = arith.maximumf %30, %31 : vector<8x256xf32>
    %33 = arith.truncf %32 : vector<8x256xf32> to vector<8x256xbf16>
    %c0_26 = arith.constant 0 : index
    %c0_27 = arith.constant 0 : index
    %34 = vector.load %arg11[%c0_26, %c0_27] : memref<256x512xbf16, #tpu.memory_space<vmem>>, vector<256x512xbf16>
    %cst_28 = arith.constant dense<0.000000e+00> : vector<8x512xf32>
    %35 = tpu.matmul %25, %34, %cst_28 {dimension_numbers = #tpu.dot_dimension_numbers<[1], [0], [0], [1], [0, 0, 1, 1], [], []>} : vector<8x256xbf16>, vector<256x512xbf16>, vector<8x512xf32> -> vector<8x512xf32>
    %c0_29 = arith.constant 0 : index
    %c0_30 = arith.constant 0 : index
    %36 = vector.load %arg12[%c0_29, %c0_30] : memref<256x512xbf16, #tpu.memory_space<vmem>>, vector<256x512xbf16>
    %cst_31 = arith.constant dense<0.000000e+00> : vector<8x512xf32>
    %37 = tpu.matmul %33, %36, %cst_31 {dimension_numbers = #tpu.dot_dimension_numbers<[1], [0], [0], [1], [0, 0, 1, 1], [], []>} : vector<8x256xbf16>, vector<256x512xbf16>, vector<8x512xf32> -> vector<8x512xf32>
    %38 = arith.addf %35, %37 : vector<8x512xf32>
    %c0_32 = arith.constant 0 : index
    %c0_33 = arith.constant 0 : index
    %39 = vector.load %arg13[%c0_32, %c0_33] : memref<1x512xf32, #tpu.memory_space<vmem>>, vector<1x512xf32>
    %40 = vector.broadcast %39 : vector<1x512xf32> to vector<8x512xf32>
    %41 = arith.addf %38, %40 : vector<8x512xf32>
    %cst_34 = arith.constant 0.000000e+00 : f32
    %42 = vector.broadcast %cst_34 : f32 to vector<8x512xf32>
    %43 = arith.maximumf %41, %42 : vector<8x512xf32>
    %44 = arith.truncf %43 : vector<8x512xf32> to vector<8x512xbf16>
    %c0_35 = arith.constant 0 : index
    %c0_36 = arith.constant 0 : index
    %45 = vector.load %arg14[%c0_35, %c0_36] : memref<512x256xbf16, #tpu.memory_space<vmem>>, vector<512x256xbf16>
    %cst_37 = arith.constant dense<0.000000e+00> : vector<8x256xf32>
    %46 = tpu.matmul %44, %45, %cst_37 {dimension_numbers = #tpu.dot_dimension_numbers<[1], [0], [0], [1], [0, 0, 1, 1], [], []>} : vector<8x512xbf16>, vector<512x256xbf16>, vector<8x256xf32> -> vector<8x256xf32>
    %c0_38 = arith.constant 0 : index
    %c0_39 = arith.constant 0 : index
    %47 = vector.load %arg15[%c0_38, %c0_39] : memref<1x256xf32, #tpu.memory_space<vmem>>, vector<1x256xf32>
    %48 = vector.broadcast %47 : vector<1x256xf32> to vector<8x256xf32>
    %49 = arith.addf %46, %48 : vector<8x256xf32>
    %50 = vector.extract_strided_slice %49 {offsets = [0, 0], sizes = [8, 128], strides = [1, 1]} : vector<8x256xf32> to vector<8x128xf32>
    %51 = vector.extract_strided_slice %49 {offsets = [0, 128], sizes = [8, 128], strides = [1, 1]} : vector<8x256xf32> to vector<8x128xf32>
    %c0_40 = arith.constant 0 : index
    %c0_41 = arith.constant 0 : index
    %52 = vector.load %arg27[%c0_40, %c0_41] : memref<8x128xf32, #tpu.memory_space<vmem>>, vector<8x128xf32>
    tpu.vector_store %arg27[%c0_40, %c0_41], %50 {strides = array<i32>} : memref<8x128xf32, #tpu.memory_space<vmem>>, vector<8x128xf32>,
    %c0_42 = arith.constant 0 : index
    %c0_43 = arith.constant 0 : index
    %53 = vector.load %arg28[%c0_42, %c0_43] : memref<8x128xf32, #tpu.memory_space<vmem>>, vector<8x128xf32>
    tpu.vector_store %arg28[%c0_42, %c0_43], %51 {strides = array<i32>} : memref<8x128xf32, #tpu.memory_space<vmem>>, vector<8x128xf32>,
    %c0_44 = arith.constant 0 : index
    %c0_45 = arith.constant 0 : index
    %54 = vector.load %arg2[%c0_44, %c0_45] : memref<8x128xf32, #tpu.memory_space<vmem>>, vector<8x128xf32>
    %cst_46 = arith.constant 5.000000e-01 : f32
    %55 = vector.broadcast %cst_46 : f32 to vector<8x128xf32>
    %56 = arith.mulf %55, %51 : vector<8x128xf32>
    %57 = math.exp %56 : vector<8x128xf32>
    %58 = arith.mulf %54, %57 : vector<8x128xf32>
    %59 = arith.addf %58, %50 : vector<8x128xf32>
    %60 = arith.truncf %59 : vector<8x128xf32> to vector<8x128xbf16>
    %c0_47 = arith.constant 0 : index
    %c0_48 = arith.constant 0 : index
    %61 = vector.load %arg16[%c0_47, %c0_48] : memref<128x256xbf16, #tpu.memory_space<vmem>>, vector<128x256xbf16>
    %cst_49 = arith.constant dense<0.000000e+00> : vector<8x256xf32>
    %62 = tpu.matmul %60, %61, %cst_49 {dimension_numbers = #tpu.dot_dimension_numbers<[1], [0], [0], [1], [0, 0, 1, 1], [], []>} : vector<8x128xbf16>, vector<128x256xbf16>, vector<8x256xf32> -> vector<8x256xf32>
    %c0_50 = arith.constant 0 : index
    %c0_51 = arith.constant 0 : index
    %63 = vector.load %arg17[%c0_50, %c0_51] : memref<1x256xf32, #tpu.memory_space<vmem>>, vector<1x256xf32>
    %64 = vector.broadcast %63 : vector<1x256xf32> to vector<8x256xf32>
    %65 = arith.addf %62, %64 : vector<8x256xf32>
    %cst_52 = arith.constant 0.000000e+00 : f32
    %66 = vector.broadcast %cst_52 : f32 to vector<8x256xf32>
    %67 = arith.maximumf %65, %66 : vector<8x256xf32>
    %68 = arith.truncf %67 : vector<8x256xf32> to vector<8x256xbf16>
    %c0_53 = arith.constant 0 : index
    %c0_54 = arith.constant 0 : index
    %69 = vector.load %arg18[%c0_53, %c0_54] : memref<128x256xbf16, #tpu.memory_space<vmem>>, vector<128x256xbf16>
    %cst_55 = arith.constant dense<0.000000e+00> : vector<8x256xf32>
    %70 = tpu.matmul %1, %69, %cst_55 {dimension_numbers = #tpu.dot_dimension_numbers<[1], [0], [0], [1], [0, 0, 1, 1], [], []>} : vector<8x128xbf16>, vector<128x256xbf16>, vector<8x256xf32> -> vector<8x256xf32>
    %c0_56 = arith.constant 0 : index
    %c0_57 = arith.constant 0 : index
    %71 = vector.load %arg19[%c0_56, %c0_57] : memref<1x256xf32, #tpu.memory_space<vmem>>, vector<1x256xf32>
    %72 = vector.broadcast %71 : vector<1x256xf32> to vector<8x256xf32>
    %73 = arith.addf %70, %72 : vector<8x256xf32>
    %cst_58 = arith.constant 0.000000e+00 : f32
    %74 = vector.broadcast %cst_58 : f32 to vector<8x256xf32>
    %75 = arith.maximumf %73, %74 : vector<8x256xf32>
    %76 = arith.truncf %75 : vector<8x256xf32> to vector<8x256xbf16>
    %c0_59 = arith.constant 0 : index
    %c0_60 = arith.constant 0 : index
    %77 = vector.load %arg20[%c0_59, %c0_60] : memref<256x512xbf16, #tpu.memory_space<vmem>>, vector<256x512xbf16>
    %cst_61 = arith.constant dense<0.000000e+00> : vector<8x512xf32>
    %78 = tpu.matmul %68, %77, %cst_61 {dimension_numbers = #tpu.dot_dimension_numbers<[1], [0], [0], [1], [0, 0, 1, 1], [], []>} : vector<8x256xbf16>, vector<256x512xbf16>, vector<8x512xf32> -> vector<8x512xf32>
    %c0_62 = arith.constant 0 : index
    %c0_63 = arith.constant 0 : index
    %79 = vector.load %arg21[%c0_62, %c0_63] : memref<256x512xbf16, #tpu.memory_space<vmem>>, vector<256x512xbf16>
    %cst_64 = arith.constant dense<0.000000e+00> : vector<8x512xf32>
    %80 = tpu.matmul %76, %79, %cst_64 {dimension_numbers = #tpu.dot_dimension_numbers<[1], [0], [0], [1], [0, 0, 1, 1], [], []>} : vector<8x256xbf16>, vector<256x512xbf16>, vector<8x512xf32> -> vector<8x512xf32>
    %81 = arith.addf %78, %80 : vector<8x512xf32>
    %c0_65 = arith.constant 0 : index
    %c0_66 = arith.constant 0 : index
    %82 = vector.load %arg22[%c0_65, %c0_66] : memref<1x512xf32, #tpu.memory_space<vmem>>, vector<1x512xf32>
    %83 = vector.broadcast %82 : vector<1x512xf32> to vector<8x512xf32>
    %84 = arith.addf %81, %83 : vector<8x512xf32>
    %cst_67 = arith.constant 0.000000e+00 : f32
    %85 = vector.broadcast %cst_67 : f32 to vector<8x512xf32>
    %86 = arith.maximumf %84, %85 : vector<8x512xf32>
    %87 = arith.truncf %86 : vector<8x512xf32> to vector<8x512xbf16>
    %c0_68 = arith.constant 0 : index
    %c0_69 = arith.constant 0 : index
    %88 = vector.load %arg23[%c0_68, %c0_69] : memref<512x1024xbf16, #tpu.memory_space<vmem>>, vector<512x1024xbf16>
    %cst_70 = arith.constant dense<0.000000e+00> : vector<8x1024xf32>
    %89 = tpu.matmul %87, %88, %cst_70 {dimension_numbers = #tpu.dot_dimension_numbers<[1], [0], [0], [1], [0, 0, 1, 1], [], []>} : vector<8x512xbf16>, vector<512x1024xbf16>, vector<8x1024xf32> -> vector<8x1024xf32>
    %c0_71 = arith.constant 0 : index
    %c0_72 = arith.constant 0 : index
    %90 = vector.load %arg24[%c0_71, %c0_72] : memref<1x1024xf32, #tpu.memory_space<vmem>>, vector<1x1024xf32>
    %91 = vector.broadcast %90 : vector<1x1024xf32> to vector<8x1024xf32>
    %92 = arith.addf %89, %91 : vector<8x1024xf32>
    %cst_73 = arith.constant 0.000000e+00 : f32
    %93 = vector.broadcast %cst_73 : f32 to vector<8x1024xf32>
    %94 = arith.maximumf %92, %93 : vector<8x1024xf32>
    %95 = arith.truncf %94 : vector<8x1024xf32> to vector<8x1024xbf16>
    %c0_74 = arith.constant 0 : index
    %c0_75 = arith.constant 0 : index
    %96 = vector.load %arg25[%c0_74, %c0_75] : memref<1024x128xbf16, #tpu.memory_space<vmem>>, vector<1024x128xbf16>
    %cst_76 = arith.constant dense<0.000000e+00> : vector<8x128xf32>
    %97 = tpu.matmul %95, %96, %cst_76 {dimension_numbers = #tpu.dot_dimension_numbers<[1], [0], [0], [1], [0, 0, 1, 1], [], []>} : vector<8x1024xbf16>, vector<1024x128xbf16>, vector<8x128xf32> -> vector<8x128xf32>
    %c0_77 = arith.constant 0 : index
    %c0_78 = arith.constant 0 : index
    %98 = vector.load %arg26[%c0_77, %c0_78] : memref<1x128xf32, #tpu.memory_space<vmem>>, vector<1x128xf32>
    %99 = vector.broadcast %98 : vector<1x128xf32> to vector<8x128xf32>
    %100 = arith.addf %97, %99 : vector<8x128xf32>
    %c0_79 = arith.constant 0 : index
    %c0_80 = arith.constant 0 : index
    %101 = vector.load %arg29[%c0_79, %c0_80] : memref<8x128xf32, #tpu.memory_space<vmem>>, vector<8x128xf32>
    tpu.vector_store %arg29[%c0_79, %c0_80], %100 {strides = array<i32>} : memref<8x128xf32, #tpu.memory_space<vmem>>, vector<8x128xf32>,
    return
  }
}

</mosaic_0001>

<bundles_post_ra>
// kernel: cvae_forward.1
= control target key start
LH: loop header
LB: loop body
LE: loop exit
PB: predicated region body
PF: predicated region fallthrough
CT: control target
= control target key end

     0   :  { %s11840_s6 = smov 1   ;;  %s11841_s10 = smov 2   ;;  %s12376_s0 = inlined_call_operand.smem [shape: u32[30], index: -1, kind: input, shape index: {}] }
   0x1   :  { %s11909_s5 = sld [smem:[%s12376_s0]]   ;;  %s11842_s14 = smov 3  }
   0x2   :  { %s11914_s9 = sld [smem:[%s12376_s0 + %s11840_s6]]   ;;  %s11843_s18 = smov 4  }
   0x3   :  { %s11919_s13 = sld [smem:[%s12376_s0 + %s11841_s10]]   ;;  %s11844_s22 = smov 5  }
   0x4   :  { %s11924_s17 = sld [smem:[%s12376_s0 + %s11842_s14]]   ;;  %s11845_s26 = smov 6  }
   0x5   :  { %s11929_s21 = sld [smem:[%s12376_s0 + %s11843_s18]]   ;;  %s11846_s30 = smov 7  }
   0x6   :  { %s11934_s25 = sld [smem:[%s12376_s0 + %s11844_s22]]   ;;  %s11847_s4 = smov 8  }
   0x7   :  { %12385 = sst [smem:[#allocation51_spill]] %s11909_s5  ;;  %s11848_s10 = smov 9  }
   0x8   :  { %12386 = sst [smem:[#allocation52_spill]] %s11914_s9  ;;  %s11849_s15 = smov 10  }
   0x9   :  { %12387 = sst [smem:[#allocation53_spill]] %s11919_s13  ;;  %s11850_s20 = smov 11  }
   0xa   :  { %s11939_s29 = sld [smem:[%s12376_s0 + %s11845_s26]]   ;;  %s11851_s26 = smov 12  }
   0xb   :  { %12388 = sst [smem:[#allocation54_spill]] %s11929_s21  ;;  %s11852_s1 = smov 13  }
   0xc   :  { %s11944_s3 = sld [smem:[%s12376_s0 + %s11846_s30]]   ;;  %s11853_s7 = smov 14  }
   0xd   :  { %s11949_s8 = sld [smem:[%s12376_s0 + %s11847_s4]]   ;;  %s11855_s22 = smov 16  }
   0xe   :  { %s11954_s14 = sld [smem:[%s12376_s0 + %s11848_s10]]   ;;  %s11856_s28 = smov 17  }
   0xf   :  { %s11959_s19 = sld [smem:[%s12376_s0 + %s11849_s15]]   ;;  %s11854_s15 = smov 15  }
  0x10   :  { %12389 = sst [smem:[#allocation55_spill]] %s11939_s29 }
  0x11   :  { %s11964_s24 = sld [smem:[%s12376_s0 + %s11850_s20]]  }
  0x12   :  { %s11969_s30 = sld [smem:[%s12376_s0 + %s11851_s26]]  }
  0x13   :  { %s11974_s6 = sld [smem:[%s12376_s0 + %s11852_s1]]  }
  0x14   :  { %12390 = sst [smem:[#allocation56_spill]] %s11954_s14 }
  0x15   :  { %s11979_s12 = sld [smem:[%s12376_s0 + %s11853_s7]]   ;;  %s11857_s7 = smov 18  }
  0x16   :  { %s11984_s20 = sld [smem:[%s12376_s0 + %s11854_s15]]   ;;  %s11858_s15 = smov 19  }
  0x17   :  { %s11989_s27 = sld [smem:[%s12376_s0 + %s11855_s22]]   ;;  %s11859_s22 = smov 20  }
  0x18   :  { %s11994_s4 = sld [smem:[%s12376_s0 + %s11856_s28]]   ;;  %s11860_s28 = smov 21  }
  0x19   :  { %s11999_s13 = sld [smem:[%s12376_s0 + %s11857_s7]]   ;;  %s11861_s7 = smov 22  }
  0x1a   :  { %s12004_s29 = sld [smem:[%s12376_s0 + %s11858_s15]]   ;;  %s11862_s15 = smov 23  }
  0x1b   :  { %s12009_s9 = sld [smem:[%s12376_s0 + %s11859_s22]]   ;;  %s11863_s22 = smov 24  }
  0x1c   :  { %s12014_s14 = sld [smem:[%s12376_s0 + %s11860_s28]]   ;;  %s11864_s28 = smov 25  }
  0x1d   :  { %12391 = sst [smem:[#allocation57_spill]] %s11989_s27 }
  0x1e   :  { %s12019_s21 = sld [smem:[%s12376_s0 + %s11861_s7]]   ;;  %s11865_s7 = smov 26  }
  0x1f   :  { %12392 = sst [smem:[#allocation58_spill]] %s11999_s13 }
  0x20   :  { %s12024_s5 = sld [smem:[%s12376_s0 + %s11862_s15]]   ;;  %s11866_s15 = smov 27  }
  0x21   :  { %12393 = sst [smem:[#allocation59_spill]] %s12009_s9 }
  0x22   :  { %s12029_s9 = sld [smem:[%s12376_s0 + %s11863_s22]]   ;;  %s11867_s22 = smov 28  }
  0x23   :  { %s12034_s13 = sld [smem:[%s12376_s0 + %s11864_s28]]   ;;  %s11868_s28 = smov 29  }
  0x24   :  { %12394 = sst [smem:[#allocation60_spill]] %s12019_s21 }
  0x25   :  { %s12039_s21 = sld [smem:[%s12376_s0 + %s11865_s7]]  }
  0x26   :  { %s12044_s27 = sld [smem:[%s12376_s0 + %s11866_s15]]  }
  0x28   :  { %12395 = sst [smem:[#allocation61_spill]] %s12029_s9 }
  0x29   :  { %12396 = sst [smem:[#allocation62_spill]] %s12034_s13 }
  0x2a   :  { %s12049_s9 = sld [smem:[%s12376_s0 + %s11867_s22]]  }
  0x2b   :  { %s12054_s13 = sld [smem:[%s12376_s0 + %s11868_s28]]  }
  0x2c   :  { %65 = vsyncpa [#allocation3], 0 }
  0x2d   :  { %66 = vsyncpa [#allocation6], 0 }
  0x2e   :  { %67 = vsyncpa [#allocation9], 0 }
  0x2f   :  { %68 = vsyncpa [#allocation12], 0 }
  0x30   :  { %69 = vsyncpa [#allocation15], 0 }
  0x31   :  { %70 = vsyncpa [#allocation18], 0 }
  0x32   :  { %71 = vsyncpa [#allocation21], 0 }
  0x33   :  { %72 = vsyncpa [#allocation24], 0 }
  0x34   :  { %73 = vsyncpa [#allocation27], 0 }
  0x35   :  { %74 = vsyncpa [#allocation30], 0 }
  0x36   :  { %75 = vsyncpa [#allocation33], 0 }
  0x37   :  { %76 = vsyncpa [#allocation4], 0 }
  0x38   :  { %77 = vsyncpa [#allocation36], 0  ;;  %s11869_s7 = smov [#allocation5]   ;;  %s11308_s0 = scalar_lea.hbm %s11934_s25, 32768 }
  0x39   :  { %s103_s10 = sshll.u32 %s11869_s7, 4  ;;  %p11309_p0 = scmp.ne.s32.totalorder %s11934_s25, %s11308_s0  ;;  %s104_s10 = int_to_ptr.vmem [resolvable:$true] %s103_s10 }
  0x3a   :  { %p11312_p1 = scmp.lt.u32.totalorder %s11308_s0, %s11934_s25 }
  0x3c   :  { %p11314_p2 = pnand %p11312_p1, %p11309_p0 }
  0x3e   :  { %11317 = shalt.err (!%p11314_p2)
}
  0x3f   :  { %s11318_s11 = scalar_lea.vmem %s104_s10, 32768  ;;  %p11323_p4 = scmp.lt.s32.totalorder %s104_s10, %s104_s10 }
  0x40   :  { %p11319_p3 = scmp.ne.s32.totalorder %s104_s10, %s11318_s11  ;;  %p11324_p5 = scmp.lt.s32.totalorder %s11318_s11, %s11318_s11 }
  0x42   :  { %p11325_p6 = por %p11324_p5, %p11323_p4 }
  0x44   :  { %p11326_p7 = pnand %p11325_p6, %p11319_p3 }
  0x46   :  { %11329 = shalt.err (!%p11326_p7)
}
  0x47   :  { %s11870_s15 = smov 256   ;;  %s11871_s16 = smov 16  }
  0x48   :  { %109 = dma.hbm_to_vmem [thread:$0]  %s11934_s25, 32768, %s104_s10, [#allocation6], %s11870_s15, %s11870_s15, %s11871_s16  }
  0x49   :  { %s11872_s18 = smov [#allocation8]   ;;  %s11873_s23 = smov [#allocation11]  }
  0x4a   :  { %s130_s22 = sshll.u32 %s11872_s18, 4  ;;  %s151_s26 = sshll.u32 %s11873_s23, 4  ;;  %s131_s22 = int_to_ptr.vmem [resolvable:$true] %s130_s22  ;;  %s152_s26 = int_to_ptr.vmem [resolvable:$true] %s151_s26 }
  0x4b   :  { %s11330_s28 = scalar_lea.hbm %s11949_s8, 32 }
  0x4c   :  { %p11331_p8 = scmp.ne.s32.totalorder %s11949_s8, %s11330_s28  ;;  %p11334_p9 = scmp.lt.u32.totalorder %s11330_s28, %s11949_s8 }
  0x4e   :  { %p11336_p10 = pnand %p11334_p9, %p11331_p8 }
  0x50   :  { %11339 = shalt.err (!%p11336_p10)
}
  0x51   :  { %s11340_s1 = scalar_lea.vmem %s131_s22, 32  ;;  %p11345_p12 = scmp.lt.s32.totalorder %s131_s22, %s131_s22 }
  0x52   :  { %p11341_p11 = scmp.ne.s32.totalorder %s131_s22, %s11340_s1  ;;  %p11346_p13 = scmp.lt.s32.totalorder %s11340_s1, %s11340_s1 }
  0x54   :  { %p11347_p0 = por %p11346_p13, %p11345_p12 }
  0x56   :  { %p11348_p1 = pnand %p11347_p0, %p11341_p11 }
  0x58   :  { %11351 = shalt.err (!%p11348_p1)
}
  0x59   :  { %133 = dma.hbm_to_vmem [thread:$0]  %s11949_s8, 32, %s131_s22, [#allocation9]  }
  0x5a   :  { %s11352_s25 = scalar_lea.hbm %s11964_s24, 8192 }
  0x5b   :  { %p11353_p2 = scmp.ne.s32.totalorder %s11964_s24, %s11352_s25  ;;  %p11356_p3 = scmp.lt.u32.totalorder %s11352_s25, %s11964_s24 }
  0x5d   :  { %p11358_p4 = pnand %p11356_p3, %p11353_p2 }
  0x5f   :  { %11361 = shalt.err (!%p11358_p4)
}
  0x60   :  { %s11362_s2 = scalar_lea.vmem %s152_s26, 8192  ;;  %p11367_p6 = scmp.lt.s32.totalorder %s152_s26, %s152_s26 }
  0x61   :  { %p11363_p5 = scmp.ne.s32.totalorder %s152_s26, %s11362_s2  ;;  %p11368_p7 = scmp.lt.s32.totalorder %s11362_s2, %s11362_s2 }
  0x63   :  { %p11369_p8 = por %p11368_p7, %p11367_p6 }
  0x65   :  { %p11370_p9 = pnand %p11369_p8, %p11363_p5 }
  0x67   :  { %11373 = shalt.err (!%p11370_p9)
}
  0x68   :  { %157 = dma.hbm_to_vmem [thread:$0]  %s11964_s24, 8192, %s152_s26, [#allocation12], %s11870_s15, %s11870_s15, %s11871_s16  }
  0x69   :  { %s11874_s8 = smov [#allocation14]   ;;  %s11875_s10 = smov [#allocation17]  }
  0x6a   :  { %s176_s7 = sshll.u32 %s11874_s8, 4  ;;  %s198_s0 = sshll.u32 %s11875_s10, 4  ;;  %s177_s7 = int_to_ptr.vmem [resolvable:$true] %s176_s7  ;;  %s199_s0 = int_to_ptr.vmem [resolvable:$true] %s198_s0 }
  0x6b   :  { %s11374_s11 = scalar_lea.hbm %s11974_s6, 64 }
  0x6c   :  { %p11375_p10 = scmp.ne.s32.totalorder %s11974_s6, %s11374_s11  ;;  %p11378_p11 = scmp.lt.u32.totalorder %s11374_s11, %s11974_s6 }
  0x6e   :  { %p11380_p12 = pnand %p11378_p11, %p11375_p10 }
  0x70   :  { %11383 = shalt.err (!%p11380_p12)
}
  0x71   :  { %s11384_s18 = scalar_lea.vmem %s177_s7, 64  ;;  %p11389_p0 = scmp.lt.s32.totalorder %s177_s7, %s177_s7 }
  0x72   :  { %p11385_p13 = scmp.ne.s32.totalorder %s177_s7, %s11384_s18  ;;  %p11390_p1 = scmp.lt.s32.totalorder %s11384_s18, %s11384_s18 }
  0x74   :  { %p11391_p2 = por %p11390_p1, %p11389_p0 }
  0x76   :  { %p11392_p3 = pnand %p11391_p2, %p11385_p13 }
  0x78   :  { %11395 = shalt.err (!%p11392_p3)
}
  0x79   :  { %179 = dma.hbm_to_vmem [thread:$0]  %s11974_s6, 64, %s177_s7, [#allocation15]  }
  0x7a   :  { %s11396_s24 = scalar_lea.hbm %s11984_s20, 32 }
  0x7b   :  { %p11397_p4 = scmp.ne.s32.totalorder %s11984_s20, %s11396_s24  ;;  %p11400_p5 = scmp.lt.u32.totalorder %s11396_s24, %s11984_s20 }
  0x7d   :  { %p11402_p6 = pnand %p11400_p5, %p11397_p4 }
  0x7f   :  { %11405 = shalt.err (!%p11402_p6)
}
  0x80   :  { %s11406_s22 = scalar_lea.vmem %s199_s0, 32  ;;  %p11411_p8 = scmp.lt.s32.totalorder %s199_s0, %s199_s0 }
  0x81   :  { %p11407_p7 = scmp.ne.s32.totalorder %s199_s0, %s11406_s22  ;;  %p11412_p9 = scmp.lt.s32.totalorder %s11406_s22, %s11406_s22 }
  0x83   :  { %p11413_p10 = por %p11412_p9, %p11411_p8 }
  0x85   :  { %p11414_p11 = pnand %p11413_p10, %p11407_p7 }
  0x87   :  { %11417 = shalt.err (!%p11414_p11)
}
  0x88   :  { %201 = dma.hbm_to_vmem [thread:$0]  %s11984_s20, 32, %s199_s0, [#allocation18]  }
  0x89   :  { %s11876_s23 = smov [#allocation20]   ;;  %s11877_s26 = smov [#allocation23]  }
  0x8a   :  { %s220_s6 = sshll.u32 %s11876_s23, 4  ;;  %s242_s28 = sshll.u32 %s11877_s26, 4  ;;  %s221_s6 = int_to_ptr.vmem [resolvable:$true] %s220_s6  ;;  %s243_s28 = int_to_ptr.vmem [resolvable:$true] %s242_s28 }
  0x8b   :  { %s11418_s1 = scalar_lea.hbm %s11994_s4, 32 }
  0x8c   :  { %p11419_p12 = scmp.ne.s32.totalorder %s11994_s4, %s11418_s1  ;;  %p11422_p13 = scmp.lt.u32.totalorder %s11418_s1, %s11994_s4 }
  0x8e   :  { %p11424_p0 = pnand %p11422_p13, %p11419_p12 }
  0x90   :  { %11427 = shalt.err (!%p11424_p0)
}
  0x91   :  { %s11428_s25 = scalar_lea.vmem %s221_s6, 32  ;;  %p11433_p2 = scmp.lt.s32.totalorder %s221_s6, %s221_s6 }
  0x92   :  { %p11429_p1 = scmp.ne.s32.totalorder %s221_s6, %s11428_s25  ;;  %p11434_p3 = scmp.lt.s32.totalorder %s11428_s25, %s11428_s25 }
  0x94   :  { %p11435_p4 = por %p11434_p3, %p11433_p2 }
  0x96   :  { %p11436_p5 = pnand %p11435_p4, %p11429_p1 }
  0x98   :  { %11439 = shalt.err (!%p11436_p5)
}
  0x99   :  { %223 = dma.hbm_to_vmem [thread:$0]  %s11994_s4, 32, %s221_s6, [#allocation21]  }
  0x9a   :  { %s11440_s20 = scalar_lea.hbm %s12004_s29, 32 }
  0x9b   :  { %p11441_p6 = scmp.ne.s32.totalorder %s12004_s29, %s11440_s20  ;;  %p11444_p7 = scmp.lt.u32.totalorder %s11440_s20, %s12004_s29 }
  0x9d   :  { %p11446_p8 = pnand %p11444_p7, %p11441_p6 }
  0x9f   :  { %11449 = shalt.err (!%p11446_p8)
}
  0xa0   :  { %s11450_s2 = scalar_lea.vmem %s243_s28, 32  ;;  %p11455_p10 = scmp.lt.s32.totalorder %s243_s28, %s243_s28 }
  0xa1   :  { %p11451_p9 = scmp.ne.s32.totalorder %s243_s28, %s11450_s2  ;;  %p11456_p11 = scmp.lt.s32.totalorder %s11450_s2, %s11450_s2 }
  0xa3   :  { %p11457_p12 = por %p11456_p11, %p11455_p10 }
  0xa5   :  { %p11458_p13 = pnand %p11457_p12, %p11451_p9 }
  0xa7   :  { %11461 = shalt.err (!%p11458_p13)
}
  0xa8   :  { %245 = dma.hbm_to_vmem [thread:$0]  %s12004_s29, 32, %s243_s28, [#allocation24]  }
  0xa9   :  { %s11878_s8 = smov [#allocation26]   ;;  %s11462_s7 = scalar_lea.hbm %s12014_s14, 8192 }
  0xaa   :  { %s263_s4 = sshll.u32 %s11878_s8, 4  ;;  %p11463_p0 = scmp.ne.s32.totalorder %s12014_s14, %s11462_s7  ;;  %s264_s4 = int_to_ptr.vmem [resolvable:$true] %s263_s4 }
  0xab   :  { %p11466_p1 = scmp.lt.u32.totalorder %s11462_s7, %s12014_s14 }
  0xad   :  { %p11468_p2 = pnand %p11466_p1, %p11463_p0 }
  0xaf   :  { %11471 = shalt.err (!%p11468_p2)
}
  0xb0   :  { %s11472_s10 = scalar_lea.vmem %s264_s4, 8192  ;;  %p11477_p4 = scmp.lt.s32.totalorder %s264_s4, %s264_s4 }
  0xb1   :  { %p11473_p3 = scmp.ne.s32.totalorder %s264_s4, %s11472_s10  ;;  %p11478_p5 = scmp.lt.s32.totalorder %s11472_s10, %s11472_s10 }
  0xb3   :  { %p11479_p6 = por %p11478_p5, %p11477_p4 }
  0xb5   :  { %p11480_p7 = pnand %p11479_p6, %p11473_p3 }
  0xb7   :  { %11483 = shalt.err (!%p11480_p7)
}
  0xb8   :  { %269 = dma.hbm_to_vmem [thread:$0]  %s12014_s14, 8192, %s264_s4, [#allocation27], %s11870_s15, %s11870_s15, %s11871_s16  }
  0xb9   :  { %s11879_s29 = smov [#allocation29]   ;;  %s11880_s11 = smov [#allocation2]  }
  0xba   :  { %s285_s0 = sshll.u32 %s11879_s29, 4  ;;  %s89_s18 = sshll.u32 %s11880_s11, 4  ;;  %s286_s0 = int_to_ptr.vmem [resolvable:$true] %s285_s0  ;;  %s12097_s18 = int_to_ptr.vmem [resolvable:$true] %s89_s18 }
  0xbb   :  { %s11484_s24 = scalar_lea.hbm %s12024_s5, 32768 }
  0xbc   :  { %p11485_p8 = scmp.ne.s32.totalorder %s12024_s5, %s11484_s24  ;;  %p11488_p9 = scmp.lt.u32.totalorder %s11484_s24, %s12024_s5 }
  0xbe   :  { %p11490_p10 = pnand %p11488_p9, %p11485_p8 }
  0xc0   :  { %11493 = shalt.err (!%p11490_p10)
}
  0xc1   :  { %s11494_s22 = scalar_lea.vmem %s286_s0, 32768  ;;  %p11499_p12 = scmp.lt.s32.totalorder %s286_s0, %s286_s0 }
  0xc2   :  { %p11495_p11 = scmp.ne.s32.totalorder %s286_s0, %s11494_s22  ;;  %p11500_p13 = scmp.lt.s32.totalorder %s11494_s22, %s11494_s22 }
  0xc4   :  { %p11501_p0 = por %p11500_p13, %p11499_p12 }
  0xc6   :  { %p11502_p1 = pnand %p11501_p0, %p11495_p11 }
  0xc8   :  { %11505 = shalt.err (!%p11502_p1)
}
  0xc9   :  { %s11881_s14 = smov 512   ;;  %s11882_s23 = smov 32  }
  0xca   :  { %291 = dma.hbm_to_vmem [thread:$0]  %s12024_s5, 32768, %s286_s0, [#allocation30], %s11881_s14, %s11881_s14, %s11882_s23  }
  0xcb   :  { %s11506_s6 = scalar_lea.hbm %s11924_s17, 8192 }
  0xcc   :  { %p11507_p2 = scmp.ne.s32.totalorder %s11924_s17, %s11506_s6  ;;  %p11510_p3 = scmp.lt.u32.totalorder %s11506_s6, %s11924_s17 }
  0xce   :  { %p11512_p4 = pnand %p11510_p3, %p11507_p2 }
  0xd0   :  { %11515 = shalt.err (!%p11512_p4)
}
  0xd1   :  { %s11516_s26 = scalar_lea.vmem %s12097_s18, 8192  ;;  %p11521_p6 = scmp.lt.s32.totalorder %s12097_s18, %s12097_s18 }
  0xd2   :  { %p11517_p5 = scmp.ne.s32.totalorder %s12097_s18, %s11516_s26  ;;  %p11522_p7 = scmp.lt.s32.totalorder %s11516_s26, %s11516_s26 }
  0xd4   :  { %p11523_p8 = por %p11522_p7, %p11521_p6 }
  0xd6   :  { %p11524_p9 = pnand %p11523_p8, %p11517_p5 }
  0xd8   :  { %11527 = shalt.err (!%p11524_p9)
}
  0xd9   :  { %95 = dma.hbm_to_vmem [thread:$0]  %s11924_s17, 8192, %s12097_s18, [#allocation3], %s11881_s14, %s11881_s14, %s11882_s23  }
  0xda   :  { %s11883_s5 = smov [#allocation7]   ;;  %s11528_s1 = scalar_lea.hbm %s11944_s3, 8192 }
  0xdb   :  { %s117_s28 = sshll.u32 %s11883_s5, 4  ;;  %p11529_p10 = scmp.ne.s32.totalorder %s11944_s3, %s11528_s1  ;;  %s118_s28 = int_to_ptr.vmem [resolvable:$true] %s117_s28 }
  0xdc   :  { %p11532_p11 = scmp.lt.u32.totalorder %s11528_s1, %s11944_s3 }
  0xde   :  { %p11534_p12 = pnand %p11532_p11, %p11529_p10 }
  0xe0   :  { %11537 = shalt.err (!%p11534_p12)
}
  0xe1   :  { %s11538_s25 = scalar_lea.vmem %s118_s28, 8192  ;;  %p11543_p0 = scmp.lt.s32.totalorder %s118_s28, %s118_s28 }
  0xe2   :  { %p11539_p13 = scmp.ne.s32.totalorder %s118_s28, %s11538_s25  ;;  %p11544_p1 = scmp.lt.s32.totalorder %s11538_s25, %s11538_s25 }
  0xe4   :  { %p11545_p2 = por %p11544_p1, %p11543_p0 }
  0xe6   :  { %p11546_p3 = pnand %p11545_p2, %p11539_p13 }
  0xe8   :  { %11549 = shalt.err (!%p11546_p3)
}
  0xe9   :  { %s11884_s20 = smov 128   ;;  %s11885_s17 = smov 8  }
  0xea   :  { %123 = dma.hbm_to_vmem [thread:$0]  %s11944_s3, 8192, %s118_s28, [#allocation6], %s11884_s20, %s11884_s20, %s11885_s17  }
  0xeb   :  { %s11886_s2 = smov [#allocation10]   ;;  %s11887_s4 = smov [#allocation13]  }
  0xec   :  { %s142_s8 = sshll.u32 %s11886_s2, 4  ;;  %s163_s7 = sshll.u32 %s11887_s4, 4  ;;  %s143_s8 = int_to_ptr.vmem [resolvable:$true] %s142_s8  ;;  %s164_s7 = int_to_ptr.vmem [resolvable:$true] %s163_s7 }
  0xed   :  { %s11550_s10 = scalar_lea.hbm %s11959_s19, 32 }
  0xee   :  { %p11551_p4 = scmp.ne.s32.totalorder %s11959_s19, %s11550_s10  ;;  %p11554_p5 = scmp.lt.u32.totalorder %s11550_s10, %s11959_s19 }
  0xf0   :  { %p11556_p6 = pnand %p11554_p5, %p11551_p4 }
  0xf2   :  { %11559 = shalt.err (!%p11556_p6)
}
  0xf3   :  { %s11560_s29 = scalar_lea.vmem %s143_s8, 32  ;;  %p11565_p8 = scmp.lt.s32.totalorder %s143_s8, %s143_s8 }
  0xf4   :  { %p11561_p7 = scmp.ne.s32.totalorder %s143_s8, %s11560_s29  ;;  %p11566_p9 = scmp.lt.s32.totalorder %s11560_s29, %s11560_s29 }
  0xf6   :  { %p11567_p10 = por %p11566_p9, %p11565_p8 }
  0xf8   :  { %p11568_p11 = pnand %p11567_p10, %p11561_p7 }
  0xfa   :  { %11571 = shalt.err (!%p11568_p11)
}
  0xfb   :  { %145 = dma.hbm_to_vmem [thread:$0]  %s11959_s19, 32, %s143_s8, [#allocation9]  }
  0xfc   :  { %s11572_s3 = scalar_lea.hbm %s11969_s30, 8192 }
  0xfd   :  { %p11573_p12 = scmp.ne.s32.totalorder %s11969_s30, %s11572_s3  ;;  %p11576_p13 = scmp.lt.u32.totalorder %s11572_s3, %s11969_s30 }
  0xff   :  { %p11578_p0 = pnand %p11576_p13, %p11573_p12 }
 0x101   :  { %11581 = shalt.err (!%p11578_p0)
}
 0x102   :  { %s11582_s0 = scalar_lea.vmem %s164_s7, 8192  ;;  %p11587_p2 = scmp.lt.s32.totalorder %s164_s7, %s164_s7 }
 0x103   :  { %p11583_p1 = scmp.ne.s32.totalorder %s164_s7, %s11582_s0  ;;  %p11588_p3 = scmp.lt.s32.totalorder %s11582_s0, %s11582_s0 }
 0x105   :  { %p11589_p4 = por %p11588_p3, %p11587_p2 }
 0x107   :  { %p11590_p5 = pnand %p11589_p4, %p11583_p1 }
 0x109   :  { %11593 = shalt.err (!%p11590_p5)
}
 0x10a   :  { %169 = dma.hbm_to_vmem [thread:$0]  %s11969_s30, 8192, %s164_s7, [#allocation12], %s11870_s15, %s11870_s15, %s11871_s16  }
 0x10b   :  { %s11888_s19 = smov [#allocation16]   ;;  %s11889_s18 = smov [#allocation19]  }
 0x10c   :  { %s185_s11 = sshll.u32 %s11888_s19, 4  ;;  %s207_s24 = sshll.u32 %s11889_s18, 4  ;;  %s186_s11 = int_to_ptr.vmem [resolvable:$true] %s185_s11  ;;  %s208_s24 = int_to_ptr.vmem [resolvable:$true] %s207_s24 }
 0x10d   :  { %s11594_s22 = scalar_lea.hbm %s11979_s12, 8192 }
 0x10e   :  { %p11595_p6 = scmp.ne.s32.totalorder %s11979_s12, %s11594_s22  ;;  %p11598_p7 = scmp.lt.u32.totalorder %s11594_s22, %s11979_s12 }
 0x110   :  { %p11600_p8 = pnand %p11598_p7, %p11595_p6 }
 0x112   :  { %11603 = shalt.err (!%p11600_p8)
}
 0x113   :  { %s11604_s14 = scalar_lea.vmem %s186_s11, 8192  ;;  %p11609_p10 = scmp.lt.s32.totalorder %s186_s11, %s186_s11 }
 0x114   :  { %p11605_p9 = scmp.ne.s32.totalorder %s186_s11, %s11604_s14  ;;  %p11610_p11 = scmp.lt.s32.totalorder %s11604_s14, %s11604_s14 }
 0x116   :  { %p11611_p12 = por %p11610_p11, %p11609_p10 }
 0x118   :  { %p11612_p13 = pnand %p11611_p12, %p11605_p9 }
 0x11a   :  { %11615 = shalt.err (!%p11612_p13)
}
 0x11b   :  { %s12397_s30 = sld [smem:[#allocation57_spill]] }
 0x11c   :  { %191 = dma.hbm_to_vmem [thread:$0]  %s11979_s12, 8192, %s186_s11, [#allocation15], %s11884_s20, %s11884_s20, %s11885_s17  }
 0x121   :  { %s11616_s23 = scalar_lea.hbm %s12397_s30, 2048 }
 0x122   :  { %p11617_p0 = scmp.ne.s32.totalorder %s12397_s30, %s11616_s23  ;;  %p11620_p1 = scmp.lt.u32.totalorder %s11616_s23, %s12397_s30 }
 0x124   :  { %p11622_p2 = pnand %p11620_p1, %p11617_p0 }
 0x126   :  { %11625 = shalt.err (!%p11622_p2)
}
 0x127   :  { %s11626_s6 = scalar_lea.vmem %s208_s24, 2048  ;;  %p11631_p4 = scmp.lt.s32.totalorder %s208_s24, %s208_s24 }
 0x128   :  { %p11627_p3 = scmp.ne.s32.totalorder %s208_s24, %s11626_s6  ;;  %p11632_p5 = scmp.lt.s32.totalorder %s11626_s6, %s11626_s6 }
 0x12a   :  { %p11633_p6 = por %p11632_p5, %p11631_p4 }
 0x12c   :  { %p11634_p7 = pnand %p11633_p6, %p11627_p3 }
 0x12e   :  { %11637 = shalt.err (!%p11634_p7)
}
 0x12f   :  { %s12398_s26 = sld [smem:[#allocation58_spill]]  ;;  %s11890_s12 = smov [#allocation22]  }
 0x130   :  { %213 = dma.hbm_to_vmem [thread:$0]  %s12397_s30, 2048, %s208_s24, [#allocation18], %s11884_s20, %s11884_s20, %s11885_s17  }
 0x131   :  { %s229_s5 = sshll.u32 %s11890_s12, 4  ;;  %s11891_s28 = smov [#allocation25]   ;;  %s230_s5 = int_to_ptr.vmem [resolvable:$true] %s229_s5 }
 0x132   :  { %s251_s1 = sshll.u32 %s11891_s28, 4  ;;  %s252_s1 = int_to_ptr.vmem [resolvable:$true] %s251_s1 }
 0x135   :  { %s11638_s25 = scalar_lea.hbm %s12398_s26, 2048 }
 0x136   :  { %p11639_p8 = scmp.ne.s32.totalorder %s12398_s26, %s11638_s25  ;;  %p11642_p9 = scmp.lt.u32.totalorder %s11638_s25, %s12398_s26 }
 0x138   :  { %p11644_p10 = pnand %p11642_p9, %p11639_p8 }
 0x13a   :  { %11647 = shalt.err (!%p11644_p10)
}
 0x13b   :  { %s11648_s2 = scalar_lea.vmem %s230_s5, 2048  ;;  %p11653_p12 = scmp.lt.s32.totalorder %s230_s5, %s230_s5 }
 0x13c   :  { %p11649_p11 = scmp.ne.s32.totalorder %s230_s5, %s11648_s2  ;;  %p11654_p13 = scmp.lt.s32.totalorder %s11648_s2, %s11648_s2 }
 0x13e   :  { %p11655_p0 = por %p11654_p13, %p11653_p12 }
 0x140   :  { %p11656_p1 = pnand %p11655_p0, %p11649_p11 }
 0x142   :  { %11659 = shalt.err (!%p11656_p1)
}
 0x143   :  { %s12399_s8 = sld [smem:[#allocation59_spill]] }
 0x144   :  { %235 = dma.hbm_to_vmem [thread:$0]  %s12398_s26, 2048, %s230_s5, [#allocation21], %s11884_s20, %s11884_s20, %s11885_s17  }
 0x149   :  { %s11660_s4 = scalar_lea.hbm %s12399_s8, 8192 }
 0x14a   :  { %p11661_p2 = scmp.ne.s32.totalorder %s12399_s8, %s11660_s4  ;;  %p11664_p3 = scmp.lt.u32.totalorder %s11660_s4, %s12399_s8 }
 0x14c   :  { %p11666_p4 = pnand %p11664_p3, %p11661_p2 }
 0x14e   :  { %11669 = shalt.err (!%p11666_p4)
}
 0x14f   :  { %s11670_s7 = scalar_lea.vmem %s252_s1, 8192  ;;  %p11675_p6 = scmp.lt.s32.totalorder %s252_s1, %s252_s1 }
 0x150   :  { %p11671_p5 = scmp.ne.s32.totalorder %s252_s1, %s11670_s7  ;;  %p11676_p7 = scmp.lt.s32.totalorder %s11670_s7, %s11670_s7 }
 0x152   :  { %p11677_p8 = por %p11676_p7, %p11675_p6 }
 0x154   :  { %p11678_p9 = pnand %p11677_p8, %p11671_p5 }
 0x156   :  { %11681 = shalt.err (!%p11678_p9)
}
 0x157   :  { %s12400_s10 = sld [smem:[#allocation60_spill]]  ;;  %s11892_s20 = smov [#allocation28]  }
 0x158   :  { %257 = dma.hbm_to_vmem [thread:$0]  %s12399_s8, 8192, %s252_s1, [#allocation24], %s11870_s15, %s11870_s15, %s11871_s16  }
 0x159   :  { %s276_s17 = sshll.u32 %s11892_s20, 4  ;;  %s11893_s29 = smov [#allocation31]   ;;  %s277_s17 = int_to_ptr.vmem [resolvable:$true] %s276_s17 }
 0x15a   :  { %s299_s3 = sshll.u32 %s11893_s29, 4  ;;  %s300_s3 = int_to_ptr.vmem [resolvable:$true] %s299_s3 }
 0x15d   :  { %s11682_s0 = scalar_lea.hbm %s12400_s10, 64 }
 0x15e   :  { %p11683_p10 = scmp.ne.s32.totalorder %s12400_s10, %s11682_s0  ;;  %p11686_p11 = scmp.lt.u32.totalorder %s11682_s0, %s12400_s10 }
 0x160   :  { %p11688_p12 = pnand %p11686_p11, %p11683_p10 }
 0x162   :  { %11691 = shalt.err (!%p11688_p12)
}
 0x163   :  { %s11692_s19 = scalar_lea.vmem %s277_s17, 64  ;;  %p11697_p0 = scmp.lt.s32.totalorder %s277_s17, %s277_s17 }
 0x164   :  { %p11693_p13 = scmp.ne.s32.totalorder %s277_s17, %s11692_s19  ;;  %p11698_p1 = scmp.lt.s32.totalorder %s11692_s19, %s11692_s19 }
 0x166   :  { %p11699_p2 = por %p11698_p1, %p11697_p0 }
 0x168   :  { %p11700_p3 = pnand %p11699_p2, %p11693_p13 }
 0x16a   :  { %11703 = shalt.err (!%p11700_p3)
}
 0x16b   :  { %s12401_s11 = sld [smem:[#allocation62_spill]] }
 0x16c   :  { %279 = dma.hbm_to_vmem [thread:$0]  %s12400_s10, 64, %s277_s17, [#allocation27]  }
 0x171   :  { %s11704_s15 = scalar_lea.hbm %s12401_s11, 8192 }
 0x172   :  { %p11705_p4 = scmp.ne.s32.totalorder %s12401_s11, %s11704_s15  ;;  %p11708_p5 = scmp.lt.u32.totalorder %s11704_s15, %s12401_s11 }
 0x174   :  { %p11710_p6 = pnand %p11708_p5, %p11705_p4 }
 0x176   :  { %11713 = shalt.err (!%p11710_p6)
}
 0x177   :  { %s11714_s16 = scalar_lea.vmem %s300_s3, 8192  ;;  %p11719_p8 = scmp.lt.s32.totalorder %s300_s3, %s300_s3 }
 0x178   :  { %p11715_p7 = scmp.ne.s32.totalorder %s300_s3, %s11714_s16  ;;  %p11720_p9 = scmp.lt.s32.totalorder %s11714_s16, %s11714_s16 }
 0x17a   :  { %p11721_p10 = por %p11720_p9, %p11719_p8 }
 0x17c   :  { %p11722_p11 = pnand %p11721_p10, %p11715_p7 }
 0x17e   :  { %11725 = shalt.err (!%p11722_p11)
}
 0x17f   :  { %s11894_s18 = smov 64   ;;  %s11895_s24 = smov 4  }
 0x180   :  { %305 = dma.hbm_to_vmem [thread:$0]  %s12401_s11, 8192, %s300_s3, [#allocation30], %s11894_s18, %s11894_s18, %s11895_s24  }
 0x181   :  { %s11896_s22 = smov [#allocation32]   ;;  %s11726_s30 = scalar_lea.hbm %s12039_s21, 16 }
 0x182   :  { %s312_s14 = sshll.u32 %s11896_s22, 4  ;;  %p11727_p12 = scmp.ne.s32.totalorder %s12039_s21, %s11726_s30  ;;  %s313_s14 = int_to_ptr.vmem [resolvable:$true] %s312_s14 }
 0x183   :  { %p11730_p13 = scmp.lt.u32.totalorder %s11726_s30, %s12039_s21 }
 0x185   :  { %p11732_p0 = pnand %p11730_p13, %p11727_p12 }
 0x187   :  { %11735 = shalt.err (!%p11732_p0)
}
 0x188   :  { %s11736_s23 = scalar_lea.vmem %s313_s14, 16  ;;  %s11740_s6 = scalar_lea.vmem %s313_s14, 32 }
 0x189   :  { %p11737_p1 = scmp.ne.s32.totalorder %s313_s14, %s11736_s23  ;;  %p11741_p2 = scmp.lt.s32.totalorder %s313_s14, %s313_s14 }
 0x18a   :  { %p11742_p3 = scmp.lt.s32.totalorder %s11740_s6, %s11736_s23 }
 0x18c   :  { %p11743_p4 = por %p11742_p3, %p11741_p2 }
 0x18e   :  { %p11744_p5 = pnand %p11743_p4, %p11737_p1 }
 0x190   :  { %11747 = shalt.err (!%p11744_p5)
}
 0x191   :  { %315 = dma.hbm_to_vmem [thread:$0]  %s12039_s21, 16, %s313_s14, [#allocation33]  }
 0x192   :  { %11814 = dma.done.wait [#allocation3], 8192  }
 0x193   :  { %11815 = vsyncadd [#allocation3], 4294959104 }
 0x194   :  { %11816 = dma.done.wait [#allocation6], 40960  }
 0x195   :  { %11817 = vsyncadd [#allocation6], 4294926336 }
 0x196   :  { %11818 = dma.done.wait [#allocation9], 64  }
 0x197   :  { %11819 = vsyncadd [#allocation9], 4294967232 }
 0x198   :  { %11820 = dma.done.wait [#allocation12], 16384  }
 0x199   :  { %11821 = vsyncadd [#allocation12], 4294950912 }
 0x19a   :  { %11822 = dma.done.wait [#allocation15], 8256  }
 0x19b   :  { %11823 = vsyncadd [#allocation15], 4294959040 }
 0x19c   :  { %11824 = dma.done.wait [#allocation18], 2080  }
 0x19d   :  { %11825 = vsyncadd [#allocation18], 4294965216 }
 0x19e   :  { %11826 = dma.done.wait [#allocation21], 2080  }
 0x19f   :  { %11827 = vsyncadd [#allocation21], 4294965216 }
 0x1a0   :  { %11828 = dma.done.wait [#allocation24], 8224  }
 0x1a1   :  { %11829 = vsyncadd [#allocation24], 4294959072 }
 0x1a2   :  { %11830 = dma.done.wait [#allocation27], 8256  }
 0x1a3   :  { %11831 = vsyncadd [#allocation27], 4294959040 }
 0x1a4   :  { %11832 = dma.done.wait [#allocation30], 40960  }
 0x1a5   :  { %11833 = vsyncadd [#allocation30], 4294926336 }
 0x1a6   :  { %11834 = dma.done.wait [#allocation33], 16  }
 0x1a7   :  { %11835 = vsyncadd [#allocation33], 4294967280  ;;  %v11897_v0 = vmov 0   ;;  %v379_v1 = vld [vmem:[#allocation2] sm:$0xff]  ;;  %v380_v14 = vld [vmem:[#allocation2 + $0x8] sm:$0xff]  ;;  %s12402_s21 = sld [smem:[#allocation51_spill]] }
 0x1a8   :  { %837 = vmatprep.mubr.bf16.mxu0 %v11897_v0  ;;  %878 = vmatprep.mubr.bf16.mxu1 %v11897_v0  ;;  %v383_v2 = vld [vmem:[#allocation2 + $0x20] sm:$0xff]  ;;  %v384_v15 = vld [vmem:[#allocation2 + $0x28] sm:$0xff]  ;;  %v381_v58 = vld [vmem:[#allocation2 + $0x10] sm:$0xff]  ;;  %s12403_s26 = sld [smem:[#allocation54_spill]]  ;;  %s12404_s12 = sld [smem:[#allocation56_spill]] }
 0x1a9   :  { %v387_v3 = vld [vmem:[#allocation2 + $0x40] sm:$0xff]  ;;  %v8923_v4 = vcombine.high %v379_v1, %v383_v2  ;;  %v8922_v5 = vcombine.low %v379_v1, %v383_v2  ;;  %v388_v16 = vld [vmem:[#allocation2 + $0x48] sm:$0xff]  ;;  %v8925_v18 = vcombine.high %v380_v14, %v384_v15  ;;  %v8924_v19 = vcombine.low %v380_v14, %v384_v15  ;;  %v385_v59 = vld [vmem:[#allocation2 + $0x30] sm:$0xff]  ;;  %s12405_s5 = sld [smem:[#allocation52_spill]]  ;;  %s12406_s28 = sld [smem:[#allocation55_spill]] }
 0x1aa   :  { %v391_v6 = vld [vmem:[#allocation2 + $0x60] sm:$0xff]  ;;  %v392_v17 = vld [vmem:[#allocation2 + $0x68] sm:$0xff]  ;;  %v8927_v1 = vcombine.high %v381_v58, %v385_v59  ;;  %v390_v15 = vld [vmem:[#allocation2 + $0x58] sm:$0xff]  ;;  %s12407_s1 = sld [smem:[#allocation53_spill]]  ;;  %s11898_s2 = smov [#allocation35]  }
 0x1ab   :  { %v8931_v7 = vcombine.high %v387_v3, %v391_v6  ;;  %v395_v8 = vld [vmem:[#allocation2 + $0x80] sm:$0xff]  ;;  %805 = vmatprep.subr.bf16.mxu0 %v8923_v4  ;;  %v8930_v10 = vcombine.low %v387_v3, %v391_v6  ;;  %v8933_v20 = vcombine.high %v388_v16, %v392_v17  ;;  %v396_v22 = vld [vmem:[#allocation2 + $0x88] sm:$0xff]  ;;  %846 = vmatprep.subr.bf16.mxu1 %v8925_v18  ;;  %v389_v4 = vld [vmem:[#allocation2 + $0x50] sm:$0xff]  ;;  %s12408_s25 = sld [smem:[#allocation61_spill]]  ;;  %s8857_s8 = sshll.u32 %s11898_s2, 4  ;;  %s8858_s8 = int_to_ptr.vmem [resolvable:$true] %s8857_s8 }
 0x1ac   :  { %v399_v9 = vld [vmem:[#allocation2 + $0xa0] sm:$0xff]  ;;  %806 = vmatpush1.bf16.msra.mxu0 %v8922_v5  ;;  %v400_v23 = vld [vmem:[#allocation2 + $0xa8] sm:$0xff]  ;;  %847 = vmatpush1.bf16.msra.mxu1 %v8924_v19  ;;  %v8932_v27 = vcombine.low %v388_v16, %v392_v17  ;;  %v393_v5 = vld [vmem:[#allocation2 + $0x70] sm:$0xff]  ;;  %s11899_s4 = smov [#allocation34]   ;;  %s11748_s10 = scalar_lea.vmem %s8858_s8, 128 }
 0x1ad   :  { %807 = vmatprep.subr.bf16.mxu0 %v8931_v7  ;;  %v8939_v11 = vcombine.high %v395_v8, %v399_v9  ;;  %v403_v12 = vld [vmem:[#allocation2 + $0xc0] sm:$0xff]  ;;  %v8938_v21 = vcombine.low %v395_v8, %v399_v9  ;;  %848 = vmatprep.subr.bf16.mxu1 %v8933_v20  ;;  %v8941_v28 = vcombine.high %v396_v22, %v400_v23  ;;  %v404_v30 = vld [vmem:[#allocation2 + $0xc8] sm:$0xff]  ;;  %v382_v7 = vld [vmem:[#allocation2 + $0x18] sm:$0xff]  ;;  %s8847_s7 = sshll.u32 %s11899_s4, 4  ;;  %p11749_p6 = scmp.ne.s32.totalorder %s8858_s8, %s11748_s10  ;;  %s8848_s7 = int_to_ptr.vmem [resolvable:$true] %s8847_s7 }
 0x1ae   :  { %v407_v13 = vld [vmem:[#allocation2 + $0xe0] sm:$0xff]  ;;  %v408_v31 = vld [vmem:[#allocation2 + $0xe8] sm:$0xff]  ;;  %v8940_v35 = vcombine.low %v396_v22, %v400_v23  ;;  %v8926_v8 = vcombine.low %v381_v58, %v385_v59  ;;  %v386_v9 = vld [vmem:[#allocation2 + $0x38] sm:$0xff]  ;;  %v8934_v16 = vcombine.low %v389_v4, %v393_v5  ;;  %p11753_p7 = scmp.lt.s32.totalorder %s8858_s8, %s8858_s8  ;;  %p11754_p8 = scmp.lt.s32.totalorder %s11748_s10, %s11748_s10 }
 0x1af   :  { %v8947_v24 = vcombine.high %v403_v12, %v407_v13  ;;  %v411_v25 = vld [vmem:[#allocation2 + $0x100] sm:$0xff]  ;;  %v8946_v29 = vcombine.low %v403_v12, %v407_v13  ;;  %v8949_v36 = vcombine.high %v404_v30, %v408_v31  ;;  %v412_v38 = vld [vmem:[#allocation2 + $0x108] sm:$0xff]  ;;  %v8948_v43 = vcombine.low %v404_v30, %v408_v31  ;;  %v397_v12 = vld [vmem:[#allocation2 + $0x90] sm:$0xff] }
 0x1b0   :  { %808 = vmatpush1.bf16.msra.mxu0 %v8930_v10  ;;  %v415_v26 = vld [vmem:[#allocation2 + $0x120] sm:$0xff]  ;;  %849 = vmatpush1.bf16.msra.mxu1 %v8932_v27  ;;  %v416_v39 = vld [vmem:[#allocation2 + $0x128] sm:$0xff]  ;;  %v8935_v10 = vcombine.high %v389_v4, %v393_v5  ;;  %v401_v13 = vld [vmem:[#allocation2 + $0xb0] sm:$0xff]  ;;  %v8929_v14 = vcombine.high %v382_v7, %v386_v9  ;;  %p11755_p9 = por %p11754_p8, %p11753_p7 }
 0x1b1   :  { %809 = vmatprep.subr.bf16.mxu0 %v8939_v11  ;;  %v8955_v32 = vcombine.high %v411_v25, %v415_v26  ;;  %v419_v33 = vld [vmem:[#allocation2 + $0x140] sm:$0xff]  ;;  %850 = vmatprep.subr.bf16.mxu1 %v8941_v28  ;;  %v8954_v37 = vcombine.low %v411_v25, %v415_v26  ;;  %v8957_v44 = vcombine.high %v412_v38, %v416_v39  ;;  %v420_v46 = vld [vmem:[#allocation2 + $0x148] sm:$0xff]  ;;  %v394_v17 = vld [vmem:[#allocation2 + $0x78] sm:$0xff] }
 0x1b2   :  { %v423_v34 = vld [vmem:[#allocation2 + $0x160] sm:$0xff]  ;;  %v424_v47 = vld [vmem:[#allocation2 + $0x168] sm:$0xff]  ;;  %v8956_v51 = vcombine.low %v412_v38, %v416_v39  ;;  %v8943_v18 = vcombine.high %v397_v12, %v401_v13  ;;  %v405_v19 = vld [vmem:[#allocation2 + $0xd0] sm:$0xff]  ;;  %v8937_v22 = vcombine.high %v390_v15, %v394_v17  ;;  %p11756_p10 = pnand %p11755_p9, %p11749_p6 }
 0x1b3   :  { %v8963_v40 = vcombine.high %v419_v33, %v423_v34  ;;  %v427_v41 = vld [vmem:[#allocation2 + $0x180] sm:$0xff]  ;;  %v8962_v45 = vcombine.low %v419_v33, %v423_v34  ;;  %v8965_v52 = vcombine.high %v420_v46, %v424_v47  ;;  %v428_v53 = vld [vmem:[#allocation2 + $0x188] sm:$0xff]  ;;  %v8964_v57 = vcombine.low %v420_v46, %v424_v47  ;;  %v409_v20 = vld [vmem:[#allocation2 + $0xf0] sm:$0xff] }
 0x1b4   :  { %810 = vmatpush1.bf16.msra.mxu0 %v8938_v21  ;;  %v431_v42 = vld [vmem:[#allocation2 + $0x1a0] sm:$0xff]  ;;  %851 = vmatpush1.bf16.msra.mxu1 %v8940_v35  ;;  %v432_v55 = vld [vmem:[#allocation2 + $0x1a8] sm:$0xff]  ;;  %v8928_v21 = vcombine.low %v382_v7, %v386_v9  ;;  %v398_v23 = vld [vmem:[#allocation2 + $0x98] sm:$0xff]  ;;  %v8951_v26 = vcombine.high %v405_v19, %v409_v20 }
 0x1b5   :  { %811 = vmatprep.subr.bf16.mxu0 %v8947_v24  ;;  %852 = vmatprep.subr.bf16.mxu1 %v8949_v36  ;;  %v8971_v48 = vcombine.high %v427_v41, %v431_v42  ;;  %v435_v49 = vld [vmem:[#allocation2 + $0x1c0] sm:$0xff]  ;;  %v8970_v54 = vcombine.low %v427_v41, %v431_v42  ;;  %v8973_v60 = vcombine.high %v428_v53, %v432_v55  ;;  %v436_v61 = vld [vmem:[#allocation2 + $0x1c8] sm:$0xff]  ;;  %v402_v25 = vld [vmem:[#allocation2 + $0xb8] sm:$0xff] }
 0x1b6   :  { %v439_v50 = vld [vmem:[#allocation2 + $0x1e0] sm:$0xff]  ;;  %v440_v63 = vld [vmem:[#allocation2 + $0x1e8] sm:$0xff]  ;;  %v8972_v3 = vcombine.low %v428_v53, %v432_v55  ;;  %v8942_v24 = vcombine.low %v397_v12, %v401_v13  ;;  %v413_v27 = vld [vmem:[#allocation2 + $0x110] sm:$0xff]  ;;  %v8945_v30 = vcombine.high %v398_v23, %v402_v25 }
 0x1b7   :  { %v8979_v56 = vcombine.high %v435_v49, %v439_v50  ;;  %v8978_v62 = vcombine.low %v435_v49, %v439_v50  ;;  %v12173_v2 = vld [vmem:[%s12402_s21] sm:$0xf]  ;;  %v8981_v6 = vcombine.high %v436_v61, %v440_v63  ;;  %v8980_v11 = vcombine.low %v436_v61, %v440_v63  ;;  %v417_v28 = vld [vmem:[#allocation2 + $0x130] sm:$0xff]  ;;  %v406_v31 = vld [vmem:[#allocation2 + $0xd8] sm:$0xff] }
 0x1b8   :  { %812 = vmatpush1.bf16.msra.mxu0 %v8946_v29  ;;  %853 = vmatpush1.bf16.msra.mxu1 %v8948_v43  ;;  %v8936_v29 = vcombine.low %v390_v15, %v394_v17  ;;  %v410_v33 = vld [vmem:[#allocation2 + $0xf8] sm:$0xff]  ;;  %v8959_v34 = vcombine.high %v413_v27, %v417_v28  ;;  %v421_v35 = vld [vmem:[#allocation2 + $0x150] sm:$0xff] }
 0x1b9   :  { %813 = vmatprep.subr.bf16.mxu0 %v8955_v32  ;;  %854 = vmatprep.subr.bf16.mxu1 %v8957_v44  ;;  %v8950_v32 = vcombine.low %v405_v19, %v409_v20  ;;  %v425_v36 = vld [vmem:[#allocation2 + $0x170] sm:$0xff]  ;;  %v8953_v38 = vcombine.high %v406_v31, %v410_v33  ;;  %v414_v39 = vld [vmem:[#allocation2 + $0x118] sm:$0xff] }
 0x1ba   :  { %v418_v41 = vld [vmem:[#allocation2 + $0x138] sm:$0xff]  ;;  %v8967_v42 = vcombine.high %v421_v35, %v425_v36  ;;  %v429_v43 = vld [vmem:[#allocation2 + $0x190] sm:$0xff] }
 0x1bb   :  { %v433_v44 = vld [vmem:[#allocation2 + $0x1b0] sm:$0xff]  ;;  %v8961_v46 = vcombine.high %v414_v39, %v418_v41  ;;  %v422_v47 = vld [vmem:[#allocation2 + $0x158] sm:$0xff]  ;;  %v8960_v53 = vcombine.low %v414_v39, %v418_v41 }
 0x1bc   :  { %814 = vmatpush1.bf16.msra.mxu0 %v8954_v37  ;;  %855 = vmatpush1.bf16.msra.mxu1 %v8956_v51  ;;  %v8944_v37 = vcombine.low %v398_v23, %v402_v25  ;;  %v426_v49 = vld [vmem:[#allocation2 + $0x178] sm:$0xff]  ;;  %v8975_v50 = vcombine.high %v429_v43, %v433_v44  ;;  %v437_v51 = vld [vmem:[#allocation2 + $0x1d0] sm:$0xff] }
 0x1bd   :  { %815 = vmatprep.subr.bf16.mxu0 %v8963_v40  ;;  %856 = vmatprep.subr.bf16.mxu1 %v8965_v52  ;;  %v8958_v40 = vcombine.low %v413_v27, %v417_v28  ;;  %v441_v52 = vld [vmem:[#allocation2 + $0x1f0] sm:$0xff]  ;;  %v430_v55 = vld [vmem:[#allocation2 + $0x198] sm:$0xff]  ;;  %v8968_v59 = vcombine.low %v422_v47, %v426_v49 }
 0x1be   :  { %v8983_v58 = vcombine.high %v437_v51, %v441_v52  ;;  %v442_v61 = vld [vmem:[#allocation2 + $0x1f8] sm:$0xff]  ;;  %v10210_v63 = vld [vmem:[#allocation5 + $0x4] ss:$16 sps:$4 sm:$0xff]   ;;  %v10208_v4 = vld [vmem:[#allocation5] ss:$16 sps:$4 sm:$0xff]  }
 0x1bf   :  { %v10213_v7 = vld [vmem:[#allocation5 + $0xc] ss:$16 sps:$4 sm:$0xff]   ;;  %v10214_v9 = vld [vmem:[#allocation5 + $0x20] ss:$16 sps:$4 sm:$0xff]   ;;  %v10217_v15 = vld [vmem:[#allocation5 + $0x28] ss:$16 sps:$4 sm:$0xff]  }
 0x1c0   :  { %816 = vmatpush1.bf16.msra.mxu0 %v8962_v45  ;;  %857 = vmatpush1.bf16.msra.mxu1 %v8964_v57  ;;  %v8952_v45 = vcombine.low %v406_v31, %v410_v33  ;;  %v434_v57 = vld [vmem:[#allocation2 + $0x1b8] sm:$0xff]  ;;  %v10220_v13 = vld [vmem:[#allocation5 + $0x40] ss:$16 sps:$4 sm:$0xff]   ;;  %v10246_v25 = vld [vmem:[#allocation5 + $0xc4] ss:$16 sps:$4 sm:$0xff]  }
 0x1c1   :  { %817 = vmatprep.subr.bf16.mxu0 %v8971_v48  ;;  %858 = vmatprep.subr.bf16.mxu1 %v8973_v60  ;;  %v8966_v48 = vcombine.low %v421_v35, %v425_v36  ;;  %v438_v60 = vld [vmem:[#allocation2 + $0x1d8] sm:$0xff]  ;;  %v10226_v17 = vld [vmem:[#allocation5 + $0x60] ss:$16 sps:$4 sm:$0xff]   ;;  %v10258_v33 = vld [vmem:[#allocation5 + $0x104] ss:$16 sps:$4 sm:$0xff]  }
 0x1c2   :  { %v8985_v5 = vcombine.high %v438_v60, %v442_v61  ;;  %v10219_v12 = vld [vmem:[#allocation5 + $0x2c] ss:$16 sps:$4 sm:$0xff]   ;;  %v10223_v19 = vld [vmem:[#allocation5 + $0x48] ss:$16 sps:$4 sm:$0xff]   ;;  %v10244_v28 = vld [vmem:[#allocation5 + $0xc0] ss:$16 sps:$4 sm:$0xff]  }
 0x1c3   :  { %v10231_v20 = vld [vmem:[#allocation5 + $0x6c] ss:$16 sps:$4 sm:$0xff]   ;;  %v10229_v23 = vld [vmem:[#allocation5 + $0x68] ss:$16 sps:$4 sm:$0xff]   ;;  %v10256_v36 = vld [vmem:[#allocation5 + $0x100] ss:$16 sps:$4 sm:$0xff]  }
 0x1c4   :  { %818 = vmatpush1.bf16.msra.mxu0 %v8970_v54  ;;  %859 = vmatpush1.bf16.msra.mxu1 %v8972_v3  ;;  %v8969_v54 = vcombine.high %v422_v47, %v426_v49  ;;  %v8976_v3 = vcombine.low %v430_v55, %v434_v57  ;;  %v10243_v27 = vld [vmem:[#allocation5 + $0xac] ss:$16 sps:$4 sm:$0xff]   ;;  %v10270_v41 = vld [vmem:[#allocation5 + $0x144] ss:$16 sps:$4 sm:$0xff]  }
 0x1c5   :  { %819 = vmatprep.subr.bf16.mxu0 %v8979_v56  ;;  %860 = vmatprep.subr.bf16.mxu1 %v8981_v6  ;;  %v8974_v56 = vcombine.low %v429_v43, %v433_v44  ;;  %v10216_v6 = vld [vmem:[#allocation5 + $0x24] ss:$16 sps:$4 sm:$0xff]   ;;  %v10249_v31 = vld [vmem:[#allocation5 + $0xcc] ss:$16 sps:$4 sm:$0xff]   ;;  %v10268_v44 = vld [vmem:[#allocation5 + $0x140] ss:$16 sps:$4 sm:$0xff]  }
 0x1c6   :  { %v10255_v35 = vld [vmem:[#allocation5 + $0xec] ss:$16 sps:$4 sm:$0xff]   ;;  %v10282_v49 = vld [vmem:[#allocation5 + $0x184] ss:$16 sps:$4 sm:$0xff]  }
 0x1c7   :  { %v10261_v39 = vld [vmem:[#allocation5 + $0x10c] ss:$16 sps:$4 sm:$0xff]  }
 0x1c8   :  { %820 = vmatpush1.bf16.msra.mxu0 %v8978_v62  ;;  %861 = vmatpush1.bf16.msra.mxu1 %v8980_v11  ;;  %v8977_v62 = vcombine.high %v430_v55, %v434_v57  ;;  %v10211_v11 = vld [vmem:[#allocation5 + $0x8] ss:$16 sps:$4 sm:$0xff]   ;;  %v10267_v43 = vld [vmem:[#allocation5 + $0x12c] ss:$16 sps:$4 sm:$0xff]   ;;  %v10286_v57 = vld [vmem:[#allocation5 + $0x1a0] ss:$16 sps:$4 sm:$0xff]  }
 0x1c9   :  { %887 = vmatprep.subr.bf16.mxu0 %v8927_v1  ;;  %928 = vmatprep.subr.bf16.mxu1 %v8929_v14  ;;  %v8982_v1 = vcombine.low %v437_v51, %v441_v52  ;;  %v10228_v14 = vld [vmem:[#allocation5 + $0x64] ss:$16 sps:$4 sm:$0xff]   ;;  %v10273_v47 = vld [vmem:[#allocation5 + $0x14c] ss:$16 sps:$4 sm:$0xff]   ;;  %v10280_v52 = vld [vmem:[#allocation5 + $0x180] ss:$16 sps:$4 sm:$0xff]  }
 0x1ca   :  { %v10279_v51 = vld [vmem:[#allocation5 + $0x16c] ss:$16 sps:$4 sm:$0xff]  }
 0x1cb   :  { %838 = vmatmul.mubr.bf16.vlgmr.msra.gmra.mrb[0].mxu0 %v12173_v2  ;;  %879 = vmatmul.mubr.bf16.vlgmr.msra.gmra.mrb[0].mxu1 %v12173_v2  ;;  %v10285_v55 = vld [vmem:[#allocation5 + $0x18c] ss:$16 sps:$4 sm:$0xff]  }
 0x1cc   :  { %888 = vmatpush1.bf16.msra.mxu0 %v8926_v8  ;;  %919 = vmatprep.mubr.bf16.mxu0 %v11897_v0  ;;  %v8984_v8 = vcombine.low %v438_v60, %v442_v61  ;;  %v10289_v60 = vld [vmem:[#allocation5 + $0x1a8] ss:$16 sps:$4 sm:$0xff]   ;;  %v10292_v61 = vld [vmem:[#allocation5 + $0x1c0] ss:$16 sps:$4 sm:$0xff]  }
 0x1cd   :  { %889 = vmatprep.subr.bf16.mxu0 %v8935_v10  ;;  %929 = vmatpush1.bf16.msra.mxu1 %v8928_v21  ;;  %v10222_v10 = vld [vmem:[#allocation5 + $0x44] ss:$16 sps:$4 sm:$0xff]   ;;  %v10232_v21 = vld [vmem:[#allocation5 + $0x80] ss:$16 sps:$4 sm:$0xff]  }
 0x1ce   :  { %960 = vmatprep.mubr.bf16.mxu1 %v11897_v0  ;;  %930 = vmatprep.subr.bf16.mxu1 %v8937_v22  ;;  %v10240_v22 = vld [vmem:[#allocation5 + $0xa4] ss:$16 sps:$4 sm:$0xff]  }
 0x1d0   :  { %890 = vmatpush1.bf16.msra.mxu0 %v8934_v16  ;;  %v10225_v16 = vld [vmem:[#allocation5 + $0x4c] ss:$16 sps:$4 sm:$0xff]  }
 0x1d1   :  { %891 = vmatprep.subr.bf16.mxu0 %v8943_v18  ;;  %931 = vmatpush1.bf16.msra.mxu1 %v8936_v29  ;;  %v10234_v18 = vld [vmem:[#allocation5 + $0x84] ss:$16 sps:$4 sm:$0xff]  }
 0x1d2   :  { %932 = vmatprep.subr.bf16.mxu1 %v8945_v30  ;;  %v10252_v29 = vld [vmem:[#allocation5 + $0xe4] ss:$16 sps:$4 sm:$0xff]   ;;  %v10241_v30 = vld [vmem:[#allocation5 + $0xa8] ss:$16 sps:$4 sm:$0xff]  }
 0x1d4   :  { %892 = vmatpush1.bf16.msra.mxu0 %v8942_v24  ;;  %v10237_v24 = vld [vmem:[#allocation5 + $0x8c] ss:$16 sps:$4 sm:$0xff]  }
 0x1d5   :  { %893 = vmatprep.subr.bf16.mxu0 %v8951_v26  ;;  %933 = vmatpush1.bf16.msra.mxu1 %v8944_v37  ;;  %v10235_v26 = vld [vmem:[#allocation5 + $0x88] ss:$16 sps:$4 sm:$0xff]   ;;  %v10264_v37 = vld [vmem:[#allocation5 + $0x124] ss:$16 sps:$4 sm:$0xff]  }
 0x1d6   :  { %934 = vmatprep.subr.bf16.mxu1 %v8953_v38  ;;  %v10253_v38 = vld [vmem:[#allocation5 + $0xe8] ss:$16 sps:$4 sm:$0xff]  }
 0x1d8   :  { %894 = vmatpush1.bf16.msra.mxu0 %v8950_v32  ;;  %v10250_v32 = vld [vmem:[#allocation5 + $0xe0] ss:$16 sps:$4 sm:$0xff]  }
 0x1d9   :  { %895 = vmatprep.subr.bf16.mxu0 %v8959_v34  ;;  %935 = vmatpush1.bf16.msra.mxu1 %v8952_v45  ;;  %v10247_v34 = vld [vmem:[#allocation5 + $0xc8] ss:$16 sps:$4 sm:$0xff]   ;;  %v10276_v45 = vld [vmem:[#allocation5 + $0x164] ss:$16 sps:$4 sm:$0xff]  }
 0x1da   :  { %936 = vmatprep.subr.bf16.mxu1 %v8961_v46  ;;  %v10265_v46 = vld [vmem:[#allocation5 + $0x128] ss:$16 sps:$4 sm:$0xff]  }
 0x1dc   :  { %896 = vmatpush1.bf16.msra.mxu0 %v8958_v40  ;;  %v10262_v40 = vld [vmem:[#allocation5 + $0x120] ss:$16 sps:$4 sm:$0xff]  }
 0x1dd   :  { %897 = vmatprep.subr.bf16.mxu0 %v8967_v42  ;;  %937 = vmatpush1.bf16.msra.mxu1 %v8960_v53  ;;  %v10259_v42 = vld [vmem:[#allocation5 + $0x108] ss:$16 sps:$4 sm:$0xff]   ;;  %v10288_v53 = vld [vmem:[#allocation5 + $0x1a4] ss:$16 sps:$4 sm:$0xff]  }
 0x1de   :  { %938 = vmatprep.subr.bf16.mxu1 %v8969_v54  ;;  %v10277_v54 = vld [vmem:[#allocation5 + $0x168] ss:$16 sps:$4 sm:$0xff]  }
 0x1e0   :  { %898 = vmatpush1.bf16.msra.mxu0 %v8966_v48  ;;  %v10274_v48 = vld [vmem:[#allocation5 + $0x160] ss:$16 sps:$4 sm:$0xff]  }
 0x1e1   :  { %899 = vmatprep.subr.bf16.mxu0 %v8975_v50  ;;  %939 = vmatpush1.bf16.msra.mxu1 %v8968_v59  ;;  %v10271_v50 = vld [vmem:[#allocation5 + $0x148] ss:$16 sps:$4 sm:$0xff]   ;;  %v10294_v59 = vld [vmem:[#allocation5 + $0x1c4] ss:$16 sps:$4 sm:$0xff]  }
 0x1e2   :  { %940 = vmatprep.subr.bf16.mxu1 %v8977_v62  ;;  %v10297_v62 = vld [vmem:[#allocation5 + $0x1cc] ss:$16 sps:$4 sm:$0xff]  }
 0x1e4   :  { %900 = vmatpush1.bf16.msra.mxu0 %v8974_v56  ;;  %v10283_v56 = vld [vmem:[#allocation5 + $0x188] ss:$16 sps:$4 sm:$0xff]  }
 0x1e5   :  { %901 = vmatprep.subr.bf16.mxu0 %v8983_v58  ;;  %941 = vmatpush1.bf16.msra.mxu1 %v8976_v3  ;;  %v10291_v58 = vld [vmem:[#allocation5 + $0x1ac] ss:$16 sps:$4 sm:$0xff]   ;;  %v10298_v3 = vld [vmem:[#allocation5 + $0x1e0] ss:$16 sps:$4 sm:$0xff]  }
 0x1e6   :  { %942 = vmatprep.subr.bf16.mxu1 %v8985_v5  ;;  %v10306_v5 = vld [vmem:[#allocation5 + $0x204] ss:$16 sps:$4 sm:$0xff]  }
 0x1e8   :  { %902 = vmatpush1.bf16.msra.mxu0 %v8982_v1  ;;  %v10295_v1 = vld [vmem:[#allocation5 + $0x1c8] ss:$16 sps:$4 sm:$0xff]  }
 0x1e9   :  { %2543 = vmatprep.subr.bf16.mxu0 %v10210_v63  ;;  %943 = vmatpush1.bf16.msra.mxu1 %v8984_v8  ;;  %v10300_v63 = vld [vmem:[#allocation5 + $0x1e4] ss:$16 sps:$4 sm:$0xff]   ;;  %v445_v8 = vlaneseq }
 0x1ea   :  { %2707 = vmatprep.subr.bf16.mxu1 %v10213_v7  ;;  %v10309_v7 = vld [vmem:[#allocation5 + $0x20c] ss:$16 sps:$4 sm:$0xff]  }
 0x1eb   :  { %920 = vmatmul.mubr.bf16.vlgmr.msra.gmra.mrb[4].mxu0 %v12173_v2 }
 0x1ec   :  { %2544 = vmatpush1.bf16.msra.mxu0 %v10208_v4  ;;  %961 = vmatmul.mubr.bf16.vlgmr.msra.gmra.mrb[4].mxu1 %v12173_v2  ;;  %v10238_v2 = vld [vmem:[#allocation5 + $0xa0] ss:$16 sps:$4 sm:$0xff]   ;;  %v10303_v4 = vld [vmem:[#allocation5 + $0x1ec] ss:$16 sps:$4 sm:$0xff]  }
 0x1ed   :  { %2545 = vmatprep.subr.bf16.mxu0 %v10216_v6  ;;  %2708 = vmatpush1.bf16.msra.mxu1 %v10211_v11  ;;  %v10301_v6 = vld [vmem:[#allocation5 + $0x1e8] ss:$16 sps:$4 sm:$0xff]   ;;  %v12187_v11 = vld [vmem:[%s12403_s26] sm:$0xff] }
 0x1ee   :  { %2709 = vmatprep.subr.bf16.mxu1 %v10219_v12 }
 0x1f0   :  { %2546 = vmatpush1.bf16.msra.mxu0 %v10214_v9  ;;  %v12181_v9 = vshrl.u32 %v445_v8, 7  ;;  %v10355_v8 = vld [vmem:[#allocation5 + $0x308] ss:$16 sps:$4 sm:$0xff]  }
 0x1f1   :  { %2547 = vmatprep.subr.bf16.mxu0 %v10222_v10  ;;  %2710 = vmatpush1.bf16.msra.mxu1 %v10217_v15 }
 0x1f2   :  { %2711 = vmatprep.subr.bf16.mxu1 %v10225_v16  ;;  %v12184_v10 = vsub.s32 0, %v12181_v9  ;;  %v12190_v12 = vsub.s32 1, %v12181_v9  ;;  %v12197_v16 = vsub.s32 3, %v12181_v9 }
 0x1f4   :  { %2548 = vmatpush1.bf16.msra.mxu0 %v10220_v13  ;;  %v448_v13 = vrot.slane %v12187_v11, %v12184_v10 }
 0x1f5   :  { %2549 = vmatprep.subr.bf16.mxu0 %v10228_v14  ;;  %2712 = vmatpush1.bf16.msra.mxu1 %v10223_v19  ;;  %v452_v14 = vrot.slane %v12187_v11, %v12190_v12 }
 0x1f6   :  { %2713 = vmatprep.subr.bf16.mxu1 %v10231_v20 }
 0x1f8   :  { %2550 = vmatpush1.bf16.msra.mxu0 %v10226_v17 }
 0x1f9   :  { %2551 = vmatprep.subr.bf16.mxu0 %v10234_v18  ;;  %2714 = vmatpush1.bf16.msra.mxu1 %v10229_v23 }
 0x1fa   :  { %2715 = vmatprep.subr.bf16.mxu1 %v10237_v24  ;;  %v10304_v24 = vld [vmem:[#allocation5 + $0x200] ss:$16 sps:$4 sm:$0xff]  }
 0x1fc   :  { %2552 = vmatpush1.bf16.msra.mxu0 %v10232_v21 }
 0x1fd   :  { %2553 = vmatprep.subr.bf16.mxu0 %v10240_v22  ;;  %2716 = vmatpush1.bf16.msra.mxu1 %v10235_v26 }
 0x1fe   :  { %2717 = vmatprep.subr.bf16.mxu1 %v10243_v27 }
 0x200   :  { %2554 = vmatpush1.bf16.msra.mxu0 %v10238_v2  ;;  %v10307_v2 = vld [vmem:[#allocation5 + $0x208] ss:$16 sps:$4 sm:$0xff]  }
 0x201   :  { %2555 = vmatprep.subr.bf16.mxu0 %v10246_v25  ;;  %2718 = vmatpush1.bf16.msra.mxu1 %v10241_v30  ;;  %v460_v25 = vrot.slane %v12187_v11, %v12197_v16  ;;  %v10315_v30 = vld [vmem:[#allocation5 + $0x22c] ss:$16 sps:$4 sm:$0xff]  }
 0x202   :  { %2719 = vmatprep.subr.bf16.mxu1 %v10249_v31 }
 0x204   :  { %2556 = vmatpush1.bf16.msra.mxu0 %v10244_v28 }
 0x205   :  { %2557 = vmatprep.subr.bf16.mxu0 %v10252_v29  ;;  %2720 = vmatpush1.bf16.msra.mxu1 %v10247_v34  ;;  %v10312_v29 = vld [vmem:[#allocation5 + $0x224] ss:$16 sps:$4 sm:$0xff]  }
 0x206   :  { %2721 = vmatprep.subr.bf16.mxu1 %v10255_v35  ;;  %v10310_v35 = vld [vmem:[#allocation5 + $0x220] ss:$16 sps:$4 sm:$0xff]  }
 0x208   :  { %2558 = vmatpush1.bf16.msra.mxu0 %v10250_v32 }
 0x209   :  { %2559 = vmatprep.subr.bf16.mxu0 %v10258_v33  ;;  %2722 = vmatpush1.bf16.msra.mxu1 %v10253_v38  ;;  %v10318_v38 = vld [vmem:[#allocation5 + $0x244] ss:$16 sps:$4 sm:$0xff]  }
 0x20a   :  { %2723 = vmatprep.subr.bf16.mxu1 %v10261_v39  ;;  %v10321_v39 = vld [vmem:[#allocation5 + $0x24c] ss:$16 sps:$4 sm:$0xff]  }
 0x20c   :  { %2560 = vmatpush1.bf16.msra.mxu0 %v10256_v36  ;;  %v10313_v36 = vld [vmem:[#allocation5 + $0x228] ss:$16 sps:$4 sm:$0xff]  }
 0x20d   :  { %2561 = vmatprep.subr.bf16.mxu0 %v10264_v37  ;;  %2724 = vmatpush1.bf16.msra.mxu1 %v10259_v42  ;;  %v10319_v42 = vld [vmem:[#allocation5 + $0x248] ss:$16 sps:$4 sm:$0xff]  }
 0x20e   :  { %2725 = vmatprep.subr.bf16.mxu1 %v10267_v43  ;;  %v10324_v43 = vld [vmem:[#allocation5 + $0x264] ss:$16 sps:$4 sm:$0xff]  }
 0x210   :  { %2562 = vmatpush1.bf16.msra.mxu0 %v10262_v40 }
 0x211   :  { %2563 = vmatprep.subr.bf16.mxu0 %v10270_v41  ;;  %2726 = vmatpush1.bf16.msra.mxu1 %v10265_v46  ;;  %v10316_v41 = vld [vmem:[#allocation5 + $0x240] ss:$16 sps:$4 sm:$0xff]   ;;  %v10325_v46 = vld [vmem:[#allocation5 + $0x268] ss:$16 sps:$4 sm:$0xff]  }
 0x212   :  { %2727 = vmatprep.subr.bf16.mxu1 %v10273_v47  ;;  %v10330_v47 = vld [vmem:[#allocation5 + $0x284] ss:$16 sps:$4 sm:$0xff]  }
 0x214   :  { %2564 = vmatpush1.bf16.msra.mxu0 %v10268_v44  ;;  %v10327_v44 = vld [vmem:[#allocation5 + $0x26c] ss:$16 sps:$4 sm:$0xff]  }
 0x215   :  { %2565 = vmatprep.subr.bf16.mxu0 %v10276_v45  ;;  %2728 = vmatpush1.bf16.msra.mxu1 %v10271_v50  ;;  %v10322_v45 = vld [vmem:[#allocation5 + $0x260] ss:$16 sps:$4 sm:$0xff]   ;;  %v10331_v50 = vld [vmem:[#allocation5 + $0x288] ss:$16 sps:$4 sm:$0xff]  }
 0x216   :  { %2729 = vmatprep.subr.bf16.mxu1 %v10279_v51  ;;  %v10336_v51 = vld [vmem:[#allocation5 + $0x2a4] ss:$16 sps:$4 sm:$0xff]  }
 0x218   :  { %2566 = vmatpush1.bf16.msra.mxu0 %v10274_v48  ;;  %v10333_v48 = vld [vmem:[#allocation5 + $0x28c] ss:$16 sps:$4 sm:$0xff]  }
 0x219   :  { %2567 = vmatprep.subr.bf16.mxu0 %v10282_v49  ;;  %2730 = vmatpush1.bf16.msra.mxu1 %v10277_v54  ;;  %v10328_v49 = vld [vmem:[#allocation5 + $0x280] ss:$16 sps:$4 sm:$0xff]   ;;  %v10337_v54 = vld [vmem:[#allocation5 + $0x2a8] ss:$16 sps:$4 sm:$0xff]  }
 0x21a   :  { %2731 = vmatprep.subr.bf16.mxu1 %v10285_v55  ;;  %v10342_v55 = vld [vmem:[#allocation5 + $0x2c4] ss:$16 sps:$4 sm:$0xff]  }
 0x21c   :  { %2568 = vmatpush1.bf16.msra.mxu0 %v10280_v52  ;;  %v10339_v52 = vld [vmem:[#allocation5 + $0x2ac] ss:$16 sps:$4 sm:$0xff]  }
 0x21d   :  { %2569 = vmatprep.subr.bf16.mxu0 %v10288_v53  ;;  %2732 = vmatpush1.bf16.msra.mxu1 %v10283_v56  ;;  %v10334_v53 = vld [vmem:[#allocation5 + $0x2a0] ss:$16 sps:$4 sm:$0xff]   ;;  %v10345_v56 = vld [vmem:[#allocation5 + $0x2cc] ss:$16 sps:$4 sm:$0xff]  }
 0x21e   :  { %2733 = vmatprep.subr.bf16.mxu1 %v10291_v58  ;;  %v10343_v58 = vld [vmem:[#allocation5 + $0x2c8] ss:$16 sps:$4 sm:$0xff]  }
 0x220   :  { %2570 = vmatpush1.bf16.msra.mxu0 %v10286_v57  ;;  %v10340_v57 = vld [vmem:[#allocation5 + $0x2c0] ss:$16 sps:$4 sm:$0xff]  }
 0x221   :  { %2571 = vmatprep.subr.bf16.mxu0 %v10294_v59  ;;  %2734 = vmatpush1.bf16.msra.mxu1 %v10289_v60  ;;  %v10348_v59 = vld [vmem:[#allocation5 + $0x2e4] ss:$16 sps:$4 sm:$0xff]   ;;  %v10351_v60 = vld [vmem:[#allocation5 + $0x2ec] ss:$16 sps:$4 sm:$0xff]  }
 0x222   :  { %2735 = vmatprep.subr.bf16.mxu1 %v10297_v62 }
 0x224   :  { %2572 = vmatpush1.bf16.msra.mxu0 %v10292_v61 }
 0x225   :  { %2573 = vmatprep.subr.bf16.mxu0 %v10300_v63  ;;  %2736 = vmatpush1.bf16.msra.mxu1 %v10295_v1  ;;  %v10346_v63 = vld [vmem:[#allocation5 + $0x2e0] ss:$16 sps:$4 sm:$0xff]   ;;  %v10349_v1 = vld [vmem:[#allocation5 + $0x2e8] ss:$16 sps:$4 sm:$0xff]  }
 0x226   :  { %2737 = vmatprep.subr.bf16.mxu1 %v10303_v4  ;;  %v10354_v4 = vld [vmem:[#allocation5 + $0x304] ss:$16 sps:$4 sm:$0xff]  }
 0x228   :  { %2574 = vmatpush1.bf16.msra.mxu0 %v10298_v3 }
 0x229   :  { %2584 = vmatprep.subr.bf16.mxu0 %v10306_v5  ;;  %2738 = vmatpush1.bf16.msra.mxu1 %v10301_v6  ;;  %v10357_v5 = vld [vmem:[#allocation5 + $0x30c] ss:$16 sps:$4 sm:$0xff]  }
 0x22a   :  { %2748 = vmatprep.subr.bf16.mxu1 %v10309_v7  ;;  %v10352_v7 = vld [vmem:[#allocation5 + $0x300] ss:$16 sps:$4 sm:$0xff]  }
 0x29e   :  { %v839_v15 = vpop.f32.mrb[0].mxu0  ;;  %v12201_v27 = vpop.f32.mrb[0].mxu1 }
 0x29f   :  { %v840_v17 = vadd.f32 %v839_v15, %v448_v13  ;;  %v841_v18 = vpop.f32.mrb[1].mxu0  ;;  %v882_v31 = vpop.f32.mrb[1].mxu1  ;;  %v10360_v13 = vld [vmem:[#allocation5 + $0x324] ss:$16 sps:$4 sm:$0xff]   ;;  %v10358_v15 = vld [vmem:[#allocation5 + $0x320] ss:$16 sps:$4 sm:$0xff]  }
 0x2a0   :  { %v842_v19 = vadd.f32 %v841_v18, %v452_v14  ;;  %v843_v20 = vpop.f32.mrb[2].mxu0  ;;  %v883_v32 = vadd.f32 %v882_v31, %v460_v25  ;;  %v884_v33 = vpop.f32.mrb[2].mxu1  ;;  %v10363_v14 = vld [vmem:[#allocation5 + $0x32c] ss:$16 sps:$4 sm:$0xff]   ;;  %v10366_v18 = vld [vmem:[#allocation5 + $0x344] ss:$16 sps:$4 sm:$0xff]  }
 0x2a1   :  { %v969_v21 = vmax.f32 %v840_v17, 0.0  ;;  %v844_v22 = vpop.f32.mrb[3].mxu0  ;;  %v885_v34 = vpop.f32.mrb[3].mxu1  ;;  %v10361_v17 = vld [vmem:[#allocation5 + $0x328] ss:$16 sps:$4 sm:$0xff]   ;;  %v467_v33 = vsub.s32 5, %v12181_v9 }
 0x2a2   :  { %v970_v23 = vmax.f32 %v842_v19, 0.0  ;;  %v972_v37 = vmax.f32 %v883_v32, 0.0  ;;  %v10369_v19 = vld [vmem:[#allocation5 + $0x34c] ss:$16 sps:$4 sm:$0xff]   ;;  %v10364_v20 = vld [vmem:[#allocation5 + $0x340] ss:$16 sps:$4 sm:$0xff]  }
 0x2a3   :  { %v977_v28 = vpack.c.bf16 %v969_v21, %v969_v21  ;;  %v10367_v21 = vld [vmem:[#allocation5 + $0x348] ss:$16 sps:$4 sm:$0xff]   ;;  %v10372_v22 = vld [vmem:[#allocation5 + $0x364] ss:$16 sps:$4 sm:$0xff]   ;;  %v10387_v32 = vld [vmem:[#allocation5 + $0x3ac] ss:$16 sps:$4 sm:$0xff]  }
 0x2a4   :  { %v978_v26 = vpack.c.bf16 %v970_v23, %v970_v23  ;;  %v980_v40 = vpack.c.bf16 %v972_v37, %v972_v37  ;;  %v10375_v23 = vld [vmem:[#allocation5 + $0x36c] ss:$16 sps:$4 sm:$0xff]   ;;  %v10378_v25 = vld [vmem:[#allocation5 + $0x384] ss:$16 sps:$4 sm:$0xff]  }
 0x2a5   :  { %v10384_v31 = vld [vmem:[#allocation5 + $0x3a4] ss:$16 sps:$4 sm:$0xff]  }
 0x2a6   :  { %2575 = vmatprep.mubr.bf16.mxu0 %v978_v26  ;;  %2739 = vmatprep.mubr.bf16.mxu1 %v978_v26  ;;  %v10381_v26 = vld [vmem:[#allocation5 + $0x38c] ss:$16 sps:$4 sm:$0xff]  }
 0x2a7   :  { %2576 = vmatmul.mubr.bf16.vlgmr.msra.gmra.mrb[8].mxu0 %v977_v28  ;;  %2740 = vmatmul.mubr.bf16.vlgmr.msra.gmra.mrb[8].mxu1 %v977_v28  ;;  %v12208_v28 = vsub.s32 2, %v12181_v9 }
 0x2a8   :  { %2585 = vmatpush1.bf16.msra.mxu0 %v10304_v24  ;;  %2749 = vmatpush1.bf16.msra.mxu1 %v10307_v2  ;;  %v10370_v24 = vld [vmem:[#allocation5 + $0x360] ss:$16 sps:$4 sm:$0xff]   ;;  %v10373_v2 = vld [vmem:[#allocation5 + $0x368] ss:$16 sps:$4 sm:$0xff]  }
 0x2a9   :  { %2586 = vmatprep.subr.bf16.mxu0 %v10312_v29  ;;  %2750 = vmatprep.subr.bf16.mxu1 %v10315_v30  ;;  %v10376_v29 = vld [vmem:[#allocation5 + $0x380] ss:$16 sps:$4 sm:$0xff]   ;;  %v10379_v30 = vld [vmem:[#allocation5 + $0x388] ss:$16 sps:$4 sm:$0xff]   ;;  %v456_v34 = vrot.slane %v12187_v11, %v12208_v28 }
 0x2aa   :  { %2616 = vmatprep.mubr.bf16.mxu0 %v980_v40  ;;  %2780 = vmatprep.mubr.bf16.mxu1 %v980_v40 }
 0x2ac   :  { %2587 = vmatpush1.bf16.msra.mxu0 %v10310_v35  ;;  %2751 = vmatpush1.bf16.msra.mxu1 %v10313_v36  ;;  %v10382_v35 = vld [vmem:[#allocation5 + $0x3a0] ss:$16 sps:$4 sm:$0xff]   ;;  %v10385_v36 = vld [vmem:[#allocation5 + $0x3a8] ss:$16 sps:$4 sm:$0xff]  }
 0x2ad   :  { %2588 = vmatprep.subr.bf16.mxu0 %v10318_v38  ;;  %2752 = vmatprep.subr.bf16.mxu1 %v10321_v39  ;;  %v10390_v38 = vld [vmem:[#allocation5 + $0x3c4] ss:$16 sps:$4 sm:$0xff]   ;;  %v10393_v39 = vld [vmem:[#allocation5 + $0x3cc] ss:$16 sps:$4 sm:$0xff]  }
 0x2b0   :  { %2589 = vmatpush1.bf16.msra.mxu0 %v10316_v41  ;;  %2753 = vmatpush1.bf16.msra.mxu1 %v10319_v42  ;;  %v468_v41 = vrot.slane %v12187_v11, %v467_v33  ;;  %v10402_v11 = vld [vmem:[#allocation5 + $0x404] ss:$16 sps:$4 sm:$0xff]  }
 0x2b1   :  { %2590 = vmatprep.subr.bf16.mxu0 %v10324_v43  ;;  %2754 = vmatprep.subr.bf16.mxu1 %v10327_v44  ;;  %v881_v43 = vadd.f32 %v12201_v27, %v456_v34  ;;  %v10405_v27 = vld [vmem:[#allocation5 + $0x40c] ss:$16 sps:$4 sm:$0xff]   ;;  %v10448_v34 = vld [vmem:[#allocation5 + $0x500] ss:$16 sps:$4 sm:$0xff]  }
 0x2b4   :  { %2591 = vmatpush1.bf16.msra.mxu0 %v10322_v45  ;;  %2755 = vmatpush1.bf16.msra.mxu1 %v10325_v46  ;;  %v10388_v45 = vld [vmem:[#allocation5 + $0x3c0] ss:$16 sps:$4 sm:$0xff]   ;;  %v10391_v46 = vld [vmem:[#allocation5 + $0x3c8] ss:$16 sps:$4 sm:$0xff]  }
 0x2b5   :  { %2592 = vmatprep.subr.bf16.mxu0 %v10330_v47  ;;  %2756 = vmatprep.subr.bf16.mxu1 %v10333_v48  ;;  %v10396_v47 = vld [vmem:[#allocation5 + $0x3e4] ss:$16 sps:$4 sm:$0xff]   ;;  %v10399_v48 = vld [vmem:[#allocation5 + $0x3ec] ss:$16 sps:$4 sm:$0xff]  }
 0x2b8   :  { %2593 = vmatpush1.bf16.msra.mxu0 %v10328_v49  ;;  %2757 = vmatpush1.bf16.msra.mxu1 %v10331_v50  ;;  %v971_v50 = vmax.f32 %v881_v43, 0.0  ;;  %v10465_v43 = vld [vmem:[#allocation5 + $0x54c] ss:$16 sps:$4 sm:$0xff]  }
 0x2b9   :  { %2594 = vmatprep.subr.bf16.mxu0 %v10336_v51  ;;  %2758 = vmatprep.subr.bf16.mxu1 %v10339_v52  ;;  %v10394_v51 = vld [vmem:[#allocation5 + $0x3e0] ss:$16 sps:$4 sm:$0xff]   ;;  %v10397_v52 = vld [vmem:[#allocation5 + $0x3e8] ss:$16 sps:$4 sm:$0xff]  }
 0x2bc   :  { %2595 = vmatpush1.bf16.msra.mxu0 %v10334_v53  ;;  %2759 = vmatpush1.bf16.msra.mxu1 %v10337_v54  ;;  %v10400_v53 = vld [vmem:[#allocation5 + $0x400] ss:$16 sps:$4 sm:$0xff]   ;;  %v10403_v54 = vld [vmem:[#allocation5 + $0x408] ss:$16 sps:$4 sm:$0xff]  }
 0x2bd   :  { %2596 = vmatprep.subr.bf16.mxu0 %v10342_v55  ;;  %2760 = vmatprep.subr.bf16.mxu1 %v10345_v56  ;;  %v979_v56 = vpack.c.bf16 %v971_v50, %v971_v50  ;;  %v10474_v50 = vld [vmem:[#allocation5 + $0x584] ss:$16 sps:$4 sm:$0xff]  }
 0x2be   :  { %v12203_v61 = vpop.f32.mrb[4].mxu0 }
 0x2bf   :  { %v12205_v62 = vpop.f32.mrb[5].mxu0  ;;  %v12213_v37 = vpop.f32.mrb[4].mxu1 }
 0x2c0   :  { %2597 = vmatpush1.bf16.msra.mxu0 %v10340_v57  ;;  %2761 = vmatpush1.bf16.msra.mxu1 %v10343_v58  ;;  %v925_v3 = vpop.f32.mrb[6].mxu0  ;;  %v12215_v40 = vpop.f32.mrb[5].mxu1  ;;  %v924_v49 = vadd.f32 %v12205_v62, %v468_v41  ;;  %v10408_v57 = vld [vmem:[#allocation5 + $0x424] ss:$16 sps:$4 sm:$0xff]   ;;  %v10411_v58 = vld [vmem:[#allocation5 + $0x42c] ss:$16 sps:$4 sm:$0xff]  }
 0x2c1   :  { %2598 = vmatprep.subr.bf16.mxu0 %v10348_v59  ;;  %2762 = vmatprep.subr.bf16.mxu1 %v10351_v60  ;;  %v926_v6 = vpop.f32.mrb[7].mxu0  ;;  %v966_v42 = vpop.f32.mrb[6].mxu1  ;;  %v10406_v60 = vld [vmem:[#allocation5 + $0x420] ss:$16 sps:$4 sm:$0xff]   ;;  %v10409_v62 = vld [vmem:[#allocation5 + $0x428] ss:$16 sps:$4 sm:$0xff]  }
 0x2c2   :  { %v967_v44 = vpop.f32.mrb[7].mxu1  ;;  %v974_v55 = vmax.f32 %v924_v49, 0.0  ;;  %v10412_v3 = vld [vmem:[#allocation5 + $0x440] ss:$16 sps:$4 sm:$0xff]   ;;  %v10423_v6 = vld [vmem:[#allocation5 + $0x46c] ss:$16 sps:$4 sm:$0xff]  }
 0x2c3   :  { %v10457_v41 = vld [vmem:[#allocation5 + $0x528] ss:$16 sps:$4 sm:$0xff]   ;;  %v10462_v42 = vld [vmem:[#allocation5 + $0x544] ss:$16 sps:$4 sm:$0xff]   ;;  %v10460_v44 = vld [vmem:[#allocation5 + $0x540] ss:$16 sps:$4 sm:$0xff]  }
 0x2c4   :  { %2599 = vmatpush1.bf16.msra.mxu0 %v10346_v63  ;;  %2763 = vmatpush1.bf16.msra.mxu1 %v10349_v1  ;;  %v982_v59 = vpack.c.bf16 %v974_v55, %v974_v55  ;;  %v10414_v63 = vld [vmem:[#allocation5 + $0x444] ss:$16 sps:$4 sm:$0xff]   ;;  %v10417_v1 = vld [vmem:[#allocation5 + $0x44c] ss:$16 sps:$4 sm:$0xff]   ;;  %v10469_v49 = vld [vmem:[#allocation5 + $0x568] ss:$16 sps:$4 sm:$0xff]  }
 0x2c5   :  { %2600 = vmatprep.subr.bf16.mxu0 %v10354_v4  ;;  %2764 = vmatprep.subr.bf16.mxu1 %v10357_v5  ;;  %v10415_v4 = vld [vmem:[#allocation5 + $0x448] ss:$16 sps:$4 sm:$0xff]   ;;  %v10420_v5 = vld [vmem:[#allocation5 + $0x464] ss:$16 sps:$4 sm:$0xff]   ;;  %v10483_v55 = vld [vmem:[#allocation5 + $0x5ac] ss:$16 sps:$4 sm:$0xff]  }
 0x2c8   :  { %2601 = vmatpush1.bf16.msra.mxu0 %v10352_v7  ;;  %2765 = vmatpush1.bf16.msra.mxu1 %v10355_v8  ;;  %v10418_v7 = vld [vmem:[#allocation5 + $0x460] ss:$16 sps:$4 sm:$0xff]   ;;  %v10421_v8 = vld [vmem:[#allocation5 + $0x468] ss:$16 sps:$4 sm:$0xff]  }
 0x2c9   :  { %2602 = vmatprep.subr.bf16.mxu0 %v10360_v13  ;;  %2766 = vmatprep.subr.bf16.mxu1 %v10363_v14  ;;  %v10426_v13 = vld [vmem:[#allocation5 + $0x484] ss:$16 sps:$4 sm:$0xff]   ;;  %v10429_v14 = vld [vmem:[#allocation5 + $0x48c] ss:$16 sps:$4 sm:$0xff]  }
 0x2cc   :  { %2603 = vmatpush1.bf16.msra.mxu0 %v10358_v15  ;;  %2767 = vmatpush1.bf16.msra.mxu1 %v10361_v17  ;;  %v10424_v15 = vld [vmem:[#allocation5 + $0x480] ss:$16 sps:$4 sm:$0xff]   ;;  %v10427_v17 = vld [vmem:[#allocation5 + $0x488] ss:$16 sps:$4 sm:$0xff]  }
 0x2cd   :  { %2604 = vmatprep.subr.bf16.mxu0 %v10366_v18  ;;  %2768 = vmatprep.subr.bf16.mxu1 %v10369_v19  ;;  %v10432_v18 = vld [vmem:[#allocation5 + $0x4a4] ss:$16 sps:$4 sm:$0xff]   ;;  %v10435_v19 = vld [vmem:[#allocation5 + $0x4ac] ss:$16 sps:$4 sm:$0xff]  }
 0x2d0   :  { %2605 = vmatpush1.bf16.msra.mxu0 %v10364_v20  ;;  %2769 = vmatpush1.bf16.msra.mxu1 %v10367_v21  ;;  %v10430_v20 = vld [vmem:[#allocation5 + $0x4a0] ss:$16 sps:$4 sm:$0xff]   ;;  %v10433_v21 = vld [vmem:[#allocation5 + $0x4a8] ss:$16 sps:$4 sm:$0xff]  }
 0x2d1   :  { %2606 = vmatprep.subr.bf16.mxu0 %v10372_v22  ;;  %2770 = vmatprep.subr.bf16.mxu1 %v10375_v23  ;;  %v10438_v22 = vld [vmem:[#allocation5 + $0x4c4] ss:$16 sps:$4 sm:$0xff]   ;;  %v10441_v23 = vld [vmem:[#allocation5 + $0x4cc] ss:$16 sps:$4 sm:$0xff]  }
 0x2d4   :  { %2607 = vmatpush1.bf16.msra.mxu0 %v10370_v24  ;;  %2771 = vmatpush1.bf16.msra.mxu1 %v10373_v2  ;;  %v10436_v24 = vld [vmem:[#allocation5 + $0x4c0] ss:$16 sps:$4 sm:$0xff]   ;;  %v10439_v2 = vld [vmem:[#allocation5 + $0x4c8] ss:$16 sps:$4 sm:$0xff]  }
 0x2d5   :  { %2608 = vmatprep.subr.bf16.mxu0 %v10378_v25  ;;  %2772 = vmatprep.subr.bf16.mxu1 %v10381_v26  ;;  %v10444_v25 = vld [vmem:[#allocation5 + $0x4e4] ss:$16 sps:$4 sm:$0xff]   ;;  %v10447_v26 = vld [vmem:[#allocation5 + $0x4ec] ss:$16 sps:$4 sm:$0xff]  }
 0x2d8   :  { %2609 = vmatpush1.bf16.msra.mxu0 %v10376_v29  ;;  %2773 = vmatpush1.bf16.msra.mxu1 %v10379_v30  ;;  %v10442_v29 = vld [vmem:[#allocation5 + $0x4e0] ss:$16 sps:$4 sm:$0xff]   ;;  %v10445_v30 = vld [vmem:[#allocation5 + $0x4e8] ss:$16 sps:$4 sm:$0xff]  }
 0x2d9   :  { %2610 = vmatprep.subr.bf16.mxu0 %v10384_v31  ;;  %2774 = vmatprep.subr.bf16.mxu1 %v10387_v32  ;;  %v10450_v31 = vld [vmem:[#allocation5 + $0x504] ss:$16 sps:$4 sm:$0xff]   ;;  %v10453_v32 = vld [vmem:[#allocation5 + $0x50c] ss:$16 sps:$4 sm:$0xff]  }
 0x2dc   :  { %2611 = vmatpush1.bf16.msra.mxu0 %v10382_v35  ;;  %2775 = vmatpush1.bf16.msra.mxu1 %v10385_v36  ;;  %v10451_v35 = vld [vmem:[#allocation5 + $0x508] ss:$16 sps:$4 sm:$0xff]   ;;  %v10456_v36 = vld [vmem:[#allocation5 + $0x524] ss:$16 sps:$4 sm:$0xff]  }
 0x2dd   :  { %2612 = vmatprep.subr.bf16.mxu0 %v10390_v38  ;;  %2776 = vmatprep.subr.bf16.mxu1 %v10393_v39  ;;  %v10459_v38 = vld [vmem:[#allocation5 + $0x52c] ss:$16 sps:$4 sm:$0xff]   ;;  %v10454_v39 = vld [vmem:[#allocation5 + $0x520] ss:$16 sps:$4 sm:$0xff]  }
 0x2e0   :  { %2613 = vmatpush1.bf16.msra.mxu0 %v10388_v45  ;;  %2777 = vmatpush1.bf16.msra.mxu1 %v10391_v46  ;;  %v10463_v45 = vld [vmem:[#allocation5 + $0x548] ss:$16 sps:$4 sm:$0xff]   ;;  %v10468_v46 = vld [vmem:[#allocation5 + $0x564] ss:$16 sps:$4 sm:$0xff]  }
 0x2e1   :  { %2614 = vmatprep.subr.bf16.mxu0 %v10396_v47  ;;  %2778 = vmatprep.subr.bf16.mxu1 %v10399_v48  ;;  %v10471_v47 = vld [vmem:[#allocation5 + $0x56c] ss:$16 sps:$4 sm:$0xff]   ;;  %v10466_v48 = vld [vmem:[#allocation5 + $0x560] ss:$16 sps:$4 sm:$0xff]  }
 0x2e4   :  { %2615 = vmatpush1.bf16.msra.mxu0 %v10394_v51  ;;  %2779 = vmatpush1.bf16.msra.mxu1 %v10397_v52  ;;  %v10477_v51 = vld [vmem:[#allocation5 + $0x58c] ss:$16 sps:$4 sm:$0xff]   ;;  %v463_v52 = vsub.s32 4, %v12181_v9 }
 0x2e5   :  { %2625 = vmatprep.subr.bf16.mxu0 %v10402_v11  ;;  %2789 = vmatprep.subr.bf16.mxu1 %v10405_v27  ;;  %v475_v11 = vsub.s32 7, %v12181_v9  ;;  %v10472_v27 = vld [vmem:[#allocation5 + $0x580] ss:$16 sps:$4 sm:$0xff]  }
 0x2e7   :  { %2617 = vmatmul.mubr.bf16.vlgmr.msra.gmra.mrb[8].mxu0 %v979_v56  ;;  %2781 = vmatmul.mubr.bf16.vlgmr.msra.gmra.mrb[8].mxu1 %v979_v56  ;;  %v12225_v56 = vld [vmem:[%s12403_s26] sm:$0xff] }
 0x2e8   :  { %2626 = vmatpush1.bf16.msra.mxu0 %v10400_v53  ;;  %2790 = vmatpush1.bf16.msra.mxu1 %v10403_v54  ;;  %v10475_v53 = vld [vmem:[#allocation5 + $0x588] ss:$16 sps:$4 sm:$0xff]   ;;  %v10480_v54 = vld [vmem:[#allocation5 + $0x5a4] ss:$16 sps:$4 sm:$0xff]  }
 0x2e9   :  { %2627 = vmatprep.subr.bf16.mxu0 %v10408_v57  ;;  %2791 = vmatprep.subr.bf16.mxu1 %v10411_v58  ;;  %v464_v57 = vrot.slane %v12225_v56, %v463_v52  ;;  %v476_v58 = vrot.slane %v12225_v56, %v475_v11 }
 0x2ea   :  { %2657 = vmatprep.mubr.bf16.mxu0 %v982_v59  ;;  %2821 = vmatprep.mubr.bf16.mxu1 %v982_v59  ;;  %v10478_v59 = vld [vmem:[#allocation5 + $0x5a0] ss:$16 sps:$4 sm:$0xff]  }
 0x2ec   :  { %2628 = vmatpush1.bf16.msra.mxu0 %v10406_v60  ;;  %2792 = vmatpush1.bf16.msra.mxu1 %v10409_v62  ;;  %v10481_v60 = vld [vmem:[#allocation5 + $0x5a8] ss:$16 sps:$4 sm:$0xff]   ;;  %v922_v62 = vadd.f32 %v12203_v61, %v464_v57  ;;  %v10496_v61 = vld [vmem:[#allocation5 + $0x600] ss:$16 sps:$4 sm:$0xff]  }
 0x2ed   :  { %2629 = vmatprep.subr.bf16.mxu0 %v10414_v63  ;;  %2793 = vmatprep.subr.bf16.mxu1 %v10417_v1  ;;  %v10486_v63 = vld [vmem:[#allocation5 + $0x5c4] ss:$16 sps:$4 sm:$0xff]   ;;  %v10489_v1 = vld [vmem:[#allocation5 + $0x5cc] ss:$16 sps:$4 sm:$0xff]   ;;  %v10547_v57 = vld [vmem:[#allocation5 + $0x708] ss:$16 sps:$4 sm:$0xff]  }
 0x2f0   :  { %2630 = vmatpush1.bf16.msra.mxu0 %v10412_v3  ;;  %2794 = vmatpush1.bf16.msra.mxu1 %v10415_v4  ;;  %v965_v3 = vadd.f32 %v12215_v40, %v476_v58  ;;  %v10484_v4 = vld [vmem:[#allocation5 + $0x5c0] ss:$16 sps:$4 sm:$0xff]   ;;  %v10499_v40 = vld [vmem:[#allocation5 + $0x608] ss:$16 sps:$4 sm:$0xff]   ;;  %v10552_v58 = vld [vmem:[#allocation5 + $0x724] ss:$16 sps:$4 sm:$0xff]  }
 0x2f1   :  { %2631 = vmatprep.subr.bf16.mxu0 %v10420_v5  ;;  %2795 = vmatprep.subr.bf16.mxu1 %v10423_v6  ;;  %v10487_v5 = vld [vmem:[#allocation5 + $0x5c8] ss:$16 sps:$4 sm:$0xff]   ;;  %v10492_v6 = vld [vmem:[#allocation5 + $0x5e4] ss:$16 sps:$4 sm:$0xff]  }
 0x2f4   :  { %2632 = vmatpush1.bf16.msra.mxu0 %v10418_v7  ;;  %2796 = vmatpush1.bf16.msra.mxu1 %v10421_v8  ;;  %v10495_v7 = vld [vmem:[#allocation5 + $0x5ec] ss:$16 sps:$4 sm:$0xff]   ;;  %v973_v8 = vmax.f32 %v922_v62, 0.0  ;;  %v10553_v62 = vld [vmem:[#allocation5 + $0x728] ss:$16 sps:$4 sm:$0xff]  }
 0x2f5   :  { %2633 = vmatprep.subr.bf16.mxu0 %v10426_v13  ;;  %2797 = vmatprep.subr.bf16.mxu1 %v10429_v14  ;;  %v976_v13 = vmax.f32 %v965_v3, 0.0  ;;  %v10490_v14 = vld [vmem:[#allocation5 + $0x5e0] ss:$16 sps:$4 sm:$0xff]  }
 0x2f6   :  { %v10556_v3 = vld [vmem:[#allocation5 + $0x740] ss:$16 sps:$4 sm:$0xff]  }
 0x2f8   :  { %2634 = vmatpush1.bf16.msra.mxu0 %v10424_v15  ;;  %2798 = vmatpush1.bf16.msra.mxu1 %v10427_v17  ;;  %v10493_v15 = vld [vmem:[#allocation5 + $0x5e8] ss:$16 sps:$4 sm:$0xff]   ;;  %v10498_v17 = vld [vmem:[#allocation5 + $0x604] ss:$16 sps:$4 sm:$0xff]  }
 0x2f9   :  { %2635 = vmatprep.subr.bf16.mxu0 %v10432_v18  ;;  %2799 = vmatprep.subr.bf16.mxu1 %v10435_v19  ;;  %v10501_v18 = vld [vmem:[#allocation5 + $0x60c] ss:$16 sps:$4 sm:$0xff]   ;;  %v981_v19 = vpack.c.bf16 %v973_v8, %v973_v8  ;;  %v10565_v8 = vld [vmem:[#allocation5 + $0x768] ss:$16 sps:$4 sm:$0xff]  }
 0x2fc   :  { %2636 = vmatpush1.bf16.msra.mxu0 %v10430_v20  ;;  %2800 = vmatpush1.bf16.msra.mxu1 %v10433_v21  ;;  %v10504_v20 = vld [vmem:[#allocation5 + $0x624] ss:$16 sps:$4 sm:$0xff]   ;;  %v10507_v21 = vld [vmem:[#allocation5 + $0x62c] ss:$16 sps:$4 sm:$0xff]  }
 0x2fd   :  { %2637 = vmatprep.subr.bf16.mxu0 %v10438_v22  ;;  %2801 = vmatprep.subr.bf16.mxu1 %v10441_v23  ;;  %v10502_v22 = vld [vmem:[#allocation5 + $0x620] ss:$16 sps:$4 sm:$0xff]   ;;  %v10505_v23 = vld [vmem:[#allocation5 + $0x628] ss:$16 sps:$4 sm:$0xff]  }
 0x300   :  { %2638 = vmatpush1.bf16.msra.mxu0 %v10436_v24  ;;  %2802 = vmatpush1.bf16.msra.mxu1 %v10439_v2  ;;  %v984_v24 = vpack.c.bf16 %v976_v13, %v976_v13  ;;  %v10510_v2 = vld [vmem:[#allocation5 + $0x644] ss:$16 sps:$4 sm:$0xff]  }
 0x301   :  { %2639 = vmatprep.subr.bf16.mxu0 %v10444_v25  ;;  %2803 = vmatprep.subr.bf16.mxu1 %v10447_v26  ;;  %v10513_v25 = vld [vmem:[#allocation5 + $0x64c] ss:$16 sps:$4 sm:$0xff]   ;;  %v10508_v26 = vld [vmem:[#allocation5 + $0x640] ss:$16 sps:$4 sm:$0xff]   ;;  %v10570_v13 = vld [vmem:[#allocation5 + $0x784] ss:$16 sps:$4 sm:$0xff]  }
 0x304   :  { %2640 = vmatpush1.bf16.msra.mxu0 %v10442_v29  ;;  %2804 = vmatpush1.bf16.msra.mxu1 %v10445_v30  ;;  %v10511_v29 = vld [vmem:[#allocation5 + $0x648] ss:$16 sps:$4 sm:$0xff]   ;;  %v10516_v30 = vld [vmem:[#allocation5 + $0x664] ss:$16 sps:$4 sm:$0xff]  }
 0x305   :  { %2641 = vmatprep.subr.bf16.mxu0 %v10450_v31  ;;  %2805 = vmatprep.subr.bf16.mxu1 %v10453_v32  ;;  %v10519_v31 = vld [vmem:[#allocation5 + $0x66c] ss:$16 sps:$4 sm:$0xff]   ;;  %v10514_v32 = vld [vmem:[#allocation5 + $0x660] ss:$16 sps:$4 sm:$0xff]  }
 0x308   :  { %2642 = vmatpush1.bf16.msra.mxu0 %v10448_v34  ;;  %2806 = vmatpush1.bf16.msra.mxu1 %v10451_v35  ;;  %v10517_v34 = vld [vmem:[#allocation5 + $0x668] ss:$16 sps:$4 sm:$0xff]   ;;  %v10522_v35 = vld [vmem:[#allocation5 + $0x684] ss:$16 sps:$4 sm:$0xff]  }
 0x309   :  { %2643 = vmatprep.subr.bf16.mxu0 %v10456_v36  ;;  %2807 = vmatprep.subr.bf16.mxu1 %v10459_v38  ;;  %v10525_v36 = vld [vmem:[#allocation5 + $0x68c] ss:$16 sps:$4 sm:$0xff]   ;;  %v10520_v38 = vld [vmem:[#allocation5 + $0x680] ss:$16 sps:$4 sm:$0xff]  }
 0x30c   :  { %2644 = vmatpush1.bf16.msra.mxu0 %v10454_v39  ;;  %2808 = vmatpush1.bf16.msra.mxu1 %v10457_v41  ;;  %v10523_v39 = vld [vmem:[#allocation5 + $0x688] ss:$16 sps:$4 sm:$0xff]   ;;  %v10528_v41 = vld [vmem:[#allocation5 + $0x6a4] ss:$16 sps:$4 sm:$0xff]  }
 0x30d   :  { %2645 = vmatprep.subr.bf16.mxu0 %v10462_v42  ;;  %2809 = vmatprep.subr.bf16.mxu1 %v10465_v43  ;;  %v10531_v42 = vld [vmem:[#allocation5 + $0x6ac] ss:$16 sps:$4 sm:$0xff]   ;;  %v10526_v43 = vld [vmem:[#allocation5 + $0x6a0] ss:$16 sps:$4 sm:$0xff]  }
 0x310   :  { %2646 = vmatpush1.bf16.msra.mxu0 %v10460_v44  ;;  %2810 = vmatpush1.bf16.msra.mxu1 %v10463_v45  ;;  %v10529_v44 = vld [vmem:[#allocation5 + $0x6a8] ss:$16 sps:$4 sm:$0xff]   ;;  %v10534_v45 = vld [vmem:[#allocation5 + $0x6c4] ss:$16 sps:$4 sm:$0xff]  }
 0x311   :  { %2647 = vmatprep.subr.bf16.mxu0 %v10468_v46  ;;  %2811 = vmatprep.subr.bf16.mxu1 %v10471_v47  ;;  %v10537_v46 = vld [vmem:[#allocation5 + $0x6cc] ss:$16 sps:$4 sm:$0xff]   ;;  %v10532_v47 = vld [vmem:[#allocation5 + $0x6c0] ss:$16 sps:$4 sm:$0xff]  }
 0x314   :  { %2648 = vmatpush1.bf16.msra.mxu0 %v10466_v48  ;;  %2812 = vmatpush1.bf16.msra.mxu1 %v10469_v49  ;;  %v10535_v48 = vld [vmem:[#allocation5 + $0x6c8] ss:$16 sps:$4 sm:$0xff]   ;;  %v10540_v49 = vld [vmem:[#allocation5 + $0x6e4] ss:$16 sps:$4 sm:$0xff]  }
 0x315   :  { %2649 = vmatprep.subr.bf16.mxu0 %v10474_v50  ;;  %2813 = vmatprep.subr.bf16.mxu1 %v10477_v51  ;;  %v10543_v50 = vld [vmem:[#allocation5 + $0x6ec] ss:$16 sps:$4 sm:$0xff]   ;;  %v10538_v51 = vld [vmem:[#allocation5 + $0x6e0] ss:$16 sps:$4 sm:$0xff]  }
 0x318   :  { %2650 = vmatpush1.bf16.msra.mxu0 %v10472_v27  ;;  %2814 = vmatpush1.bf16.msra.mxu1 %v10475_v53  ;;  %v10541_v27 = vld [vmem:[#allocation5 + $0x6e8] ss:$16 sps:$4 sm:$0xff]   ;;  %v10546_v53 = vld [vmem:[#allocation5 + $0x704] ss:$16 sps:$4 sm:$0xff]  }
 0x319   :  { %2651 = vmatprep.subr.bf16.mxu0 %v10480_v54  ;;  %2815 = vmatprep.subr.bf16.mxu1 %v10483_v55  ;;  %v10549_v54 = vld [vmem:[#allocation5 + $0x70c] ss:$16 sps:$4 sm:$0xff]   ;;  %v10544_v55 = vld [vmem:[#allocation5 + $0x700] ss:$16 sps:$4 sm:$0xff]  }
 0x31c   :  { %2652 = vmatpush1.bf16.msra.mxu0 %v10478_v59  ;;  %2816 = vmatpush1.bf16.msra.mxu1 %v10481_v60  ;;  %v10555_v59 = vld [vmem:[#allocation5 + $0x72c] ss:$16 sps:$4 sm:$0xff]   ;;  %v10550_v60 = vld [vmem:[#allocation5 + $0x720] ss:$16 sps:$4 sm:$0xff]  }
 0x31d   :  { %2653 = vmatprep.subr.bf16.mxu0 %v10486_v63  ;;  %2817 = vmatprep.subr.bf16.mxu1 %v10489_v1  ;;  %v10558_v63 = vld [vmem:[#allocation5 + $0x744] ss:$16 sps:$4 sm:$0xff]   ;;  %v10561_v1 = vld [vmem:[#allocation5 + $0x74c] ss:$16 sps:$4 sm:$0xff]  }
 0x320   :  { %2654 = vmatpush1.bf16.msra.mxu0 %v10484_v4  ;;  %2818 = vmatpush1.bf16.msra.mxu1 %v10487_v5  ;;  %v10559_v4 = vld [vmem:[#allocation5 + $0x748] ss:$16 sps:$4 sm:$0xff]   ;;  %v10564_v5 = vld [vmem:[#allocation5 + $0x764] ss:$16 sps:$4 sm:$0xff]  }
 0x321   :  { %2655 = vmatprep.subr.bf16.mxu0 %v10492_v6  ;;  %2819 = vmatprep.subr.bf16.mxu1 %v10495_v7  ;;  %v10567_v6 = vld [vmem:[#allocation5 + $0x76c] ss:$16 sps:$4 sm:$0xff]   ;;  %v10562_v7 = vld [vmem:[#allocation5 + $0x760] ss:$16 sps:$4 sm:$0xff]  }
 0x324   :  { %2656 = vmatpush1.bf16.msra.mxu0 %v10490_v14  ;;  %2820 = vmatpush1.bf16.msra.mxu1 %v10493_v15  ;;  %v10573_v14 = vld [vmem:[#allocation5 + $0x78c] ss:$16 sps:$4 sm:$0xff]   ;;  %v10568_v15 = vld [vmem:[#allocation5 + $0x780] ss:$16 sps:$4 sm:$0xff]  }
 0x325   :  { %2666 = vmatprep.subr.bf16.mxu0 %v10498_v17  ;;  %2830 = vmatprep.subr.bf16.mxu1 %v10501_v18  ;;  %v10571_v17 = vld [vmem:[#allocation5 + $0x788] ss:$16 sps:$4 sm:$0xff]   ;;  %v471_v18 = vsub.s32 6, %v12181_v9 }
 0x327   :  { %2658 = vmatmul.mubr.bf16.vlgmr.msra.gmra.mrb[8].mxu0 %v981_v19  ;;  %2822 = vmatmul.mubr.bf16.vlgmr.msra.gmra.mrb[8].mxu1 %v981_v19  ;;  %v10574_v19 = vld [vmem:[#allocation5 + $0x7a0] ss:$16 sps:$4 sm:$0xff]  }
 0x328   :  { %2667 = vmatpush1.bf16.msra.mxu0 %v10496_v61  ;;  %2831 = vmatpush1.bf16.msra.mxu1 %v10499_v40  ;;  %v10576_v61 = vld [vmem:[#allocation5 + $0x7a4] ss:$16 sps:$4 sm:$0xff]   ;;  %v10579_v40 = vld [vmem:[#allocation5 + $0x7ac] ss:$16 sps:$4 sm:$0xff]  }
 0x329   :  { %2668 = vmatprep.subr.bf16.mxu0 %v10504_v20  ;;  %2832 = vmatprep.subr.bf16.mxu1 %v10507_v21  ;;  %v10577_v20 = vld [vmem:[#allocation5 + $0x7a8] ss:$16 sps:$4 sm:$0xff]   ;;  %v472_v21 = vrot.slane %v12225_v56, %v471_v18  ;;  %v10586_v56 = vld [vmem:[#allocation5 + $0x7e0] ss:$16 sps:$4 sm:$0xff]  }
 0x32a   :  { %2698 = vmatprep.mubr.bf16.mxu0 %v984_v24  ;;  %2862 = vmatprep.mubr.bf16.mxu1 %v984_v24  ;;  %v10580_v24 = vld [vmem:[#allocation5 + $0x7c0] ss:$16 sps:$4 sm:$0xff]  }
 0x32c   :  { %2669 = vmatpush1.bf16.msra.mxu0 %v10502_v22  ;;  %2833 = vmatpush1.bf16.msra.mxu1 %v10505_v23  ;;  %v10582_v22 = vld [vmem:[#allocation5 + $0x7c4] ss:$16 sps:$4 sm:$0xff]   ;;  %v10585_v23 = vld [vmem:[#allocation5 + $0x7cc] ss:$16 sps:$4 sm:$0xff]  }
 0x32d   :  { %2670 = vmatprep.subr.bf16.mxu0 %v10510_v2  ;;  %2834 = vmatprep.subr.bf16.mxu1 %v10513_v25  ;;  %v10583_v2 = vld [vmem:[#allocation5 + $0x7c8] ss:$16 sps:$4 sm:$0xff]   ;;  %v963_v25 = vadd.f32 %v12213_v37, %v472_v21 }
 0x32e   :  { %v10592_v37 = vld [vmem:[%s12404_s12] ss:$8 sps:$4 sm:$0xff]  }
 0x32f   :  { %v10652_v21 = vld [vmem:[#allocation7 + $0xc0] ss:$8 sps:$4 sm:$0xff]  }
 0x330   :  { %2671 = vmatpush1.bf16.msra.mxu0 %v10508_v26  ;;  %2835 = vmatpush1.bf16.msra.mxu1 %v10511_v29  ;;  %v10588_v26 = vld [vmem:[#allocation5 + $0x7e4] ss:$16 sps:$4 sm:$0xff]   ;;  %v10591_v29 = vld [vmem:[#allocation5 + $0x7ec] ss:$16 sps:$4 sm:$0xff]  }
 0x331   :  { %2672 = vmatprep.subr.bf16.mxu0 %v10516_v30  ;;  %2836 = vmatprep.subr.bf16.mxu1 %v10519_v31  ;;  %v10589_v30 = vld [vmem:[#allocation5 + $0x7e8] ss:$16 sps:$4 sm:$0xff]   ;;  %v975_v31 = vmax.f32 %v963_v25, 0.0  ;;  %v10663_v25 = vld [vmem:[#allocation7 + $0xf4] ss:$8 sps:$4 sm:$0xff]  }
 0x334   :  { %2673 = vmatpush1.bf16.msra.mxu0 %v10514_v32  ;;  %2837 = vmatpush1.bf16.msra.mxu1 %v10517_v34  ;;  %v10594_v32 = vld [vmem:[%s12404_s12 + $0x4] ss:$8 sps:$4 sm:$0xff]  }
 0x335   :  { %2674 = vmatprep.subr.bf16.mxu0 %v10522_v35  ;;  %2838 = vmatprep.subr.bf16.mxu1 %v10525_v36  ;;  %v10618_v34 = vld [vmem:[#allocation7 + $0x4] ss:$8 sps:$4 sm:$0xff]   ;;  %v983_v35 = vpack.c.bf16 %v975_v31, %v975_v31  ;;  %v10597_v36 = vld [vmem:[%s12404_s12 + $0x14] ss:$8 sps:$4 sm:$0xff]   ;;  %v10717_v31 = vld [vmem:[#allocation13 + $0x24] ss:$16 sps:$4 sm:$0xff]  }
 0x338   :  { %2675 = vmatpush1.bf16.msra.mxu0 %v10520_v38  ;;  %2839 = vmatpush1.bf16.msra.mxu1 %v10523_v39  ;;  %v10616_v38 = vld [vmem:[#allocation7] ss:$8 sps:$4 sm:$0xff]   ;;  %v10621_v39 = vld [vmem:[#allocation7 + $0x14] ss:$8 sps:$4 sm:$0xff]  }
 0x339   :  { %2676 = vmatprep.subr.bf16.mxu0 %v10528_v41  ;;  %2840 = vmatprep.subr.bf16.mxu1 %v10531_v42  ;;  %v10595_v41 = vld [vmem:[%s12404_s12 + $0x10] ss:$8 sps:$4 sm:$0xff]   ;;  %v10600_v42 = vld [vmem:[%s12404_s12 + $0x24] ss:$8 sps:$4 sm:$0xff]  }
 0x33c   :  { %2677 = vmatpush1.bf16.msra.mxu0 %v10526_v43  ;;  %2841 = vmatpush1.bf16.msra.mxu1 %v10529_v44  ;;  %v10619_v43 = vld [vmem:[#allocation7 + $0x10] ss:$8 sps:$4 sm:$0xff]   ;;  %v10624_v44 = vld [vmem:[#allocation7 + $0x24] ss:$8 sps:$4 sm:$0xff]  }
 0x33d   :  { %2678 = vmatprep.subr.bf16.mxu0 %v10534_v45  ;;  %2842 = vmatprep.subr.bf16.mxu1 %v10537_v46  ;;  %v10598_v45 = vld [vmem:[%s12404_s12 + $0x20] ss:$8 sps:$4 sm:$0xff]   ;;  %v10603_v46 = vld [vmem:[%s12404_s12 + $0x34] ss:$8 sps:$4 sm:$0xff]  }
 0x340   :  { %2679 = vmatpush1.bf16.msra.mxu0 %v10532_v47  ;;  %2843 = vmatpush1.bf16.msra.mxu1 %v10535_v48  ;;  %v10622_v47 = vld [vmem:[#allocation7 + $0x20] ss:$8 sps:$4 sm:$0xff]   ;;  %v10627_v48 = vld [vmem:[#allocation7 + $0x34] ss:$8 sps:$4 sm:$0xff]  }
 0x341   :  { %2680 = vmatprep.subr.bf16.mxu0 %v10540_v49  ;;  %2844 = vmatprep.subr.bf16.mxu1 %v10543_v50  ;;  %v10601_v49 = vld [vmem:[%s12404_s12 + $0x30] ss:$8 sps:$4 sm:$0xff]   ;;  %v10606_v50 = vld [vmem:[%s12404_s12 + $0x44] ss:$8 sps:$4 sm:$0xff]  }
 0x344   :  { %2681 = vmatpush1.bf16.msra.mxu0 %v10538_v51  ;;  %2845 = vmatpush1.bf16.msra.mxu1 %v10541_v27  ;;  %v10625_v51 = vld [vmem:[#allocation7 + $0x30] ss:$8 sps:$4 sm:$0xff]   ;;  %v10630_v27 = vld [vmem:[#allocation7 + $0x44] ss:$8 sps:$4 sm:$0xff]  }
 0x345   :  { %2682 = vmatprep.subr.bf16.mxu0 %v10546_v53  ;;  %2846 = vmatprep.subr.bf16.mxu1 %v10549_v54  ;;  %v10604_v53 = vld [vmem:[%s12404_s12 + $0x40] ss:$8 sps:$4 sm:$0xff]   ;;  %v10609_v54 = vld [vmem:[%s12404_s12 + $0x54] ss:$8 sps:$4 sm:$0xff]  }
 0x348   :  { %2683 = vmatpush1.bf16.msra.mxu0 %v10544_v55  ;;  %2847 = vmatpush1.bf16.msra.mxu1 %v10547_v57  ;;  %v10628_v55 = vld [vmem:[#allocation7 + $0x40] ss:$8 sps:$4 sm:$0xff]   ;;  %v10633_v57 = vld [vmem:[#allocation7 + $0x54] ss:$8 sps:$4 sm:$0xff]  }
 0x349   :  { %2684 = vmatprep.subr.bf16.mxu0 %v10552_v58  ;;  %2848 = vmatprep.subr.bf16.mxu1 %v10555_v59  ;;  %v10607_v58 = vld [vmem:[%s12404_s12 + $0x50] ss:$8 sps:$4 sm:$0xff]   ;;  %v10612_v59 = vld [vmem:[%s12404_s12 + $0x64] ss:$8 sps:$4 sm:$0xff]  }
 0x34c   :  { %2685 = vmatpush1.bf16.msra.mxu0 %v10550_v60  ;;  %2849 = vmatpush1.bf16.msra.mxu1 %v10553_v62  ;;  %v10631_v60 = vld [vmem:[#allocation7 + $0x50] ss:$8 sps:$4 sm:$0xff]   ;;  %v10636_v62 = vld [vmem:[#allocation7 + $0x64] ss:$8 sps:$4 sm:$0xff]  }
 0x34d   :  { %2686 = vmatprep.subr.bf16.mxu0 %v10558_v63  ;;  %2850 = vmatprep.subr.bf16.mxu1 %v10561_v1  ;;  %v10610_v63 = vld [vmem:[%s12404_s12 + $0x60] ss:$8 sps:$4 sm:$0xff]   ;;  %v10615_v1 = vld [vmem:[%s12404_s12 + $0x74] ss:$8 sps:$4 sm:$0xff]  }
 0x350   :  { %2687 = vmatpush1.bf16.msra.mxu0 %v10556_v3  ;;  %2851 = vmatpush1.bf16.msra.mxu1 %v10559_v4  ;;  %v10634_v3 = vld [vmem:[#allocation7 + $0x60] ss:$8 sps:$4 sm:$0xff]   ;;  %v10639_v4 = vld [vmem:[#allocation7 + $0x74] ss:$8 sps:$4 sm:$0xff]  }
 0x351   :  { %2688 = vmatprep.subr.bf16.mxu0 %v10564_v5  ;;  %2852 = vmatprep.subr.bf16.mxu1 %v10567_v6  ;;  %v10613_v5 = vld [vmem:[%s12404_s12 + $0x70] ss:$8 sps:$4 sm:$0xff]  }
 0x352   :  { %v10637_v6 = vld [vmem:[#allocation7 + $0x70] ss:$8 sps:$4 sm:$0xff]  }
 0x354   :  { %2689 = vmatpush1.bf16.msra.mxu0 %v10562_v7  ;;  %2853 = vmatpush1.bf16.msra.mxu1 %v10565_v8  ;;  %v10642_v7 = vld [vmem:[#allocation7 + $0x84] ss:$8 sps:$4 sm:$0xff]   ;;  %v378_v8 = vld [vmem:[%s12405_s5] sm:$0xf] }
 0x355   :  { %2690 = vmatprep.subr.bf16.mxu0 %v10570_v13  ;;  %2854 = vmatprep.subr.bf16.mxu1 %v10573_v14  ;;  %v10640_v13 = vld [vmem:[#allocation7 + $0x80] ss:$8 sps:$4 sm:$0xff]   ;;  %v10645_v14 = vld [vmem:[#allocation7 + $0x94] ss:$8 sps:$4 sm:$0xff]  }
 0x358   :  { %2691 = vmatpush1.bf16.msra.mxu0 %v10568_v15  ;;  %2855 = vmatpush1.bf16.msra.mxu1 %v10571_v17  ;;  %v10643_v15 = vld [vmem:[#allocation7 + $0x90] ss:$8 sps:$4 sm:$0xff]   ;;  %v10648_v17 = vld [vmem:[#allocation7 + $0xa4] ss:$8 sps:$4 sm:$0xff]  }
 0x359   :  { %2692 = vmatprep.subr.bf16.mxu0 %v10576_v61  ;;  %2856 = vmatprep.subr.bf16.mxu1 %v10579_v40  ;;  %v10646_v61 = vld [vmem:[#allocation7 + $0xa0] ss:$8 sps:$4 sm:$0xff]   ;;  %v10651_v40 = vld [vmem:[#allocation7 + $0xb4] ss:$8 sps:$4 sm:$0xff]  }
 0x35c   :  { %2693 = vmatpush1.bf16.msra.mxu0 %v10574_v19  ;;  %2857 = vmatpush1.bf16.msra.mxu1 %v10577_v20  ;;  %v10649_v19 = vld [vmem:[#allocation7 + $0xb0] ss:$8 sps:$4 sm:$0xff]   ;;  %v10654_v20 = vld [vmem:[#allocation7 + $0xc4] ss:$8 sps:$4 sm:$0xff]  }
 0x35d   :  { %2694 = vmatprep.subr.bf16.mxu0 %v10582_v22  ;;  %2858 = vmatprep.subr.bf16.mxu1 %v10585_v23  ;;  %v10657_v22 = vld [vmem:[#allocation7 + $0xd4] ss:$8 sps:$4 sm:$0xff]   ;;  %v10655_v23 = vld [vmem:[#allocation7 + $0xd0] ss:$8 sps:$4 sm:$0xff]  }
 0x360   :  { %2695 = vmatpush1.bf16.msra.mxu0 %v10580_v24  ;;  %2859 = vmatpush1.bf16.msra.mxu1 %v10583_v2  ;;  %v10660_v24 = vld [vmem:[#allocation7 + $0xe4] ss:$8 sps:$4 sm:$0xff]   ;;  %v10658_v2 = vld [vmem:[#allocation7 + $0xe0] ss:$8 sps:$4 sm:$0xff]  }
 0x361   :  { %2696 = vmatprep.subr.bf16.mxu0 %v10588_v26  ;;  %2860 = vmatprep.subr.bf16.mxu1 %v10591_v29  ;;  %v10661_v26 = vld [vmem:[#allocation7 + $0xf0] ss:$8 sps:$4 sm:$0xff]   ;;  %v10666_v29 = vld [vmem:[#allocation7 + $0x104] ss:$8 sps:$4 sm:$0xff]  }
 0x364   :  { %2697 = vmatpush1.bf16.msra.mxu0 %v10586_v56  ;;  %2861 = vmatpush1.bf16.msra.mxu1 %v10589_v30  ;;  %v10712_v56 = vld [vmem:[#allocation13] ss:$16 sps:$4 sm:$0xff]   ;;  %v10714_v30 = vld [vmem:[#allocation13 + $0x4] ss:$16 sps:$4 sm:$0xff]  }
 0x365   :  { %3469 = vmatprep.subr.bf16.mxu1 %v10594_v32  ;;  %3275 = vmatprep.subr.bf16.mxu0 %v10618_v34  ;;  %v10715_v32 = vld [vmem:[#allocation13 + $0x20] ss:$16 sps:$4 sm:$0xff]   ;;  %v10720_v34 = vld [vmem:[#allocation13 + $0x44] ss:$16 sps:$4 sm:$0xff]  }
 0x367   :  { %2699 = vmatmul.mubr.bf16.vlgmr.msra.gmra.mrb[8].mxu0 %v983_v35  ;;  %2863 = vmatmul.mubr.bf16.vlgmr.msra.gmra.mrb[8].mxu1 %v983_v35  ;;  %v10723_v35 = vld [vmem:[#allocation13 + $0x64] ss:$16 sps:$4 sm:$0xff]  }
 0x368   :  { %3470 = vmatpush1.bf16.msra.mxu1 %v10592_v37  ;;  %3501 = vmatprep.mubr.bf16.mxu1 %v11897_v0  ;;  %v10718_v37 = vld [vmem:[#allocation13 + $0x40] ss:$16 sps:$4 sm:$0xff]  }
 0x369   :  { %3471 = vmatprep.subr.bf16.mxu1 %v10597_v36  ;;  %3276 = vmatpush1.bf16.msra.mxu0 %v10616_v38  ;;  %v10721_v36 = vld [vmem:[#allocation13 + $0x60] ss:$16 sps:$4 sm:$0xff]   ;;  %v10726_v38 = vld [vmem:[#allocation13 + $0x84] ss:$16 sps:$4 sm:$0xff]  }
 0x36a   :  { %3277 = vmatprep.subr.bf16.mxu0 %v10621_v39  ;;  %v10724_v39 = vld [vmem:[#allocation13 + $0x80] ss:$16 sps:$4 sm:$0xff]  }
 0x36c   :  { %3472 = vmatpush1.bf16.msra.mxu1 %v10595_v41  ;;  %v10729_v41 = vld [vmem:[#allocation13 + $0xa4] ss:$16 sps:$4 sm:$0xff]  }
 0x36d   :  { %3473 = vmatprep.subr.bf16.mxu1 %v10600_v42  ;;  %3278 = vmatpush1.bf16.msra.mxu0 %v10619_v43  ;;  %v10727_v42 = vld [vmem:[#allocation13 + $0xa0] ss:$16 sps:$4 sm:$0xff]   ;;  %v10732_v43 = vld [vmem:[#allocation13 + $0xc4] ss:$16 sps:$4 sm:$0xff]  }
 0x36e   :  { %3279 = vmatprep.subr.bf16.mxu0 %v10624_v44  ;;  %v10730_v44 = vld [vmem:[#allocation13 + $0xc0] ss:$16 sps:$4 sm:$0xff]  }
 0x370   :  { %3474 = vmatpush1.bf16.msra.mxu1 %v10598_v45  ;;  %v10735_v45 = vld [vmem:[#allocation13 + $0xe4] ss:$16 sps:$4 sm:$0xff]  }
 0x371   :  { %3475 = vmatprep.subr.bf16.mxu1 %v10603_v46  ;;  %3280 = vmatpush1.bf16.msra.mxu0 %v10622_v47  ;;  %v10733_v46 = vld [vmem:[#allocation13 + $0xe0] ss:$16 sps:$4 sm:$0xff]   ;;  %v10738_v47 = vld [vmem:[#allocation13 + $0x104] ss:$16 sps:$4 sm:$0xff]  }
 0x372   :  { %3281 = vmatprep.subr.bf16.mxu0 %v10627_v48  ;;  %v10736_v48 = vld [vmem:[#allocation13 + $0x100] ss:$16 sps:$4 sm:$0xff]  }
 0x374   :  { %3476 = vmatpush1.bf16.msra.mxu1 %v10601_v49  ;;  %v10741_v49 = vld [vmem:[#allocation13 + $0x124] ss:$16 sps:$4 sm:$0xff]  }
 0x375   :  { %3477 = vmatprep.subr.bf16.mxu1 %v10606_v50  ;;  %3282 = vmatpush1.bf16.msra.mxu0 %v10625_v51  ;;  %v10739_v50 = vld [vmem:[#allocation13 + $0x120] ss:$16 sps:$4 sm:$0xff]   ;;  %v10744_v51 = vld [vmem:[#allocation13 + $0x144] ss:$16 sps:$4 sm:$0xff]  }
 0x376   :  { %3283 = vmatprep.subr.bf16.mxu0 %v10630_v27  ;;  %v10742_v27 = vld [vmem:[#allocation13 + $0x140] ss:$16 sps:$4 sm:$0xff]  }
 0x378   :  { %3478 = vmatpush1.bf16.msra.mxu1 %v10604_v53  ;;  %v10747_v53 = vld [vmem:[#allocation13 + $0x164] ss:$16 sps:$4 sm:$0xff]  }
 0x379   :  { %3479 = vmatprep.subr.bf16.mxu1 %v10609_v54  ;;  %3284 = vmatpush1.bf16.msra.mxu0 %v10628_v55  ;;  %v10745_v54 = vld [vmem:[#allocation13 + $0x160] ss:$16 sps:$4 sm:$0xff]   ;;  %v10750_v55 = vld [vmem:[#allocation13 + $0x184] ss:$16 sps:$4 sm:$0xff]  }
 0x37a   :  { %3285 = vmatprep.subr.bf16.mxu0 %v10633_v57  ;;  %v10748_v57 = vld [vmem:[#allocation13 + $0x180] ss:$16 sps:$4 sm:$0xff]  }
 0x37c   :  { %3480 = vmatpush1.bf16.msra.mxu1 %v10607_v58  ;;  %v10753_v58 = vld [vmem:[#allocation13 + $0x1a4] ss:$16 sps:$4 sm:$0xff]  }
 0x37d   :  { %3481 = vmatprep.subr.bf16.mxu1 %v10612_v59  ;;  %3286 = vmatpush1.bf16.msra.mxu0 %v10631_v60  ;;  %v12259_v59 = vld [vmem:[%s12406_s28] sm:$0xf]  ;;  %v10751_v60 = vld [vmem:[#allocation13 + $0x1a0] ss:$16 sps:$4 sm:$0xff]  }
 0x37e   :  { %3287 = vmatprep.subr.bf16.mxu0 %v10636_v62  ;;  %v1246_v62 = vrot.slane %v12259_v59, %v12184_v10 }
 0x380   :  { %3482 = vmatpush1.bf16.msra.mxu1 %v10610_v63  ;;  %v10756_v63 = vld [vmem:[#allocation13 + $0x1c4] ss:$16 sps:$4 sm:$0xff]  }
 0x381   :  { %3483 = vmatprep.subr.bf16.mxu1 %v10615_v1  ;;  %3288 = vmatpush1.bf16.msra.mxu0 %v10634_v3  ;;  %v1250_v1 = vrot.slane %v12259_v59, %v12190_v12  ;;  %v1258_v3 = vrot.slane %v12259_v59, %v12197_v16 }
 0x382   :  { %3289 = vmatprep.subr.bf16.mxu0 %v10639_v4 }
 0x384   :  { %3484 = vmatpush1.bf16.msra.mxu1 %v10613_v5 }
 0x385   :  { %3290 = vmatpush1.bf16.msra.mxu0 %v10637_v6  ;;  %3962 = vmatprep.subr.bf16.mxu1 %v10714_v30  ;;  %v10754_v6 = vld [vmem:[#allocation13 + $0x1c0] ss:$16 sps:$4 sm:$0xff]  }
 0x386   :  { %3291 = vmatprep.subr.bf16.mxu0 %v10642_v7 }
 0x387   :  { %3502 = vmatmul.mubr.bf16.vlgmr.msra.gmra.mrb[12].mxu1 %v378_v8 }
 0x388   :  { %3963 = vmatpush1.bf16.msra.mxu1 %v10712_v56  ;;  %v10669_v56 = vld [vmem:[#allocation7 + $0x114] ss:$8 sps:$4 sm:$0xff]  }
 0x389   :  { %3292 = vmatpush1.bf16.msra.mxu0 %v10640_v13  ;;  %3964 = vmatprep.subr.bf16.mxu1 %v10717_v31  ;;  %v10667_v31 = vld [vmem:[#allocation7 + $0x110] ss:$8 sps:$4 sm:$0xff]  }
 0x38a   :  { %3293 = vmatprep.subr.bf16.mxu0 %v10645_v14  ;;  %v10759_v14 = vld [vmem:[#allocation13 + $0x1e4] ss:$16 sps:$4 sm:$0xff]  }
 0x38c   :  { %3965 = vmatpush1.bf16.msra.mxu1 %v10715_v32  ;;  %v10672_v32 = vld [vmem:[#allocation7 + $0x124] ss:$8 sps:$4 sm:$0xff]  }
 0x38d   :  { %3294 = vmatpush1.bf16.msra.mxu0 %v10643_v15  ;;  %3966 = vmatprep.subr.bf16.mxu1 %v10720_v34  ;;  %v10670_v34 = vld [vmem:[#allocation7 + $0x120] ss:$8 sps:$4 sm:$0xff]  }
 0x38e   :  { %3295 = vmatprep.subr.bf16.mxu0 %v10648_v17 }
 0x390   :  { %3967 = vmatpush1.bf16.msra.mxu1 %v10718_v37  ;;  %v10675_v37 = vld [vmem:[#allocation7 + $0x134] ss:$8 sps:$4 sm:$0xff]  }
 0x391   :  { %3296 = vmatpush1.bf16.msra.mxu0 %v10646_v61  ;;  %3968 = vmatprep.subr.bf16.mxu1 %v10723_v35  ;;  %v10673_v35 = vld [vmem:[#allocation7 + $0x130] ss:$8 sps:$4 sm:$0xff]  }
 0x392   :  { %3297 = vmatprep.subr.bf16.mxu0 %v10651_v40 }
 0x394   :  { %3969 = vmatpush1.bf16.msra.mxu1 %v10721_v36  ;;  %v10678_v36 = vld [vmem:[#allocation7 + $0x144] ss:$8 sps:$4 sm:$0xff]  }
 0x395   :  { %3298 = vmatpush1.bf16.msra.mxu0 %v10649_v19  ;;  %3970 = vmatprep.subr.bf16.mxu1 %v10726_v38  ;;  %v10676_v38 = vld [vmem:[#allocation7 + $0x140] ss:$8 sps:$4 sm:$0xff]  }
 0x396   :  { %3299 = vmatprep.subr.bf16.mxu0 %v10654_v20 }
 0x398   :  { %3971 = vmatpush1.bf16.msra.mxu1 %v10724_v39  ;;  %v10681_v39 = vld [vmem:[#allocation7 + $0x154] ss:$8 sps:$4 sm:$0xff]  }
 0x399   :  { %3300 = vmatpush1.bf16.msra.mxu0 %v10652_v21  ;;  %3972 = vmatprep.subr.bf16.mxu1 %v10729_v41  ;;  %v10679_v41 = vld [vmem:[#allocation7 + $0x150] ss:$8 sps:$4 sm:$0xff]  }
 0x39a   :  { %3301 = vmatprep.subr.bf16.mxu0 %v10657_v22 }
 0x39c   :  { %3973 = vmatpush1.bf16.msra.mxu1 %v10727_v42  ;;  %v3377_v42 = vld [vmem:[#allocation10] sm:$0x3] }
 0x39d   :  { %3302 = vmatpush1.bf16.msra.mxu0 %v10655_v23  ;;  %3974 = vmatprep.subr.bf16.mxu1 %v10732_v43  ;;  %v10684_v43 = vld [vmem:[#allocation7 + $0x164] ss:$8 sps:$4 sm:$0xff]  }
 0x39e   :  { %3303 = vmatprep.subr.bf16.mxu0 %v10660_v24  ;;  %v10757_v24 = vld [vmem:[#allocation13 + $0x1e0] ss:$16 sps:$4 sm:$0xff]  }
 0x3a0   :  { %3975 = vmatpush1.bf16.msra.mxu1 %v10730_v44  ;;  %v3382_v44 = vrot.slane %v3377_v42, %v12184_v10 }
 0x3a1   :  { %3304 = vmatpush1.bf16.msra.mxu0 %v10658_v2  ;;  %3976 = vmatprep.subr.bf16.mxu1 %v10735_v45  ;;  %v10762_v2 = vld [vmem:[#allocation13 + $0xc] ss:$16 sps:$4 sm:$0xff]  }
 0x3a2   :  { %3305 = vmatprep.subr.bf16.mxu0 %v10663_v25  ;;  %v10682_v45 = vld [vmem:[#allocation7 + $0x160] ss:$8 sps:$4 sm:$0xff]  }
 0x3a4   :  { %3977 = vmatpush1.bf16.msra.mxu1 %v10733_v46  ;;  %v3386_v46 = vrot.slane %v3377_v42, %v12190_v12  ;;  %v10784_v42 = vld [vmem:[#allocation13 + $0x108] ss:$16 sps:$4 sm:$0xff]  }
 0x3a5   :  { %3306 = vmatpush1.bf16.msra.mxu0 %v10661_v26  ;;  %3978 = vmatprep.subr.bf16.mxu1 %v10738_v47  ;;  %v10664_v26 = vld [vmem:[#allocation7 + $0x100] ss:$8 sps:$4 sm:$0xff]   ;;  %v10687_v47 = vld [vmem:[#allocation7 + $0x174] ss:$8 sps:$4 sm:$0xff]  }
 0x3a6   :  { %3316 = vmatprep.subr.bf16.mxu0 %v10666_v29 }
 0x3a8   :  { %3979 = vmatpush1.bf16.msra.mxu1 %v10736_v48 }
 0x3a9   :  { %3980 = vmatprep.subr.bf16.mxu1 %v10741_v49 }
 0x3ac   :  { %3981 = vmatpush1.bf16.msra.mxu1 %v10739_v50 }
 0x3ad   :  { %3982 = vmatprep.subr.bf16.mxu1 %v10744_v51  ;;  %v10685_v51 = vld [vmem:[#allocation7 + $0x170] ss:$8 sps:$4 sm:$0xff]  }
 0x3b0   :  { %3983 = vmatpush1.bf16.msra.mxu1 %v10742_v27 }
 0x3b1   :  { %3984 = vmatprep.subr.bf16.mxu1 %v10747_v53 }
 0x3b4   :  { %3985 = vmatpush1.bf16.msra.mxu1 %v10745_v54  ;;  %v10690_v54 = vld [vmem:[#allocation7 + $0x184] ss:$8 sps:$4 sm:$0xff]  }
 0x3b5   :  { %3986 = vmatprep.subr.bf16.mxu1 %v10750_v55 }
 0x3b8   :  { %3987 = vmatpush1.bf16.msra.mxu1 %v10748_v57 }
 0x3b9   :  { %3988 = vmatprep.subr.bf16.mxu1 %v10753_v58 }
 0x3bc   :  { %3989 = vmatpush1.bf16.msra.mxu1 %v10751_v60 }
 0x3bd   :  { %3990 = vmatprep.subr.bf16.mxu1 %v10756_v63 }
 0x3c0   :  { %3991 = vmatpush1.bf16.msra.mxu1 %v10754_v6  ;;  %v10691_v6 = vld [vmem:[#allocation7 + $0x190] ss:$8 sps:$4 sm:$0xff]  }
 0x3c1   :  { %3992 = vmatprep.subr.bf16.mxu1 %v10759_v14  ;;  %v10694_v14 = vld [vmem:[#allocation7 + $0x1a0] ss:$8 sps:$4 sm:$0xff]  }
 0x3c4   :  { %3993 = vmatpush1.bf16.msra.mxu1 %v10757_v24  ;;  %v10705_v24 = vld [vmem:[#allocation7 + $0x1d4] ss:$8 sps:$4 sm:$0xff]  }
 0x3c5   :  { %4003 = vmatprep.subr.bf16.mxu1 %v10762_v2  ;;  %v10777_v2 = vld [vmem:[#allocation13 + $0xac] ss:$16 sps:$4 sm:$0xff]  }
 0x43a   :  { %v2700_v4 = vpop.f32.mrb[8].mxu0  ;;  %v12267_v5 = vpop.f32.mrb[8].mxu1 }
 0x43b   :  { %v10083_v7 = vadd.f32 %v2700_v4, %v1246_v62  ;;  %v2702_v8 = vpop.f32.mrb[9].mxu0  ;;  %v2866_v13 = vpop.f32.mrb[9].mxu1  ;;  %v10688_v62 = vld [vmem:[#allocation7 + $0x180] ss:$8 sps:$4 sm:$0xff]  }
 0x43c   :  { %v10084_v15 = vadd.f32 %v2702_v8, %v1250_v1  ;;  %v10086_v17 = vadd.f32 %v2866_v13, %v1258_v3  ;;  %v2704_v61 = vpop.f32.mrb[10].mxu0  ;;  %v2868_v40 = vpop.f32.mrb[10].mxu1  ;;  %v10760_v1 = vld [vmem:[#allocation13 + $0x8] ss:$16 sps:$4 sm:$0xff]   ;;  %v10765_v4 = vld [vmem:[#allocation13 + $0x2c] ss:$16 sps:$4 sm:$0xff]  }
 0x43d   :  { %v2871_v19 = vmax.f32 %v10083_v7, 0.0  ;;  %v2705_v20 = vpop.f32.mrb[11].mxu0  ;;  %v2869_v21 = vpop.f32.mrb[11].mxu1  ;;  %v10693_v3 = vld [vmem:[#allocation7 + $0x194] ss:$8 sps:$4 sm:$0xff]  }
 0x43e   :  { %v2872_v22 = vmax.f32 %v10084_v15, 0.0  ;;  %v2874_v23 = vmax.f32 %v10086_v17, 0.0  ;;  %v10763_v7 = vld [vmem:[#allocation13 + $0x28] ss:$16 sps:$4 sm:$0xff]   ;;  %v10768_v13 = vld [vmem:[#allocation13 + $0x4c] ss:$16 sps:$4 sm:$0xff]  }
 0x43f   :  { %v2875_v29 = vpack.c.bf16 %v2871_v19, %v2871_v19  ;;  %v10696_v8 = vld [vmem:[#allocation7 + $0x1a4] ss:$8 sps:$4 sm:$0xff]   ;;  %v10699_v17 = vld [vmem:[#allocation7 + $0x1b4] ss:$8 sps:$4 sm:$0xff]   ;;  %v10771_v61 = vld [vmem:[#allocation13 + $0x6c] ss:$16 sps:$4 sm:$0xff]  }
 0x440   :  { %v2876_v25 = vpack.c.bf16 %v2872_v22, %v2872_v22  ;;  %v2878_v30 = vpack.c.bf16 %v2874_v23, %v2874_v23  ;;  %v10766_v15 = vld [vmem:[#allocation13 + $0x48] ss:$16 sps:$4 sm:$0xff]   ;;  %v10697_v40 = vld [vmem:[#allocation7 + $0x1b0] ss:$8 sps:$4 sm:$0xff]   ;;  %v10700_v22 = vld [vmem:[#allocation7 + $0x1c0] ss:$8 sps:$4 sm:$0xff]  }
 0x441   :  { %v10769_v19 = vld [vmem:[#allocation13 + $0x68] ss:$16 sps:$4 sm:$0xff]   ;;  %v10774_v21 = vld [vmem:[#allocation13 + $0x8c] ss:$16 sps:$4 sm:$0xff]  }
 0x442   :  { %3307 = vmatprep.mubr.bf16.mxu0 %v2876_v25  ;;  %v10702_v20 = vld [vmem:[#allocation7 + $0x1c4] ss:$8 sps:$4 sm:$0xff]   ;;  %v10703_v25 = vld [vmem:[#allocation7 + $0x1d0] ss:$8 sps:$4 sm:$0xff]  }
 0x443   :  { %3308 = vmatmul.mubr.bf16.vlgmr.msra.gmra.mrb[12].mxu0 %v2875_v29  ;;  %v10772_v23 = vld [vmem:[#allocation13 + $0x88] ss:$16 sps:$4 sm:$0xff]   ;;  %v1254_v29 = vrot.slane %v12259_v59, %v12208_v28  ;;  %v10786_v59 = vld [vmem:[#allocation13 + $0x10c] ss:$16 sps:$4 sm:$0xff]  }
 0x444   :  { %3317 = vmatpush1.bf16.msra.mxu0 %v10664_v26  ;;  %3348 = vmatprep.mubr.bf16.mxu0 %v2878_v30  ;;  %v10775_v26 = vld [vmem:[#allocation13 + $0xa8] ss:$16 sps:$4 sm:$0xff]   ;;  %v10780_v30 = vld [vmem:[#allocation13 + $0xcc] ss:$16 sps:$4 sm:$0xff]  }
 0x445   :  { %3318 = vmatprep.subr.bf16.mxu0 %v10669_v56  ;;  %v10708_v56 = vld [vmem:[#allocation7 + $0x1e4] ss:$8 sps:$4 sm:$0xff]  }
 0x448   :  { %3319 = vmatpush1.bf16.msra.mxu0 %v10667_v31  ;;  %v10706_v31 = vld [vmem:[#allocation7 + $0x1e0] ss:$8 sps:$4 sm:$0xff]  }
 0x449   :  { %3320 = vmatprep.subr.bf16.mxu0 %v10672_v32  ;;  %v10778_v32 = vld [vmem:[#allocation13 + $0xc8] ss:$16 sps:$4 sm:$0xff]  }
 0x44c   :  { %3321 = vmatpush1.bf16.msra.mxu0 %v10670_v34  ;;  %v10085_v34 = vadd.f32 %v12267_v5, %v1254_v29  ;;  %v10789_v5 = vld [vmem:[#allocation13 + $0x12c] ss:$16 sps:$4 sm:$0xff]   ;;  %v10870_v29 = vld [vmem:[#allocation11 + $0x144] ss:$16 sps:$4 sm:$0xff]  }
 0x44d   :  { %3322 = vmatprep.subr.bf16.mxu0 %v10675_v37  ;;  %v10711_v37 = vld [vmem:[#allocation7 + $0x1f4] ss:$8 sps:$4 sm:$0xff]  }
 0x450   :  { %3323 = vmatpush1.bf16.msra.mxu0 %v10673_v35  ;;  %v10783_v35 = vld [vmem:[#allocation13 + $0xec] ss:$16 sps:$4 sm:$0xff]  }
 0x451   :  { %3324 = vmatprep.subr.bf16.mxu0 %v10678_v36  ;;  %v10709_v36 = vld [vmem:[#allocation7 + $0x1f0] ss:$8 sps:$4 sm:$0xff]  }
 0x454   :  { %3325 = vmatpush1.bf16.msra.mxu0 %v10676_v38  ;;  %v10781_v38 = vld [vmem:[#allocation13 + $0xe8] ss:$16 sps:$4 sm:$0xff]  }
 0x455   :  { %3326 = vmatprep.subr.bf16.mxu0 %v10681_v39  ;;  %v2873_v39 = vmax.f32 %v10085_v34, 0.0  ;;  %v10829_v34 = vld [vmem:[#allocation11 + $0x68] ss:$16 sps:$4 sm:$0xff]  }
 0x458   :  { %3327 = vmatpush1.bf16.msra.mxu0 %v10679_v41  ;;  %v10810_v41 = vld [vmem:[#allocation11 + $0x4] ss:$16 sps:$4 sm:$0xff]  }
 0x459   :  { %3328 = vmatprep.subr.bf16.mxu0 %v10684_v43  ;;  %v10808_v43 = vld [vmem:[#allocation11] ss:$16 sps:$4 sm:$0xff]  }
 0x45a   :  { %v3503_v48 = vpop.f32.mrb[12].mxu1 }
 0x45b   :  { %v3504_v49 = vadd.f32 %v3503_v48, %v3382_v44  ;;  %v3505_v50 = vpop.f32.mrb[13].mxu1  ;;  %v2877_v44 = vpack.c.bf16 %v2873_v39, %v2873_v39  ;;  %v10792_v48 = vld [vmem:[#allocation13 + $0x14c] ss:$16 sps:$4 sm:$0xff]  }
 0x45c   :  { %3329 = vmatpush1.bf16.msra.mxu0 %v10682_v45  ;;  %v3506_v27 = vadd.f32 %v3505_v50, %v3386_v46  ;;  %v3507_v53 = vpop.f32.mrb[14].mxu1  ;;  %v10816_v45 = vld [vmem:[#allocation11 + $0x24] ss:$16 sps:$4 sm:$0xff]   ;;  %v10787_v46 = vld [vmem:[#allocation13 + $0x128] ss:$16 sps:$4 sm:$0xff]  }
 0x45d   :  { %3330 = vmatprep.subr.bf16.mxu0 %v10687_v47  ;;  %v3510_v55 = vmax.f32 %v3504_v49, 0.0  ;;  %v3508_v57 = vpop.f32.mrb[15].mxu1  ;;  %v10814_v47 = vld [vmem:[#allocation11 + $0x20] ss:$16 sps:$4 sm:$0xff]   ;;  %v10822_v49 = vld [vmem:[#allocation11 + $0x44] ss:$16 sps:$4 sm:$0xff]  }
 0x45e   :  { %v3511_v58 = vmax.f32 %v3506_v27, 0.0  ;;  %v10790_v50 = vld [vmem:[#allocation13 + $0x148] ss:$16 sps:$4 sm:$0xff]   ;;  %v10795_v27 = vld [vmem:[#allocation13 + $0x16c] ss:$16 sps:$4 sm:$0xff]  }
 0x45f   :  { %v12271_v60 = vpack.c.bf16 %v3510_v55, %v3510_v55  ;;  %v10828_v53 = vld [vmem:[#allocation11 + $0x64] ss:$16 sps:$4 sm:$0xff]   ;;  %v10826_v55 = vld [vmem:[#allocation11 + $0x60] ss:$16 sps:$4 sm:$0xff]   ;;  %v10798_v57 = vld [vmem:[#allocation13 + $0x18c] ss:$16 sps:$4 sm:$0xff]  }
 0x460   :  { %3331 = vmatpush1.bf16.msra.mxu0 %v10685_v51  ;;  %v3513_v63 = vpack.c.bf16 %v3511_v58, %v3511_v58  ;;  %v10820_v51 = vld [vmem:[#allocation11 + $0x40] ss:$16 sps:$4 sm:$0xff]   ;;  %v10834_v58 = vld [vmem:[#allocation11 + $0x84] ss:$16 sps:$4 sm:$0xff]   ;;  %v10843_v39 = vld [vmem:[#allocation11 + $0xac] ss:$16 sps:$4 sm:$0xff]  }
 0x461   :  { %3332 = vmatprep.subr.bf16.mxu0 %v10690_v54  ;;  %v10793_v54 = vld [vmem:[#allocation13 + $0x168] ss:$16 sps:$4 sm:$0xff]  }
 0x462   :  { %3994 = vmatprep.mubr.bf16.mxu1 %v3513_v63 }
 0x463   :  { %3995 = vmatmul.mubr.bf16.vlgmr.msra.gmra.mrb[16].mxu1 %v12271_v60 }
 0x464   :  { %3333 = vmatpush1.bf16.msra.mxu0 %v10688_v62  ;;  %4004 = vmatpush1.bf16.msra.mxu1 %v10760_v1  ;;  %v10796_v62 = vld [vmem:[#allocation13 + $0x188] ss:$16 sps:$4 sm:$0xff]   ;;  %v10801_v1 = vld [vmem:[#allocation13 + $0x1ac] ss:$16 sps:$4 sm:$0xff]  }
 0x465   :  { %3334 = vmatprep.subr.bf16.mxu0 %v10693_v3  ;;  %4005 = vmatprep.subr.bf16.mxu1 %v10765_v4  ;;  %v10840_v3 = vld [vmem:[#allocation11 + $0xa4] ss:$16 sps:$4 sm:$0xff]   ;;  %v10799_v4 = vld [vmem:[#allocation13 + $0x1a8] ss:$16 sps:$4 sm:$0xff]  }
 0x466   :  { %4035 = vmatprep.mubr.bf16.mxu1 %v3513_v63  ;;  %v10832_v63 = vld [vmem:[#allocation11 + $0x80] ss:$16 sps:$4 sm:$0xff]  }
 0x468   :  { %3335 = vmatpush1.bf16.msra.mxu0 %v10691_v6  ;;  %4006 = vmatpush1.bf16.msra.mxu1 %v10763_v7  ;;  %v10838_v6 = vld [vmem:[#allocation11 + $0xa0] ss:$16 sps:$4 sm:$0xff]   ;;  %v10804_v7 = vld [vmem:[#allocation13 + $0x1cc] ss:$16 sps:$4 sm:$0xff]  }
 0x469   :  { %3336 = vmatprep.subr.bf16.mxu0 %v10696_v8  ;;  %4007 = vmatprep.subr.bf16.mxu1 %v10768_v13  ;;  %v10846_v8 = vld [vmem:[#allocation11 + $0xc4] ss:$16 sps:$4 sm:$0xff]   ;;  %v10802_v13 = vld [vmem:[#allocation13 + $0x1c8] ss:$16 sps:$4 sm:$0xff]  }
 0x46c   :  { %3337 = vmatpush1.bf16.msra.mxu0 %v10694_v14  ;;  %4008 = vmatpush1.bf16.msra.mxu1 %v10766_v15  ;;  %v10844_v14 = vld [vmem:[#allocation11 + $0xc0] ss:$16 sps:$4 sm:$0xff]   ;;  %v10807_v15 = vld [vmem:[#allocation13 + $0x1ec] ss:$16 sps:$4 sm:$0xff]  }
 0x46d   :  { %3338 = vmatprep.subr.bf16.mxu0 %v10699_v17  ;;  %4009 = vmatprep.subr.bf16.mxu1 %v10771_v61  ;;  %v10852_v17 = vld [vmem:[#allocation11 + $0xe4] ss:$16 sps:$4 sm:$0xff]   ;;  %v10805_v61 = vld [vmem:[#allocation13 + $0x1e8] ss:$16 sps:$4 sm:$0xff]  }
 0x470   :  { %3339 = vmatpush1.bf16.msra.mxu0 %v10697_v40  ;;  %4010 = vmatpush1.bf16.msra.mxu1 %v10769_v19  ;;  %v10850_v40 = vld [vmem:[#allocation11 + $0xe0] ss:$16 sps:$4 sm:$0xff]   ;;  %v10813_v19 = vld [vmem:[#allocation11 + $0xc] ss:$16 sps:$4 sm:$0xff]  }
 0x471   :  { %3340 = vmatprep.subr.bf16.mxu0 %v10702_v20  ;;  %4011 = vmatprep.subr.bf16.mxu1 %v10774_v21  ;;  %v10858_v20 = vld [vmem:[#allocation11 + $0x104] ss:$16 sps:$4 sm:$0xff]   ;;  %v10811_v21 = vld [vmem:[#allocation11 + $0x8] ss:$16 sps:$4 sm:$0xff]  }
 0x474   :  { %3341 = vmatpush1.bf16.msra.mxu0 %v10700_v22  ;;  %4012 = vmatpush1.bf16.msra.mxu1 %v10772_v23  ;;  %v10856_v22 = vld [vmem:[#allocation11 + $0x100] ss:$16 sps:$4 sm:$0xff]   ;;  %v10819_v23 = vld [vmem:[#allocation11 + $0x2c] ss:$16 sps:$4 sm:$0xff]  }
 0x475   :  { %3342 = vmatprep.subr.bf16.mxu0 %v10705_v24  ;;  %4013 = vmatprep.subr.bf16.mxu1 %v10777_v2  ;;  %v10864_v24 = vld [vmem:[#allocation11 + $0x124] ss:$16 sps:$4 sm:$0xff]   ;;  %v10817_v2 = vld [vmem:[#allocation11 + $0x28] ss:$16 sps:$4 sm:$0xff]  }
 0x478   :  { %3343 = vmatpush1.bf16.msra.mxu0 %v10703_v25  ;;  %4014 = vmatpush1.bf16.msra.mxu1 %v10775_v26  ;;  %v10862_v25 = vld [vmem:[#allocation11 + $0x120] ss:$16 sps:$4 sm:$0xff]   ;;  %v10825_v26 = vld [vmem:[#allocation11 + $0x4c] ss:$16 sps:$4 sm:$0xff]  }
 0x479   :  { %3344 = vmatprep.subr.bf16.mxu0 %v10708_v56  ;;  %4015 = vmatprep.subr.bf16.mxu1 %v10780_v30  ;;  %v10823_v56 = vld [vmem:[#allocation11 + $0x48] ss:$16 sps:$4 sm:$0xff]   ;;  %v10868_v30 = vld [vmem:[#allocation11 + $0x140] ss:$16 sps:$4 sm:$0xff]  }
 0x47c   :  { %3345 = vmatpush1.bf16.msra.mxu0 %v10706_v31  ;;  %4016 = vmatpush1.bf16.msra.mxu1 %v10778_v32  ;;  %v10831_v31 = vld [vmem:[#allocation11 + $0x6c] ss:$16 sps:$4 sm:$0xff]   ;;  %v10876_v32 = vld [vmem:[#allocation11 + $0x164] ss:$16 sps:$4 sm:$0xff]  }
 0x47d   :  { %3346 = vmatprep.subr.bf16.mxu0 %v10711_v37  ;;  %4017 = vmatprep.subr.bf16.mxu1 %v10783_v35  ;;  %v10837_v37 = vld [vmem:[#allocation11 + $0x8c] ss:$16 sps:$4 sm:$0xff]   ;;  %v10882_v35 = vld [vmem:[#allocation11 + $0x184] ss:$16 sps:$4 sm:$0xff]  }
 0x480   :  { %3347 = vmatpush1.bf16.msra.mxu0 %v10709_v36  ;;  %4018 = vmatpush1.bf16.msra.mxu1 %v10781_v38  ;;  %v10835_v36 = vld [vmem:[#allocation11 + $0x88] ss:$16 sps:$4 sm:$0xff]   ;;  %v10880_v38 = vld [vmem:[#allocation11 + $0x180] ss:$16 sps:$4 sm:$0xff]  }
 0x481   :  { %4019 = vmatprep.subr.bf16.mxu1 %v10786_v59  ;;  %4364 = vmatprep.subr.bf16.mxu0 %v10810_v41  ;;  %v10888_v59 = vld [vmem:[#allocation11 + $0x1a4] ss:$16 sps:$4 sm:$0xff]   ;;  %v10841_v41 = vld [vmem:[#allocation11 + $0xa8] ss:$16 sps:$4 sm:$0xff]  }
 0x483   :  { %3349 = vmatmul.mubr.bf16.vlgmr.msra.gmra.mrb[12].mxu0 %v2877_v44  ;;  %v10847_v44 = vld [vmem:[#allocation11 + $0xc8] ss:$16 sps:$4 sm:$0xff]  }
 0x484   :  { %4020 = vmatpush1.bf16.msra.mxu1 %v10784_v42  ;;  %4365 = vmatpush1.bf16.msra.mxu0 %v10808_v43  ;;  %v10886_v42 = vld [vmem:[#allocation11 + $0x1a0] ss:$16 sps:$4 sm:$0xff]   ;;  %v10849_v43 = vld [vmem:[#allocation11 + $0xcc] ss:$16 sps:$4 sm:$0xff]  }
 0x485   :  { %4021 = vmatprep.subr.bf16.mxu1 %v10789_v5  ;;  %4366 = vmatprep.subr.bf16.mxu0 %v10816_v45  ;;  %v10855_v5 = vld [vmem:[#allocation11 + $0xec] ss:$16 sps:$4 sm:$0xff]   ;;  %v10853_v45 = vld [vmem:[#allocation11 + $0xe8] ss:$16 sps:$4 sm:$0xff]  }
 0x488   :  { %4022 = vmatpush1.bf16.msra.mxu1 %v10787_v46  ;;  %4367 = vmatpush1.bf16.msra.mxu0 %v10814_v47  ;;  %v10861_v46 = vld [vmem:[#allocation11 + $0x10c] ss:$16 sps:$4 sm:$0xff]   ;;  %v10859_v47 = vld [vmem:[#allocation11 + $0x108] ss:$16 sps:$4 sm:$0xff]  }
 0x489   :  { %4023 = vmatprep.subr.bf16.mxu1 %v10792_v48  ;;  %4368 = vmatprep.subr.bf16.mxu0 %v10822_v49  ;;  %v10867_v48 = vld [vmem:[#allocation11 + $0x12c] ss:$16 sps:$4 sm:$0xff]   ;;  %v10865_v49 = vld [vmem:[#allocation11 + $0x128] ss:$16 sps:$4 sm:$0xff]  }
 0x48c   :  { %4024 = vmatpush1.bf16.msra.mxu1 %v10790_v50  ;;  %4369 = vmatpush1.bf16.msra.mxu0 %v10820_v51  ;;  %v10873_v50 = vld [vmem:[#allocation11 + $0x14c] ss:$16 sps:$4 sm:$0xff]   ;;  %v10871_v51 = vld [vmem:[#allocation11 + $0x148] ss:$16 sps:$4 sm:$0xff]  }
 0x48d   :  { %4025 = vmatprep.subr.bf16.mxu1 %v10795_v27  ;;  %4370 = vmatprep.subr.bf16.mxu0 %v10828_v53  ;;  %v10879_v27 = vld [vmem:[#allocation11 + $0x16c] ss:$16 sps:$4 sm:$0xff]   ;;  %v10877_v53 = vld [vmem:[#allocation11 + $0x168] ss:$16 sps:$4 sm:$0xff]  }
 0x490   :  { %4026 = vmatpush1.bf16.msra.mxu1 %v10793_v54  ;;  %4371 = vmatpush1.bf16.msra.mxu0 %v10826_v55  ;;  %v10885_v54 = vld [vmem:[#allocation11 + $0x18c] ss:$16 sps:$4 sm:$0xff]   ;;  %v10883_v55 = vld [vmem:[#allocation11 + $0x188] ss:$16 sps:$4 sm:$0xff]  }
 0x491   :  { %4027 = vmatprep.subr.bf16.mxu1 %v10798_v57  ;;  %4372 = vmatprep.subr.bf16.mxu0 %v10834_v58  ;;  %v10891_v57 = vld [vmem:[#allocation11 + $0x1ac] ss:$16 sps:$4 sm:$0xff]   ;;  %v10889_v58 = vld [vmem:[#allocation11 + $0x1a8] ss:$16 sps:$4 sm:$0xff]  }
 0x494   :  { %4028 = vmatpush1.bf16.msra.mxu1 %v10796_v62  ;;  %4373 = vmatpush1.bf16.msra.mxu0 %v10832_v63  ;;  %v10894_v62 = vld [vmem:[#allocation11 + $0x1c4] ss:$16 sps:$4 sm:$0xff]   ;;  %v10897_v63 = vld [vmem:[#allocation11 + $0x1cc] ss:$16 sps:$4 sm:$0xff]  }
 0x495   :  { %4029 = vmatprep.subr.bf16.mxu1 %v10801_v1  ;;  %4374 = vmatprep.subr.bf16.mxu0 %v10840_v3  ;;  %v10892_v1 = vld [vmem:[#allocation11 + $0x1c0] ss:$16 sps:$4 sm:$0xff]   ;;  %v10895_v3 = vld [vmem:[#allocation11 + $0x1c8] ss:$16 sps:$4 sm:$0xff]  }
 0x498   :  { %4030 = vmatpush1.bf16.msra.mxu1 %v10799_v4  ;;  %4375 = vmatpush1.bf16.msra.mxu0 %v10838_v6  ;;  %v10900_v4 = vld [vmem:[#allocation11 + $0x1e4] ss:$16 sps:$4 sm:$0xff]   ;;  %v10903_v6 = vld [vmem:[#allocation11 + $0x1ec] ss:$16 sps:$4 sm:$0xff]  }
 0x499   :  { %4031 = vmatprep.subr.bf16.mxu1 %v10804_v7  ;;  %4376 = vmatprep.subr.bf16.mxu0 %v10846_v8  ;;  %v10898_v7 = vld [vmem:[#allocation11 + $0x1e0] ss:$16 sps:$4 sm:$0xff]   ;;  %v10901_v8 = vld [vmem:[#allocation11 + $0x1e8] ss:$16 sps:$4 sm:$0xff]  }
 0x49c   :  { %4032 = vmatpush1.bf16.msra.mxu1 %v10802_v13  ;;  %4377 = vmatpush1.bf16.msra.mxu0 %v10844_v14  ;;  %v10906_v13 = vld [vmem:[#allocation16 + $0x4] ss:$8 sps:$4 sm:$0xff]  }
 0x49d   :  { %4033 = vmatprep.subr.bf16.mxu1 %v10807_v15  ;;  %4378 = vmatprep.subr.bf16.mxu0 %v10852_v17 }
 0x4a0   :  { %4034 = vmatpush1.bf16.msra.mxu1 %v10805_v61  ;;  %4379 = vmatpush1.bf16.msra.mxu0 %v10850_v40  ;;  %v2943_v40 = vld [vmem:[#allocation8] sm:$0x3] }
 0x4a1   :  { %4405 = vmatprep.subr.bf16.mxu1 %v10813_v19  ;;  %4380 = vmatprep.subr.bf16.mxu0 %v10858_v20  ;;  %v2948_v19 = vrot.slane %v2943_v40, %v12184_v10  ;;  %v2952_v20 = vrot.slane %v2943_v40, %v12190_v12  ;;  %v11003_v40 = vld [vmem:[#allocation19 + $0x10] ss:$8 sps:$4 sm:$0xff]  }
 0x4a3   :  { %4036 = vmatmul.mubr.bf16.vlgmr.msra.gmra.mrb[20].mxu1 %v12271_v60  ;;  %v10874_v60 = vld [vmem:[#allocation11 + $0x160] ss:$16 sps:$4 sm:$0xff]  }
 0x4a4   :  { %4406 = vmatpush1.bf16.msra.mxu1 %v10811_v21  ;;  %4381 = vmatpush1.bf16.msra.mxu0 %v10856_v22 }
 0x4a5   :  { %4407 = vmatprep.subr.bf16.mxu1 %v10819_v23  ;;  %4382 = vmatprep.subr.bf16.mxu0 %v10864_v24 }
 0x4a8   :  { %4408 = vmatpush1.bf16.msra.mxu1 %v10817_v2  ;;  %4383 = vmatpush1.bf16.msra.mxu0 %v10862_v25 }
 0x4a9   :  { %4409 = vmatprep.subr.bf16.mxu1 %v10825_v26  ;;  %4384 = vmatprep.subr.bf16.mxu0 %v10870_v29 }
 0x4ac   :  { %4410 = vmatpush1.bf16.msra.mxu1 %v10823_v56  ;;  %4385 = vmatpush1.bf16.msra.mxu0 %v10868_v30  ;;  %v10904_v30 = vld [vmem:[#allocation16] ss:$8 sps:$4 sm:$0xff]  }
 0x4ad   :  { %4411 = vmatprep.subr.bf16.mxu1 %v10831_v31  ;;  %4386 = vmatprep.subr.bf16.mxu0 %v10876_v32  ;;  %v10909_v32 = vld [vmem:[#allocation16 + $0x14] ss:$8 sps:$4 sm:$0xff]  }
 0x4b0   :  { %4412 = vmatpush1.bf16.msra.mxu1 %v10829_v34  ;;  %4387 = vmatpush1.bf16.msra.mxu0 %v10874_v60  ;;  %v10907_v34 = vld [vmem:[#allocation16 + $0x10] ss:$8 sps:$4 sm:$0xff]   ;;  %v10912_v60 = vld [vmem:[#allocation16 + $0x24] ss:$8 sps:$4 sm:$0xff]  }
 0x4b1   :  { %4413 = vmatprep.subr.bf16.mxu1 %v10837_v37  ;;  %4388 = vmatprep.subr.bf16.mxu0 %v10882_v35  ;;  %v10910_v37 = vld [vmem:[#allocation16 + $0x20] ss:$8 sps:$4 sm:$0xff]   ;;  %v10915_v35 = vld [vmem:[#allocation16 + $0x34] ss:$8 sps:$4 sm:$0xff]  }
 0x4b4   :  { %4414 = vmatpush1.bf16.msra.mxu1 %v10835_v36  ;;  %4389 = vmatpush1.bf16.msra.mxu0 %v10880_v38  ;;  %v10913_v36 = vld [vmem:[#allocation16 + $0x30] ss:$8 sps:$4 sm:$0xff]   ;;  %v10918_v38 = vld [vmem:[#allocation16 + $0x44] ss:$8 sps:$4 sm:$0xff]  }
 0x4b5   :  { %4415 = vmatprep.subr.bf16.mxu1 %v10843_v39  ;;  %4390 = vmatprep.subr.bf16.mxu0 %v10888_v59  ;;  %v10916_v39 = vld [vmem:[#allocation16 + $0x40] ss:$8 sps:$4 sm:$0xff]   ;;  %v10921_v59 = vld [vmem:[#allocation16 + $0x54] ss:$8 sps:$4 sm:$0xff]  }
 0x4b8   :  { %4416 = vmatpush1.bf16.msra.mxu1 %v10841_v41  ;;  %4391 = vmatpush1.bf16.msra.mxu0 %v10886_v42  ;;  %v10919_v41 = vld [vmem:[#allocation16 + $0x50] ss:$8 sps:$4 sm:$0xff]   ;;  %v10924_v42 = vld [vmem:[#allocation16 + $0x64] ss:$8 sps:$4 sm:$0xff]  }
 0x4b9   :  { %4417 = vmatprep.subr.bf16.mxu1 %v10849_v43  ;;  %4392 = vmatprep.subr.bf16.mxu0 %v10894_v62  ;;  %v10922_v43 = vld [vmem:[#allocation16 + $0x60] ss:$8 sps:$4 sm:$0xff]  }
 0x4ba   :  { %v10940_v62 = vld [vmem:[#allocation16 + $0xc0] ss:$8 sps:$4 sm:$0xff]  }
 0x4bc   :  { %4418 = vmatpush1.bf16.msra.mxu1 %v10847_v44  ;;  %4393 = vmatpush1.bf16.msra.mxu0 %v10892_v1  ;;  %v10927_v44 = vld [vmem:[#allocation16 + $0x74] ss:$8 sps:$4 sm:$0xff]   ;;  %v10943_v1 = vld [vmem:[#allocation16 + $0xd0] ss:$8 sps:$4 sm:$0xff]  }
 0x4bd   :  { %4419 = vmatprep.subr.bf16.mxu1 %v10855_v5  ;;  %4394 = vmatprep.subr.bf16.mxu0 %v10900_v4  ;;  %v10946_v4 = vld [vmem:[#allocation16 + $0xe0] ss:$8 sps:$4 sm:$0xff]  }
 0x4c0   :  { %4420 = vmatpush1.bf16.msra.mxu1 %v10853_v45  ;;  %4395 = vmatpush1.bf16.msra.mxu0 %v10898_v7  ;;  %v10949_v7 = vld [vmem:[#allocation16 + $0xf0] ss:$8 sps:$4 sm:$0xff]  }
 0x4c1   :  { %4421 = vmatprep.subr.bf16.mxu1 %v10861_v46  ;;  %4876 = vmatprep.subr.bf16.mxu0 %v10906_v13  ;;  %v11000_v13 = vld [vmem:[#allocation19] ss:$8 sps:$4 sm:$0xff]  }
 0x4c4   :  { %4422 = vmatpush1.bf16.msra.mxu1 %v10859_v47  ;;  %v10925_v47 = vld [vmem:[#allocation16 + $0x70] ss:$8 sps:$4 sm:$0xff]  }
 0x4c5   :  { %4423 = vmatprep.subr.bf16.mxu1 %v10867_v48 }
 0x4c8   :  { %4424 = vmatpush1.bf16.msra.mxu1 %v10865_v49  ;;  %v10930_v49 = vld [vmem:[#allocation16 + $0x84] ss:$8 sps:$4 sm:$0xff]  }
 0x4c9   :  { %4425 = vmatprep.subr.bf16.mxu1 %v10873_v50  ;;  %v10928_v50 = vld [vmem:[#allocation16 + $0x80] ss:$8 sps:$4 sm:$0xff]  }
 0x4cc   :  { %4426 = vmatpush1.bf16.msra.mxu1 %v10871_v51  ;;  %v10933_v51 = vld [vmem:[#allocation16 + $0x94] ss:$8 sps:$4 sm:$0xff]  }
 0x4cd   :  { %4427 = vmatprep.subr.bf16.mxu1 %v10879_v27  ;;  %v10931_v27 = vld [vmem:[#allocation16 + $0x90] ss:$8 sps:$4 sm:$0xff]  }
 0x4d0   :  { %4428 = vmatpush1.bf16.msra.mxu1 %v10877_v53  ;;  %v10936_v53 = vld [vmem:[#allocation16 + $0xa4] ss:$8 sps:$4 sm:$0xff]  }
 0x4d1   :  { %4429 = vmatprep.subr.bf16.mxu1 %v10885_v54  ;;  %v10934_v54 = vld [vmem:[#allocation16 + $0xa0] ss:$8 sps:$4 sm:$0xff]  }
 0x4d4   :  { %4430 = vmatpush1.bf16.msra.mxu1 %v10883_v55  ;;  %v10939_v55 = vld [vmem:[#allocation16 + $0xb4] ss:$8 sps:$4 sm:$0xff]  }
 0x4d5   :  { %4431 = vmatprep.subr.bf16.mxu1 %v10891_v57  ;;  %v10937_v57 = vld [vmem:[#allocation16 + $0xb0] ss:$8 sps:$4 sm:$0xff]  }
 0x4d8   :  { %4432 = vmatpush1.bf16.msra.mxu1 %v10889_v58  ;;  %v10942_v58 = vld [vmem:[#allocation16 + $0xc4] ss:$8 sps:$4 sm:$0xff]  }
 0x4d9   :  { %4433 = vmatprep.subr.bf16.mxu1 %v10897_v63  ;;  %v10945_v63 = vld [vmem:[#allocation16 + $0xd4] ss:$8 sps:$4 sm:$0xff]  }
 0x4dc   :  { %4434 = vmatpush1.bf16.msra.mxu1 %v10895_v3  ;;  %v10948_v3 = vld [vmem:[#allocation16 + $0xe4] ss:$8 sps:$4 sm:$0xff]  }
 0x4dd   :  { %4435 = vmatprep.subr.bf16.mxu1 %v10903_v6  ;;  %v10951_v6 = vld [vmem:[#allocation16 + $0xf4] ss:$8 sps:$4 sm:$0xff]  }
 0x4e0   :  { %4436 = vmatpush1.bf16.msra.mxu1 %v10901_v8  ;;  %v10954_v8 = vld [vmem:[#allocation16 + $0x104] ss:$8 sps:$4 sm:$0xff]  }
 0x536   :  { %v12278_v14 = vpop.f32.mrb[16].mxu1 }
 0x537   :  { %v12280_v15 = vpop.f32.mrb[17].mxu1 }
 0x538   :  { %v4000_v17 = vpop.f32.mrb[18].mxu1 }
 0x539   :  { %v4001_v61 = vpop.f32.mrb[19].mxu1  ;;  %v11002_v17 = vld [vmem:[#allocation19 + $0x4] ss:$8 sps:$4 sm:$0xff]  }
 0x53a   :  { %v11005_v61 = vld [vmem:[#allocation19 + $0x14] ss:$8 sps:$4 sm:$0xff]   ;;  %5075 = vmatprep.subr.bf16.mxu1 %v11002_v17 }
 0x53b   :  { %v10988_v17 = vld [vmem:[#allocation16 + $0x1c0] ss:$8 sps:$4 sm:$0xff]  }
 0x556   :  { %v3350_v21 = vpop.f32.mrb[12].mxu0 }
 0x557   :  { %v10087_v22 = vadd.f32 %v3350_v21, %v2948_v19  ;;  %v3352_v23 = vpop.f32.mrb[13].mxu0  ;;  %v4446_v19 = vld [vmem:[#allocation14] sm:$0xf] }
 0x558   :  { %v10088_v24 = vadd.f32 %v3352_v23, %v2952_v20  ;;  %v3354_v2 = vpop.f32.mrb[14].mxu0  ;;  %v4451_v20 = vrot.slane %v4446_v19, %v12184_v10  ;;  %v4459_v21 = vrot.slane %v4446_v19, %v12208_v28 }
 0x559   :  { %v3357_v25 = vmax.f32 %v10087_v22, 0.0  ;;  %v3355_v26 = vpop.f32.mrb[15].mxu0  ;;  %v4463_v2 = vrot.slane %v4446_v19, %v12197_v16 }
 0x55a   :  { %v3358_v29 = vmax.f32 %v10088_v24, 0.0  ;;  %v4455_v24 = vrot.slane %v4446_v19, %v12190_v12  ;;  %v10996_v19 = vld [vmem:[#allocation16 + $0x1e4] ss:$8 sps:$4 sm:$0xff]  }
 0x55b   :  { %v3359_v31 = vpack.c.bf16 %v3357_v25, %v3357_v25 }
 0x55c   :  { %v3360_v56 = vpack.c.bf16 %v3358_v29, %v3358_v29 }
 0x55e   :  { %4396 = vmatprep.mubr.bf16.mxu0 %v3360_v56  ;;  %4437 = vmatprep.mubr.bf16.mxu1 %v3360_v56 }
 0x55f   :  { %4397 = vmatmul.mubr.bf16.vlgmr.msra.gmra.mrb[16].mxu0 %v3359_v31  ;;  %4438 = vmatmul.mubr.bf16.vlgmr.msra.gmra.mrb[24].mxu1 %v3359_v31 }
 0x560   :  { %4877 = vmatpush1.bf16.msra.mxu0 %v10904_v30  ;;  %5107 = vmatprep.mubr.bf16.mxu1 %v11897_v0 }
 0x561   :  { %4878 = vmatprep.subr.bf16.mxu0 %v10909_v32  ;;  %5076 = vmatpush1.bf16.msra.mxu1 %v11000_v13  ;;  %v10990_v13 = vld [vmem:[#allocation16 + $0x1c4] ss:$8 sps:$4 sm:$0xff]  }
 0x562   :  { %5077 = vmatprep.subr.bf16.mxu1 %v11005_v61  ;;  %v10993_v61 = vld [vmem:[#allocation16 + $0x1d4] ss:$8 sps:$4 sm:$0xff]  }
 0x564   :  { %4879 = vmatpush1.bf16.msra.mxu0 %v10907_v34 }
 0x565   :  { %4880 = vmatprep.subr.bf16.mxu0 %v10912_v60  ;;  %5078 = vmatpush1.bf16.msra.mxu1 %v11003_v40  ;;  %v10991_v40 = vld [vmem:[#allocation16 + $0x1d0] ss:$8 sps:$4 sm:$0xff]  }
 0x568   :  { %4881 = vmatpush1.bf16.msra.mxu0 %v10910_v37 }
 0x569   :  { %4882 = vmatprep.subr.bf16.mxu0 %v10915_v35 }
 0x56c   :  { %4883 = vmatpush1.bf16.msra.mxu0 %v10913_v36 }
 0x56d   :  { %4884 = vmatprep.subr.bf16.mxu0 %v10918_v38 }
 0x570   :  { %4885 = vmatpush1.bf16.msra.mxu0 %v10916_v39 }
 0x571   :  { %4886 = vmatprep.subr.bf16.mxu0 %v10921_v59 }
 0x574   :  { %4887 = vmatpush1.bf16.msra.mxu0 %v10919_v41 }
 0x575   :  { %4888 = vmatprep.subr.bf16.mxu0 %v10924_v42 }
 0x576   :  { %v4037_v5 = vpop.f32.mrb[20].mxu1 }
 0x577   :  { %v4039_v45 = vpop.f32.mrb[21].mxu1 }
 0x578   :  { %v4041_v46 = vpop.f32.mrb[22].mxu1  ;;  %4889 = vmatpush1.bf16.msra.mxu0 %v10922_v43 }
 0x579   :  { %v4042_v48 = vpop.f32.mrb[23].mxu1  ;;  %4890 = vmatprep.subr.bf16.mxu0 %v10927_v44 }
 0x57a   :  { %v10963_v48 = vld [vmem:[#allocation16 + $0x134] ss:$8 sps:$4 sm:$0xff]  }
 0x57c   :  { %4891 = vmatpush1.bf16.msra.mxu0 %v10925_v47  ;;  %v10958_v47 = vld [vmem:[#allocation16 + $0x120] ss:$8 sps:$4 sm:$0xff]  }
 0x57d   :  { %4892 = vmatprep.subr.bf16.mxu0 %v10930_v49  ;;  %v10961_v49 = vld [vmem:[#allocation16 + $0x130] ss:$8 sps:$4 sm:$0xff]  }
 0x580   :  { %4893 = vmatpush1.bf16.msra.mxu0 %v10928_v50  ;;  %v10966_v50 = vld [vmem:[#allocation16 + $0x144] ss:$8 sps:$4 sm:$0xff]  }
 0x581   :  { %4894 = vmatprep.subr.bf16.mxu0 %v10933_v51  ;;  %v10964_v51 = vld [vmem:[#allocation16 + $0x140] ss:$8 sps:$4 sm:$0xff]  }
 0x584   :  { %4895 = vmatpush1.bf16.msra.mxu0 %v10931_v27  ;;  %v10969_v27 = vld [vmem:[#allocation16 + $0x154] ss:$8 sps:$4 sm:$0xff]  }
 0x585   :  { %4896 = vmatprep.subr.bf16.mxu0 %v10936_v53  ;;  %v10967_v53 = vld [vmem:[#allocation16 + $0x150] ss:$8 sps:$4 sm:$0xff]  }
 0x588   :  { %4897 = vmatpush1.bf16.msra.mxu0 %v10934_v54  ;;  %v10972_v54 = vld [vmem:[#allocation16 + $0x164] ss:$8 sps:$4 sm:$0xff]  }
 0x589   :  { %4898 = vmatprep.subr.bf16.mxu0 %v10939_v55  ;;  %v10970_v55 = vld [vmem:[#allocation16 + $0x160] ss:$8 sps:$4 sm:$0xff]  }
 0x58c   :  { %4899 = vmatpush1.bf16.msra.mxu0 %v10937_v57  ;;  %v10975_v57 = vld [vmem:[#allocation16 + $0x174] ss:$8 sps:$4 sm:$0xff]  }
 0x58d   :  { %4900 = vmatprep.subr.bf16.mxu0 %v10942_v58  ;;  %v10973_v58 = vld [vmem:[#allocation16 + $0x170] ss:$8 sps:$4 sm:$0xff]  }
 0x590   :  { %4901 = vmatpush1.bf16.msra.mxu0 %v10940_v62  ;;  %v10978_v62 = vld [vmem:[#allocation16 + $0x184] ss:$8 sps:$4 sm:$0xff]  }
 0x591   :  { %4902 = vmatprep.subr.bf16.mxu0 %v10945_v63  ;;  %v10976_v63 = vld [vmem:[#allocation16 + $0x180] ss:$8 sps:$4 sm:$0xff]  }
 0x594   :  { %4903 = vmatpush1.bf16.msra.mxu0 %v10943_v1  ;;  %v10981_v1 = vld [vmem:[#allocation16 + $0x194] ss:$8 sps:$4 sm:$0xff]  }
 0x595   :  { %4904 = vmatprep.subr.bf16.mxu0 %v10948_v3  ;;  %v10979_v3 = vld [vmem:[#allocation16 + $0x190] ss:$8 sps:$4 sm:$0xff]  }
 0x598   :  { %4905 = vmatpush1.bf16.msra.mxu0 %v10946_v4  ;;  %v10984_v4 = vld [vmem:[#allocation16 + $0x1a4] ss:$8 sps:$4 sm:$0xff]  }
 0x599   :  { %4906 = vmatprep.subr.bf16.mxu0 %v10951_v6  ;;  %v10982_v6 = vld [vmem:[#allocation16 + $0x1a0] ss:$8 sps:$4 sm:$0xff]  }
 0x59c   :  { %4907 = vmatpush1.bf16.msra.mxu0 %v10949_v7  ;;  %v10987_v7 = vld [vmem:[#allocation16 + $0x1b4] ss:$8 sps:$4 sm:$0xff]  }
 0x59d   :  { %4917 = vmatprep.subr.bf16.mxu0 %v10954_v8  ;;  %v10985_v8 = vld [vmem:[#allocation16 + $0x1b0] ss:$8 sps:$4 sm:$0xff]  }
 0x632   :  { %v4398_v22 = vpop.f32.mrb[16].mxu0  ;;  %v4439_v23 = vpop.f32.mrb[24].mxu1 }
 0x633   :  { %v4399_v25 = vadd.f32 %v4398_v22, %v12278_v14  ;;  %v4440_v26 = vadd.f32 %v4439_v23, %v4037_v5  ;;  %v4400_v29 = vpop.f32.mrb[17].mxu0  ;;  %v4441_v56 = vpop.f32.mrb[25].mxu1  ;;  %v10952_v14 = vld [vmem:[#allocation16 + $0x100] ss:$8 sps:$4 sm:$0xff]   ;;  %v10957_v5 = vld [vmem:[#allocation16 + $0x114] ss:$8 sps:$4 sm:$0xff]  }
 0x634   :  { %v4401_v30 = vadd.f32 %v4400_v29, %v12280_v15  ;;  %v4442_v31 = vadd.f32 %v4441_v56, %v4039_v45  ;;  %v4402_v32 = vpop.f32.mrb[18].mxu0  ;;  %v4443_v34 = vpop.f32.mrb[26].mxu1  ;;  %v10955_v15 = vld [vmem:[#allocation16 + $0x110] ss:$8 sps:$4 sm:$0xff]   ;;  %v10960_v45 = vld [vmem:[#allocation16 + $0x124] ss:$8 sps:$4 sm:$0xff]  }
 0x635   :  { %v4468_v60 = vadd.f32 %v4451_v20, %v4399_v25  ;;  %v12291_v37 = vadd.f32 %v4459_v21, %v4440_v26  ;;  %v4403_v35 = vpop.f32.mrb[19].mxu0  ;;  %v4444_v36 = vpop.f32.mrb[27].mxu1  ;;  %v10994_v20 = vld [vmem:[#allocation16 + $0x1e0] ss:$8 sps:$4 sm:$0xff]   ;;  %v10999_v21 = vld [vmem:[#allocation16 + $0x1f4] ss:$8 sps:$4 sm:$0xff]  }
 0x636   :  { %v4469_v38 = vadd.f32 %v4455_v24, %v4401_v30  ;;  %v4471_v39 = vadd.f32 %v4463_v2, %v4442_v31  ;;  %v10997_v22 = vld [vmem:[#allocation16 + $0x1f0] ss:$8 sps:$4 sm:$0xff]   ;;  %v11006_v25 = vld [vmem:[#allocation19 + $0x20] ss:$8 sps:$4 sm:$0xff]  }
 0x637   :  { %v4472_v59 = vmax.f32 %v4468_v60, 0.0  ;;  %v4474_v23 = vmax.f32 %v12291_v37, 0.0  ;;  %v11008_v2 = vld [vmem:[#allocation19 + $0x24] ss:$8 sps:$4 sm:$0xff]   ;;  %v11011_v26 = vld [vmem:[#allocation19 + $0x34] ss:$8 sps:$4 sm:$0xff]  }
 0x638   :  { %v4473_v41 = vmax.f32 %v4469_v38, 0.0  ;;  %v4475_v42 = vmax.f32 %v4471_v39, 0.0  ;;  %5079 = vmatprep.subr.bf16.mxu1 %v11008_v2  ;;  %v11009_v29 = vld [vmem:[#allocation19 + $0x30] ss:$8 sps:$4 sm:$0xff]   ;;  %v11014_v56 = vld [vmem:[#allocation19 + $0x44] ss:$8 sps:$4 sm:$0xff]  }
 0x639   :  { %v4476_v44 = vpack.c.bf16 %v4472_v59, %v4472_v59  ;;  %v4478_v24 = vpack.c.bf16 %v4474_v23, %v4474_v23  ;;  %5080 = vmatpush1.bf16.msra.mxu1 %v11006_v25  ;;  %v11012_v30 = vld [vmem:[#allocation19 + $0x40] ss:$8 sps:$4 sm:$0xff]   ;;  %v11017_v31 = vld [vmem:[#allocation19 + $0x54] ss:$8 sps:$4 sm:$0xff]   ;;  %v11015_v32 = vld [vmem:[#allocation19 + $0x50] ss:$8 sps:$4 sm:$0xff]  }
 0x63a   :  { %v4477_v43 = vpack.c.bf16 %v4473_v41, %v4473_v41  ;;  %v4479_v46 = vpack.c.bf16 %v4475_v42, %v4475_v42  ;;  %5081 = vmatprep.subr.bf16.mxu1 %v11011_v26  ;;  %v11020_v34 = vld [vmem:[#allocation19 + $0x64] ss:$8 sps:$4 sm:$0xff]   ;;  %v11018_v60 = vld [vmem:[#allocation19 + $0x60] ss:$8 sps:$4 sm:$0xff]   ;;  %v11023_v37 = vld [vmem:[#allocation19 + $0x74] ss:$8 sps:$4 sm:$0xff]  }
 0x63b   :  { %v11021_v35 = vld [vmem:[#allocation19 + $0x70] ss:$8 sps:$4 sm:$0xff]   ;;  %v11051_v38 = vld [vmem:[#allocation26 + $0x8] ss:$16 sps:$4 sm:$0xff]  }
 0x63c   :  { %4908 = vmatprep.mubr.bf16.mxu0 %v4477_v43  ;;  %v11026_v36 = vld [vmem:[#allocation22 + $0x4] ss:$8 sps:$4 sm:$0xff]   ;;  %v11041_v23 = vld [vmem:[#allocation22 + $0x54] ss:$8 sps:$4 sm:$0xff]   ;;  %v11045_v26 = vld [vmem:[#allocation22 + $0x70] ss:$8 sps:$4 sm:$0xff]  }
 0x63d   :  { %4909 = vmatmul.mubr.bf16.vlgmr.msra.gmra.mrb[20].mxu0 %v4476_v44  ;;  %5082 = vmatpush1.bf16.msra.mxu1 %v11009_v29  ;;  %v11053_v39 = vld [vmem:[#allocation26 + $0xc] ss:$16 sps:$4 sm:$0xff]   ;;  %v11057_v41 = vld [vmem:[#allocation26 + $0x28] ss:$16 sps:$4 sm:$0xff]   ;;  %v11050_v29 = vld [vmem:[#allocation26 + $0x4] ss:$16 sps:$4 sm:$0xff]  }
 0x63e   :  { %4918 = vmatpush1.bf16.msra.mxu0 %v10952_v14  ;;  %4949 = vmatprep.mubr.bf16.mxu0 %v4479_v46  ;;  %v11059_v59 = vld [vmem:[#allocation26 + $0x2c] ss:$16 sps:$4 sm:$0xff]   ;;  %v11063_v43 = vld [vmem:[#allocation26 + $0x48] ss:$16 sps:$4 sm:$0xff]  }
 0x63f   :  { %4919 = vmatprep.subr.bf16.mxu0 %v10957_v5  ;;  %5083 = vmatprep.subr.bf16.mxu1 %v11014_v56  ;;  %v11065_v42 = vld [vmem:[#allocation26 + $0x4c] ss:$16 sps:$4 sm:$0xff]   ;;  %v11069_v44 = vld [vmem:[#allocation26 + $0x68] ss:$16 sps:$4 sm:$0xff]   ;;  %v11048_v56 = vld [vmem:[#allocation26] ss:$16 sps:$4 sm:$0xff]  }
 0x640   :  { %v11071_v14 = vld [vmem:[#allocation26 + $0x6c] ss:$16 sps:$4 sm:$0xff]   ;;  %v11075_v46 = vld [vmem:[#allocation26 + $0x88] ss:$16 sps:$4 sm:$0xff]  }
 0x641   :  { %5084 = vmatpush1.bf16.msra.mxu1 %v11012_v30  ;;  %v11077_v5 = vld [vmem:[#allocation26 + $0x8c] ss:$16 sps:$4 sm:$0xff]   ;;  %v11056_v30 = vld [vmem:[#allocation26 + $0x24] ss:$16 sps:$4 sm:$0xff]  }
 0x642   :  { %4920 = vmatpush1.bf16.msra.mxu0 %v10955_v15  ;;  %5085 = vmatprep.subr.bf16.mxu1 %v11017_v31  ;;  %v11083_v15 = vld [vmem:[#allocation26 + $0xac] ss:$16 sps:$4 sm:$0xff]   ;;  %v11307_v31 = vld [vmem:[%s12405_s5] sm:$0xf] }
 0x643   :  { %4921 = vmatprep.subr.bf16.mxu0 %v10960_v45  ;;  %v11081_v45 = vld [vmem:[#allocation26 + $0xa8] ss:$16 sps:$4 sm:$0xff]  }
 0x644   :  { %v11044_v2 = vld [vmem:[#allocation22 + $0x64] ss:$8 sps:$4 sm:$0xff]   ;;  %v11047_v25 = vld [vmem:[#allocation22 + $0x74] ss:$8 sps:$4 sm:$0xff]  }
 0x645   :  { %5086 = vmatpush1.bf16.msra.mxu1 %v11015_v32  ;;  %v11054_v32 = vld [vmem:[#allocation26 + $0x20] ss:$16 sps:$4 sm:$0xff]  }
 0x646   :  { %4922 = vmatpush1.bf16.msra.mxu0 %v10958_v47  ;;  %5087 = vmatprep.subr.bf16.mxu1 %v11020_v34  ;;  %v11089_v47 = vld [vmem:[#allocation26 + $0xcc] ss:$16 sps:$4 sm:$0xff]   ;;  %v11062_v34 = vld [vmem:[#allocation26 + $0x44] ss:$16 sps:$4 sm:$0xff]  }
 0x647   :  { %4923 = vmatprep.subr.bf16.mxu0 %v10963_v48  ;;  %v11087_v48 = vld [vmem:[#allocation26 + $0xc8] ss:$16 sps:$4 sm:$0xff]  }
 0x649   :  { %5088 = vmatpush1.bf16.msra.mxu1 %v11018_v60  ;;  %v11060_v60 = vld [vmem:[#allocation26 + $0x40] ss:$16 sps:$4 sm:$0xff]  }
 0x64a   :  { %4924 = vmatpush1.bf16.msra.mxu0 %v10961_v49  ;;  %5089 = vmatprep.subr.bf16.mxu1 %v11023_v37  ;;  %v4544_v49 = vld [vmem:[#allocation17] sm:$0x3]  ;;  %v11068_v37 = vld [vmem:[#allocation26 + $0x64] ss:$16 sps:$4 sm:$0xff]  }
 0x64b   :  { %4925 = vmatprep.subr.bf16.mxu0 %v10966_v50  ;;  %v4549_v50 = vrot.slane %v4544_v49, %v12184_v10 }
 0x64d   :  { %5090 = vmatpush1.bf16.msra.mxu1 %v11021_v35  ;;  %v11066_v35 = vld [vmem:[#allocation26 + $0x60] ss:$16 sps:$4 sm:$0xff]  }
 0x64e   :  { %4926 = vmatpush1.bf16.msra.mxu0 %v10964_v51  ;;  %5228 = vmatprep.subr.bf16.mxu1 %v11026_v36  ;;  %v4553_v51 = vrot.slane %v4544_v49, %v12190_v12  ;;  %v11074_v36 = vld [vmem:[#allocation26 + $0x84] ss:$16 sps:$4 sm:$0xff]   ;;  %v11107_v49 = vld [vmem:[#allocation26 + $0x12c] ss:$16 sps:$4 sm:$0xff]  }
 0x64f   :  { %4927 = vmatprep.subr.bf16.mxu0 %v10969_v27 }
 0x652   :  { %4928 = vmatpush1.bf16.msra.mxu0 %v10967_v53 }
 0x653   :  { %4929 = vmatprep.subr.bf16.mxu0 %v10972_v54 }
 0x656   :  { %4930 = vmatpush1.bf16.msra.mxu0 %v10970_v55 }
 0x657   :  { %4931 = vmatprep.subr.bf16.mxu0 %v10975_v57 }
 0x65a   :  { %4932 = vmatpush1.bf16.msra.mxu0 %v10973_v58 }
 0x65b   :  { %4933 = vmatprep.subr.bf16.mxu0 %v10978_v62 }
 0x65e   :  { %4934 = vmatpush1.bf16.msra.mxu0 %v10976_v63 }
 0x65f   :  { %4935 = vmatprep.subr.bf16.mxu0 %v10981_v1  ;;  %v4960_v1 = vld [vmem:[%s12407_s1] sm:$0xff] }
 0x662   :  { %4936 = vmatpush1.bf16.msra.mxu0 %v10979_v3 }
 0x663   :  { %4937 = vmatprep.subr.bf16.mxu0 %v10984_v4 }
 0x666   :  { %4938 = vmatpush1.bf16.msra.mxu0 %v10982_v6 }
 0x667   :  { %4939 = vmatprep.subr.bf16.mxu0 %v10987_v7  ;;  %v11024_v7 = vld [vmem:[#allocation22] ss:$8 sps:$4 sm:$0xff]  }
 0x66a   :  { %4940 = vmatpush1.bf16.msra.mxu0 %v10985_v8 }
 0x66b   :  { %4941 = vmatprep.subr.bf16.mxu0 %v10990_v13  ;;  %v11029_v13 = vld [vmem:[#allocation22 + $0x14] ss:$8 sps:$4 sm:$0xff]  }
 0x66e   :  { %4942 = vmatpush1.bf16.msra.mxu0 %v10988_v17  ;;  %v11027_v17 = vld [vmem:[#allocation22 + $0x10] ss:$8 sps:$4 sm:$0xff]  }
 0x66f   :  { %4943 = vmatprep.subr.bf16.mxu0 %v10993_v61  ;;  %v11032_v61 = vld [vmem:[#allocation22 + $0x24] ss:$8 sps:$4 sm:$0xff]  }
 0x672   :  { %4944 = vmatpush1.bf16.msra.mxu0 %v10991_v40  ;;  %v11030_v40 = vld [vmem:[#allocation22 + $0x20] ss:$8 sps:$4 sm:$0xff]  }
 0x673   :  { %4945 = vmatprep.subr.bf16.mxu0 %v10996_v19  ;;  %v11035_v19 = vld [vmem:[#allocation22 + $0x34] ss:$8 sps:$4 sm:$0xff]  }
 0x676   :  { %4946 = vmatpush1.bf16.msra.mxu0 %v10994_v20  ;;  %v11033_v20 = vld [vmem:[#allocation22 + $0x30] ss:$8 sps:$4 sm:$0xff]  }
 0x677   :  { %4947 = vmatprep.subr.bf16.mxu0 %v10999_v21  ;;  %v11038_v21 = vld [vmem:[#allocation22 + $0x44] ss:$8 sps:$4 sm:$0xff]  }
 0x67a   :  { %4948 = vmatpush1.bf16.msra.mxu0 %v10997_v22  ;;  %v11036_v22 = vld [vmem:[#allocation22 + $0x40] ss:$8 sps:$4 sm:$0xff]  }
 0x67b   :  { %5762 = vmatprep.subr.bf16.mxu0 %v11053_v39  ;;  %v11080_v39 = vld [vmem:[#allocation26 + $0xa4] ss:$16 sps:$4 sm:$0xff]  }
 0x67d   :  { %4950 = vmatmul.mubr.bf16.vlgmr.msra.gmra.mrb[20].mxu0 %v4478_v24  ;;  %v11039_v24 = vld [vmem:[#allocation22 + $0x50] ss:$8 sps:$4 sm:$0xff]  }
 0x67e   :  { %5763 = vmatpush1.bf16.msra.mxu0 %v11051_v38  ;;  %v11072_v38 = vld [vmem:[#allocation26 + $0x80] ss:$16 sps:$4 sm:$0xff]  }
 0x67f   :  { %5764 = vmatprep.subr.bf16.mxu0 %v11059_v59  ;;  %v11078_v59 = vld [vmem:[#allocation26 + $0xa0] ss:$16 sps:$4 sm:$0xff]  }
 0x682   :  { %5765 = vmatpush1.bf16.msra.mxu0 %v11057_v41  ;;  %v11086_v41 = vld [vmem:[#allocation26 + $0xc4] ss:$16 sps:$4 sm:$0xff]  }
 0x683   :  { %5766 = vmatprep.subr.bf16.mxu0 %v11065_v42  ;;  %v11084_v42 = vld [vmem:[#allocation26 + $0xc0] ss:$16 sps:$4 sm:$0xff]  }
 0x686   :  { %5767 = vmatpush1.bf16.msra.mxu0 %v11063_v43  ;;  %v11092_v43 = vld [vmem:[#allocation26 + $0xe4] ss:$16 sps:$4 sm:$0xff]  }
 0x687   :  { %5768 = vmatprep.subr.bf16.mxu0 %v11071_v14  ;;  %v11095_v14 = vld [vmem:[#allocation26 + $0xec] ss:$16 sps:$4 sm:$0xff]  }
 0x68a   :  { %5769 = vmatpush1.bf16.msra.mxu0 %v11069_v44  ;;  %v11090_v44 = vld [vmem:[#allocation26 + $0xe0] ss:$16 sps:$4 sm:$0xff]  }
 0x68b   :  { %5770 = vmatprep.subr.bf16.mxu0 %v11077_v5  ;;  %v11093_v5 = vld [vmem:[#allocation26 + $0xe8] ss:$16 sps:$4 sm:$0xff]  }
 0x68e   :  { %5771 = vmatpush1.bf16.msra.mxu0 %v11075_v46  ;;  %v11096_v46 = vld [vmem:[#allocation26 + $0x100] ss:$16 sps:$4 sm:$0xff]  }
 0x68f   :  { %5772 = vmatprep.subr.bf16.mxu0 %v11083_v15  ;;  %v11098_v15 = vld [vmem:[#allocation26 + $0x104] ss:$16 sps:$4 sm:$0xff]  }
 0x692   :  { %5773 = vmatpush1.bf16.msra.mxu0 %v11081_v45  ;;  %v11099_v45 = vld [vmem:[#allocation26 + $0x108] ss:$16 sps:$4 sm:$0xff]  }
 0x693   :  { %5774 = vmatprep.subr.bf16.mxu0 %v11089_v47  ;;  %v11101_v47 = vld [vmem:[#allocation26 + $0x10c] ss:$16 sps:$4 sm:$0xff]  }
 0x696   :  { %5775 = vmatpush1.bf16.msra.mxu0 %v11087_v48  ;;  %v11104_v48 = vld [vmem:[#allocation26 + $0x124] ss:$16 sps:$4 sm:$0xff]  }
 0x697   :  { %5776 = vmatprep.subr.bf16.mxu0 %v11095_v14 }
 0x69a   :  { %5777 = vmatpush1.bf16.msra.mxu0 %v11093_v5  ;;  %v11144_v5 = vld [vmem:[#allocation25] ss:$16 sps:$4 sm:$0xff]  }
 0x69b   :  { %5778 = vmatprep.subr.bf16.mxu0 %v11101_v47  ;;  %v11155_v47 = vld [vmem:[#allocation25 + $0x2c] ss:$16 sps:$4 sm:$0xff]  }
 0x69e   :  { %5779 = vmatpush1.bf16.msra.mxu0 %v11099_v45  ;;  %v11152_v45 = vld [vmem:[#allocation25 + $0x24] ss:$16 sps:$4 sm:$0xff]  }
 0x69f   :  { %5780 = vmatprep.subr.bf16.mxu0 %v11107_v49  ;;  %v11150_v49 = vld [vmem:[#allocation25 + $0x20] ss:$16 sps:$4 sm:$0xff]  }
 0x750   :  { %v4951_v27 = vpop.f32.mrb[20].mxu0 }
 0x751   :  { %v10089_v53 = vadd.f32 %v4951_v27, %v4549_v50  ;;  %v4953_v54 = vpop.f32.mrb[21].mxu0  ;;  %v11102_v50 = vld [vmem:[#allocation26 + $0x120] ss:$16 sps:$4 sm:$0xff]   ;;  %v11110_v27 = vld [vmem:[#allocation26 + $0x144] ss:$16 sps:$4 sm:$0xff]  }
 0x752   :  { %v10090_v55 = vadd.f32 %v4953_v54, %v4553_v51  ;;  %v4955_v57 = vpop.f32.mrb[22].mxu0  ;;  %v11105_v51 = vld [vmem:[#allocation26 + $0x128] ss:$16 sps:$4 sm:$0xff]   ;;  %v11108_v54 = vld [vmem:[#allocation26 + $0x140] ss:$16 sps:$4 sm:$0xff]  }
 0x753   :  { %4958 = vst [vmem:[#allocation34] sm:$0xff] %v10089_v53  ;;  %v4956_v58 = vpop.f32.mrb[23].mxu0  ;;  %5781 = vmatpush1.bf16.msra.mxu0 %v11105_v51  ;;  %v11116_v57 = vld [vmem:[#allocation26 + $0x164] ss:$16 sps:$4 sm:$0xff]  }
 0x754   :  { %v4961_v62 = vmul.f32 0.5, %v10090_v55  ;;  %4959 = vst [vmem:[#allocation35] sm:$0xff] %v10090_v55  ;;  %v11111_v55 = vld [vmem:[#allocation26 + $0x148] ss:$16 sps:$4 sm:$0xff]   ;;  %v11119_v58 = vld [vmem:[#allocation26 + $0x16c] ss:$16 sps:$4 sm:$0xff]  }
 0x755   :  { %v11158_v51 = vld [vmem:[#allocation25 + $0x44] ss:$16 sps:$4 sm:$0xff]  }
 0x756   :  { %v4962_v63 = vmul.f32 1.442695, %v4961_v62  ;;  %v11114_v62 = vld [vmem:[#allocation26 + $0x160] ss:$16 sps:$4 sm:$0xff]  }
 0x758   :  { %11304 = vpow2.f32 %v4962_v63  ;;  %v11117_v63 = vld [vmem:[#allocation26 + $0x168] ss:$16 sps:$4 sm:$0xff]  }
 0x762   :  { %v11305_v3 = vpop.eup %11304 }
 0x763   :  { %v4964_v4 = vmul.f32 %v11305_v3, %v4960_v1  ;;  %v11122_v1 = vld [vmem:[#allocation26 + $0x184] ss:$16 sps:$4 sm:$0xff]   ;;  %v11125_v3 = vld [vmem:[#allocation26 + $0x18c] ss:$16 sps:$4 sm:$0xff]  }
 0x765   :  { %v4965_v6 = vadd.f32 %v10089_v53, %v4964_v4  ;;  %v11113_v53 = vld [vmem:[#allocation26 + $0x14c] ss:$16 sps:$4 sm:$0xff]   ;;  %v11120_v4 = vld [vmem:[#allocation26 + $0x180] ss:$16 sps:$4 sm:$0xff]  }
 0x766   :  { %5782 = vmatprep.subr.bf16.mxu0 %v11113_v53  ;;  %v11156_v53 = vld [vmem:[#allocation25 + $0x40] ss:$16 sps:$4 sm:$0xff]  }
 0x767   :  { %v4966_v8 = vpack.c.bf16 %v4965_v6, %v4965_v6  ;;  %5783 = vmatpush1.bf16.msra.mxu0 %v11111_v55  ;;  %v11123_v6 = vld [vmem:[#allocation26 + $0x188] ss:$16 sps:$4 sm:$0xff]   ;;  %v11164_v55 = vld [vmem:[#allocation25 + $0x64] ss:$16 sps:$4 sm:$0xff]  }
 0x768   :  { %5784 = vmatprep.subr.bf16.mxu0 %v11119_v58  ;;  %v11162_v58 = vld [vmem:[#allocation25 + $0x60] ss:$16 sps:$4 sm:$0xff]  }
 0x769   :  { %5108 = vmatmul.mubr.bf16.vlgmr.msra.gmra.mrb[28].mxu1 %v4966_v8  ;;  %v11131_v8 = vld [vmem:[#allocation26 + $0x1ac] ss:$16 sps:$4 sm:$0xff]  }
 0x76a   :  { %5229 = vmatpush1.bf16.msra.mxu1 %v11024_v7  ;;  %5260 = vmatprep.mubr.bf16.mxu1 %v11897_v0  ;;  %v11042_v0 = vld [vmem:[#allocation22 + $0x60] ss:$8 sps:$4 sm:$0xff]  }
 0x76b   :  { %5230 = vmatprep.subr.bf16.mxu1 %v11029_v13  ;;  %5785 = vmatpush1.bf16.msra.mxu0 %v11117_v63  ;;  %v11128_v7 = vld [vmem:[#allocation26 + $0x1a4] ss:$16 sps:$4 sm:$0xff]   ;;  %v11126_v13 = vld [vmem:[#allocation26 + $0x1a0] ss:$16 sps:$4 sm:$0xff]  }
 0x76c   :  { %5786 = vmatprep.subr.bf16.mxu0 %v11125_v3  ;;  %v11170_v63 = vld [vmem:[#allocation25 + $0x84] ss:$16 sps:$4 sm:$0xff]   ;;  %v11168_v3 = vld [vmem:[#allocation25 + $0x80] ss:$16 sps:$4 sm:$0xff]  }
 0x76e   :  { %5231 = vmatpush1.bf16.msra.mxu1 %v11027_v17  ;;  %v11129_v17 = vld [vmem:[#allocation26 + $0x1a8] ss:$16 sps:$4 sm:$0xff]  }
 0x76f   :  { %5232 = vmatprep.subr.bf16.mxu1 %v11032_v61  ;;  %5787 = vmatpush1.bf16.msra.mxu0 %v11123_v6  ;;  %v11134_v61 = vld [vmem:[#allocation26 + $0x1c4] ss:$16 sps:$4 sm:$0xff]  }
 0x770   :  { %5788 = vmatprep.subr.bf16.mxu0 %v11131_v8  ;;  %v11176_v6 = vld [vmem:[#allocation25 + $0xa4] ss:$16 sps:$4 sm:$0xff]   ;;  %v11174_v8 = vld [vmem:[#allocation25 + $0xa0] ss:$16 sps:$4 sm:$0xff]  }
 0x772   :  { %5233 = vmatpush1.bf16.msra.mxu1 %v11030_v40  ;;  %v11137_v40 = vld [vmem:[#allocation26 + $0x1cc] ss:$16 sps:$4 sm:$0xff]  }
 0x773   :  { %5234 = vmatprep.subr.bf16.mxu1 %v11035_v19  ;;  %5789 = vmatpush1.bf16.msra.mxu0 %v11129_v17  ;;  %v11132_v19 = vld [vmem:[#allocation26 + $0x1c0] ss:$16 sps:$4 sm:$0xff]   ;;  %v11182_v17 = vld [vmem:[#allocation25 + $0xc4] ss:$16 sps:$4 sm:$0xff]  }
 0x774   :  { %5790 = vmatprep.subr.bf16.mxu0 %v11137_v40  ;;  %v11180_v40 = vld [vmem:[#allocation25 + $0xc0] ss:$16 sps:$4 sm:$0xff]  }
 0x776   :  { %5235 = vmatpush1.bf16.msra.mxu1 %v11033_v20  ;;  %v11135_v20 = vld [vmem:[#allocation26 + $0x1c8] ss:$16 sps:$4 sm:$0xff]  }
 0x777   :  { %5236 = vmatprep.subr.bf16.mxu1 %v11038_v21  ;;  %5791 = vmatpush1.bf16.msra.mxu0 %v11135_v20  ;;  %v11140_v21 = vld [vmem:[#allocation26 + $0x1e4] ss:$16 sps:$4 sm:$0xff]  }
 0x778   :  { %v11188_v20 = vld [vmem:[#allocation25 + $0xe4] ss:$16 sps:$4 sm:$0xff]  }
 0x77a   :  { %5237 = vmatpush1.bf16.msra.mxu1 %v11036_v22  ;;  %v11143_v22 = vld [vmem:[#allocation26 + $0x1ec] ss:$16 sps:$4 sm:$0xff]  }
 0x77b   :  { %5238 = vmatprep.subr.bf16.mxu1 %v11041_v23  ;;  %v11138_v23 = vld [vmem:[#allocation26 + $0x1e0] ss:$16 sps:$4 sm:$0xff]   ;;  %5792 = vmatprep.subr.bf16.mxu0 %v11143_v22 }
 0x77c   :  { %v11186_v22 = vld [vmem:[#allocation25 + $0xe0] ss:$16 sps:$4 sm:$0xff]  }
 0x77e   :  { %5239 = vmatpush1.bf16.msra.mxu1 %v11039_v24  ;;  %v11141_v24 = vld [vmem:[#allocation26 + $0x1e8] ss:$16 sps:$4 sm:$0xff]  }
 0x77f   :  { %5240 = vmatprep.subr.bf16.mxu1 %v11044_v2  ;;  %5793 = vmatpush1.bf16.msra.mxu0 %v11141_v24  ;;  %v11146_v2 = vld [vmem:[#allocation25 + $0x4] ss:$16 sps:$4 sm:$0xff]  }
 0x780   :  { %v11194_v24 = vld [vmem:[#allocation25 + $0x104] ss:$16 sps:$4 sm:$0xff]  }
 0x782   :  { %5241 = vmatpush1.bf16.msra.mxu1 %v11042_v0  ;;  %v11149_v0 = vld [vmem:[#allocation25 + $0xc] ss:$16 sps:$4 sm:$0xff]  }
 0x783   :  { %5242 = vmatprep.subr.bf16.mxu1 %v11047_v25  ;;  %6164 = vmatprep.subr.bf16.mxu0 %v11149_v0  ;;  %v11192_v0 = vld [vmem:[#allocation25 + $0x100] ss:$16 sps:$4 sm:$0xff]  }
 0x786   :  { %5243 = vmatpush1.bf16.msra.mxu1 %v11045_v26 }
 0x787   :  { %5721 = vmatprep.subr.bf16.mxu1 %v11050_v29 }
 0x789   :  { %5261 = vmatmul.mubr.bf16.vlgmr.msra.gmra.mrb[32].mxu1 %v11307_v31  ;;  %v5136_v31 = vld [vmem:[#allocation23] sm:$0x3] }
 0x78a   :  { %5722 = vmatpush1.bf16.msra.mxu1 %v11048_v56 }
 0x78b   :  { %5723 = vmatprep.subr.bf16.mxu1 %v11056_v30  ;;  %v12301_v30 = vld [vmem:[#allocation20] sm:$0x3] }
 0x78e   :  { %5724 = vmatpush1.bf16.msra.mxu1 %v11054_v32  ;;  %v4992_v32 = vrot.slane %v12301_v30, %v12190_v12 }
 0x78f   :  { %5725 = vmatprep.subr.bf16.mxu1 %v11062_v34  ;;  %v5141_v34 = vrot.slane %v5136_v31, %v12184_v10 }
 0x792   :  { %5726 = vmatpush1.bf16.msra.mxu1 %v11060_v60  ;;  %v5145_v60 = vrot.slane %v5136_v31, %v12190_v12  ;;  %v11198_v31 = vld [vmem:[#allocation25 + $0x120] ss:$16 sps:$4 sm:$0xff]  }
 0x793   :  { %5727 = vmatprep.subr.bf16.mxu1 %v11068_v37 }
 0x796   :  { %5728 = vmatpush1.bf16.msra.mxu1 %v11066_v35 }
 0x797   :  { %5729 = vmatprep.subr.bf16.mxu1 %v11074_v36 }
 0x79a   :  { %5730 = vmatpush1.bf16.msra.mxu1 %v11072_v38 }
 0x79b   :  { %5731 = vmatprep.subr.bf16.mxu1 %v11080_v39 }
 0x79e   :  { %5732 = vmatpush1.bf16.msra.mxu1 %v11078_v59 }
 0x79f   :  { %5733 = vmatprep.subr.bf16.mxu1 %v11086_v41 }
 0x7a2   :  { %5734 = vmatpush1.bf16.msra.mxu1 %v11084_v42 }
 0x7a3   :  { %5735 = vmatprep.subr.bf16.mxu1 %v11092_v43 }
 0x7a6   :  { %5736 = vmatpush1.bf16.msra.mxu1 %v11090_v44 }
 0x7a7   :  { %5737 = vmatprep.subr.bf16.mxu1 %v11098_v15 }
 0x7aa   :  { %5738 = vmatpush1.bf16.msra.mxu1 %v11096_v46  ;;  %v11147_v46 = vld [vmem:[#allocation25 + $0x8] ss:$16 sps:$4 sm:$0xff]  }
 0x7ab   :  { %5739 = vmatprep.subr.bf16.mxu1 %v11104_v48 }
 0x7ae   :  { %5740 = vmatpush1.bf16.msra.mxu1 %v11102_v50  ;;  %v11153_v50 = vld [vmem:[#allocation25 + $0x28] ss:$16 sps:$4 sm:$0xff]  }
 0x7af   :  { %5741 = vmatprep.subr.bf16.mxu1 %v11110_v27  ;;  %v11161_v27 = vld [vmem:[#allocation25 + $0x4c] ss:$16 sps:$4 sm:$0xff]  }
 0x7b2   :  { %5742 = vmatpush1.bf16.msra.mxu1 %v11108_v54  ;;  %v11159_v54 = vld [vmem:[#allocation25 + $0x48] ss:$16 sps:$4 sm:$0xff]  }
 0x7b3   :  { %5743 = vmatprep.subr.bf16.mxu1 %v11116_v57  ;;  %v11167_v57 = vld [vmem:[#allocation25 + $0x6c] ss:$16 sps:$4 sm:$0xff]  }
 0x7b6   :  { %5744 = vmatpush1.bf16.msra.mxu1 %v11114_v62  ;;  %v11165_v62 = vld [vmem:[#allocation25 + $0x68] ss:$16 sps:$4 sm:$0xff]  }
 0x7b7   :  { %5745 = vmatprep.subr.bf16.mxu1 %v11122_v1  ;;  %v11173_v1 = vld [vmem:[#allocation25 + $0x8c] ss:$16 sps:$4 sm:$0xff]  }
 0x7ba   :  { %5746 = vmatpush1.bf16.msra.mxu1 %v11120_v4  ;;  %v11171_v4 = vld [vmem:[#allocation25 + $0x88] ss:$16 sps:$4 sm:$0xff]  }
 0x7bb   :  { %5747 = vmatprep.subr.bf16.mxu1 %v11128_v7  ;;  %v11179_v7 = vld [vmem:[#allocation25 + $0xac] ss:$16 sps:$4 sm:$0xff]  }
 0x7be   :  { %5748 = vmatpush1.bf16.msra.mxu1 %v11126_v13  ;;  %v11177_v13 = vld [vmem:[#allocation25 + $0xa8] ss:$16 sps:$4 sm:$0xff]  }
 0x7bf   :  { %5749 = vmatprep.subr.bf16.mxu1 %v11134_v61  ;;  %v11185_v61 = vld [vmem:[#allocation25 + $0xcc] ss:$16 sps:$4 sm:$0xff]  }
 0x7c2   :  { %5750 = vmatpush1.bf16.msra.mxu1 %v11132_v19  ;;  %v11183_v19 = vld [vmem:[#allocation25 + $0xc8] ss:$16 sps:$4 sm:$0xff]  }
 0x7c3   :  { %5751 = vmatprep.subr.bf16.mxu1 %v11140_v21  ;;  %v11191_v21 = vld [vmem:[#allocation25 + $0xec] ss:$16 sps:$4 sm:$0xff]  }
 0x7c6   :  { %5752 = vmatpush1.bf16.msra.mxu1 %v11138_v23  ;;  %v11189_v23 = vld [vmem:[#allocation25 + $0xe8] ss:$16 sps:$4 sm:$0xff]  }
 0x7c7   :  { %6123 = vmatprep.subr.bf16.mxu1 %v11146_v2  ;;  %v11197_v2 = vld [vmem:[#allocation25 + $0x10c] ss:$16 sps:$4 sm:$0xff]  }
 0x83c   :  { %v12299_v25 = vpop.f32.mrb[28].mxu1 }
 0x83d   :  { %v5111_v26 = vpop.f32.mrb[29].mxu1 }
 0x83e   :  { %v5113_v29 = vpop.f32.mrb[30].mxu1  ;;  %v5112_v35 = vadd.f32 %v5111_v26, %v4992_v32  ;;  %v11195_v26 = vld [vmem:[#allocation25 + $0x108] ss:$16 sps:$4 sm:$0xff]  }
 0x83f   :  { %v5114_v56 = vpop.f32.mrb[31].mxu1  ;;  %v11200_v29 = vld [vmem:[#allocation25 + $0x124] ss:$16 sps:$4 sm:$0xff]   ;;  %v11201_v32 = vld [vmem:[#allocation25 + $0x128] ss:$16 sps:$4 sm:$0xff]  }
 0x840   :  { %v5117_v14 = vmax.f32 %v5112_v35, 0.0  ;;  %v11203_v56 = vld [vmem:[#allocation25 + $0x12c] ss:$16 sps:$4 sm:$0xff]   ;;  %v11207_v35 = vld [vmem:[#allocation25 + $0x148] ss:$16 sps:$4 sm:$0xff]  }
 0x842   :  { %v5119_v48 = vpack.c.bf16 %v5117_v14, %v5117_v14  ;;  %v11219_v14 = vld [vmem:[#allocation25 + $0x188] ss:$16 sps:$4 sm:$0xff]  }
 0x85c   :  { %v5262_v37 = vpop.f32.mrb[32].mxu1 }
 0x85d   :  { %v5263_v36 = vadd.f32 %v5262_v37, %v5141_v34  ;;  %v5264_v38 = vpop.f32.mrb[33].mxu1  ;;  %v11206_v34 = vld [vmem:[#allocation25 + $0x144] ss:$16 sps:$4 sm:$0xff]   ;;  %v11204_v37 = vld [vmem:[#allocation25 + $0x140] ss:$16 sps:$4 sm:$0xff]  }
 0x85e   :  { %v5265_v39 = vadd.f32 %v5264_v38, %v5145_v60  ;;  %v5266_v59 = vpop.f32.mrb[34].mxu1  ;;  %v11209_v60 = vld [vmem:[#allocation25 + $0x14c] ss:$16 sps:$4 sm:$0xff]  }
 0x85f   :  { %v5269_v41 = vmax.f32 %v5263_v36, 0.0  ;;  %v5267_v42 = vpop.f32.mrb[35].mxu1  ;;  %v11212_v36 = vld [vmem:[#allocation25 + $0x164] ss:$16 sps:$4 sm:$0xff]   ;;  %v11215_v38 = vld [vmem:[#allocation25 + $0x16c] ss:$16 sps:$4 sm:$0xff]  }
 0x860   :  { %v5270_v43 = vmax.f32 %v5265_v39, 0.0  ;;  %v11210_v39 = vld [vmem:[#allocation25 + $0x160] ss:$16 sps:$4 sm:$0xff]   ;;  %v11213_v59 = vld [vmem:[#allocation25 + $0x168] ss:$16 sps:$4 sm:$0xff]  }
 0x861   :  { %v5271_v15 = vpack.c.bf16 %v5269_v41, %v5269_v41  ;;  %v11218_v41 = vld [vmem:[#allocation25 + $0x184] ss:$16 sps:$4 sm:$0xff]   ;;  %v11221_v42 = vld [vmem:[#allocation25 + $0x18c] ss:$16 sps:$4 sm:$0xff]  }
 0x862   :  { %v5272_v44 = vpack.c.bf16 %v5270_v43, %v5270_v43  ;;  %v11216_v43 = vld [vmem:[#allocation25 + $0x180] ss:$16 sps:$4 sm:$0xff]  }
 0x864   :  { %5753 = vmatprep.mubr.bf16.mxu1 %v5272_v44  ;;  %5794 = vmatprep.mubr.bf16.mxu0 %v5272_v44  ;;  %v11224_v44 = vld [vmem:[#allocation25 + $0x1a4] ss:$16 sps:$4 sm:$0xff]  }
 0x865   :  { %5754 = vmatmul.mubr.bf16.vlgmr.msra.gmra.mrb[36].mxu1 %v5271_v15  ;;  %5795 = vmatmul.mubr.bf16.vlgmr.msra.gmra.mrb[24].mxu0 %v5271_v15  ;;  %v11225_v15 = vld [vmem:[#allocation25 + $0x1a8] ss:$16 sps:$4 sm:$0xff]  }
 0x866   :  { %6124 = vmatpush1.bf16.msra.mxu1 %v11144_v5  ;;  %6165 = vmatpush1.bf16.msra.mxu0 %v11147_v46  ;;  %v11227_v5 = vld [vmem:[#allocation25 + $0x1ac] ss:$16 sps:$4 sm:$0xff]   ;;  %v11222_v46 = vld [vmem:[#allocation25 + $0x1a0] ss:$16 sps:$4 sm:$0xff]  }
 0x867   :  { %6155 = vmatprep.mubr.bf16.mxu1 %v5119_v48  ;;  %6196 = vmatprep.mubr.bf16.mxu0 %v5119_v48  ;;  %v11233_v48 = vld [vmem:[#allocation25 + $0x1cc] ss:$16 sps:$4 sm:$0xff]  }
 0x868   :  { %6125 = vmatprep.subr.bf16.mxu1 %v11152_v45  ;;  %6166 = vmatprep.subr.bf16.mxu0 %v11155_v47  ;;  %v4988_v45 = vrot.slane %v12301_v30, %v12184_v10  ;;  %v11230_v47 = vld [vmem:[#allocation25 + $0x1c4] ss:$16 sps:$4 sm:$0xff]  }
 0x86a   :  { %6126 = vmatpush1.bf16.msra.mxu1 %v11150_v49  ;;  %6167 = vmatpush1.bf16.msra.mxu0 %v11153_v50  ;;  %v11228_v49 = vld [vmem:[#allocation25 + $0x1c0] ss:$16 sps:$4 sm:$0xff]   ;;  %v11231_v50 = vld [vmem:[#allocation25 + $0x1c8] ss:$16 sps:$4 sm:$0xff]  }
 0x86b   :  { %6127 = vmatprep.subr.bf16.mxu1 %v11158_v51  ;;  %6168 = vmatprep.subr.bf16.mxu0 %v11161_v27  ;;  %v5110_v51 = vadd.f32 %v12299_v25, %v4988_v45  ;;  %v11236_v27 = vld [vmem:[#allocation25 + $0x1e4] ss:$16 sps:$4 sm:$0xff]  }
 0x86e   :  { %6128 = vmatpush1.bf16.msra.mxu1 %v11156_v53  ;;  %6169 = vmatpush1.bf16.msra.mxu0 %v11159_v54  ;;  %v11239_v53 = vld [vmem:[#allocation25 + $0x1ec] ss:$16 sps:$4 sm:$0xff]   ;;  %v11234_v54 = vld [vmem:[#allocation25 + $0x1e0] ss:$16 sps:$4 sm:$0xff]  }
 0x86f   :  { %6129 = vmatprep.subr.bf16.mxu1 %v11164_v55  ;;  %6170 = vmatprep.subr.bf16.mxu0 %v11167_v57  ;;  %v11237_v55 = vld [vmem:[#allocation25 + $0x1e8] ss:$16 sps:$4 sm:$0xff]   ;;  %v5116_v57 = vmax.f32 %v5110_v51, 0.0  ;;  %v6288_v51 = vld [vmem:[#allocation29 + $0x188] sm:$0xff] }
 0x871   :  { %v5118_v30 = vpack.c.bf16 %v5116_v57, %v5116_v57 }
 0x872   :  { %6130 = vmatpush1.bf16.msra.mxu1 %v11162_v58  ;;  %6171 = vmatpush1.bf16.msra.mxu0 %v11165_v62  ;;  %v6239_v58 = vld [vmem:[#allocation29] sm:$0xff] }
 0x873   :  { %6131 = vmatprep.subr.bf16.mxu1 %v11170_v63  ;;  %6172 = vmatprep.subr.bf16.mxu0 %v11173_v1  ;;  %v6243_v62 = vld [vmem:[#allocation29 + $0x20] sm:$0xff]  ;;  %v6240_v63 = vld [vmem:[#allocation29 + $0x8] sm:$0xff] }
 0x874   :  { %v9674_v25 = vcombine.low %v6239_v58, %v6243_v62  ;;  %v9675_v1 = vcombine.high %v6239_v58, %v6243_v62  ;;  %v6299_v58 = vld [vmem:[#allocation29 + $0x1e0] sm:$0xff]  ;;  %v6296_v62 = vld [vmem:[#allocation29 + $0x1c8] sm:$0xff] }
 0x876   :  { %6132 = vmatpush1.bf16.msra.mxu1 %v11168_v3  ;;  %6173 = vmatpush1.bf16.msra.mxu0 %v11171_v4  ;;  %v6244_v3 = vld [vmem:[#allocation29 + $0x28] sm:$0xff]  ;;  %v6247_v4 = vld [vmem:[#allocation29 + $0x40] sm:$0xff] }
 0x877   :  { %6133 = vmatprep.subr.bf16.mxu1 %v11176_v6  ;;  %6174 = vmatprep.subr.bf16.mxu0 %v11179_v7  ;;  %v6251_v6 = vld [vmem:[#allocation29 + $0x60] sm:$0xff]  ;;  %v9676_v7 = vcombine.low %v6240_v63, %v6244_v3 }
 0x87a   :  { %6134 = vmatpush1.bf16.msra.mxu1 %v11174_v8  ;;  %6175 = vmatpush1.bf16.msra.mxu0 %v11177_v13  ;;  %v9677_v8 = vcombine.high %v6240_v63, %v6244_v3  ;;  %v9683_v13 = vcombine.high %v6247_v4, %v6251_v6  ;;  %v6300_v63 = vld [vmem:[#allocation29 + $0x1e8] sm:$0xff] }
 0x87b   :  { %6135 = vmatprep.subr.bf16.mxu1 %v11182_v17  ;;  %6176 = vmatprep.subr.bf16.mxu0 %v11185_v61  ;;  %v6248_v17 = vld [vmem:[#allocation29 + $0x48] sm:$0xff] }
 0x87c   :  { %v6252_v61 = vld [vmem:[#allocation29 + $0x68] sm:$0xff] }
 0x87e   :  { %6136 = vmatpush1.bf16.msra.mxu1 %v11180_v40  ;;  %6177 = vmatpush1.bf16.msra.mxu0 %v11183_v19  ;;  %v6255_v40 = vld [vmem:[#allocation29 + $0x80] sm:$0xff]  ;;  %v9685_v19 = vcombine.high %v6248_v17, %v6252_v61 }
 0x87f   :  { %6137 = vmatprep.subr.bf16.mxu1 %v11188_v20  ;;  %6178 = vmatprep.subr.bf16.mxu0 %v11191_v21  ;;  %v6259_v20 = vld [vmem:[#allocation29 + $0xa0] sm:$0xff]  ;;  %v6256_v21 = vld [vmem:[#allocation29 + $0x88] sm:$0xff] }
 0x882   :  { %6138 = vmatpush1.bf16.msra.mxu1 %v11186_v22  ;;  %6179 = vmatpush1.bf16.msra.mxu0 %v11189_v23  ;;  %v6260_v22 = vld [vmem:[#allocation29 + $0xa8] sm:$0xff]  ;;  %v9682_v23 = vcombine.low %v6247_v4, %v6251_v6  ;;  %v9733_v4 = vcombine.high %v6296_v62, %v6300_v63  ;;  %v6303_v6 = vld [vmem:[#allocation29 + $0x200] sm:$0xff] }
 0x883   :  { %6139 = vmatprep.subr.bf16.mxu1 %v11194_v24  ;;  %6180 = vmatprep.subr.bf16.mxu0 %v11197_v2  ;;  %v9684_v24 = vcombine.low %v6248_v17, %v6252_v61  ;;  %v9691_v2 = vcombine.high %v6255_v40, %v6259_v20  ;;  %v9732_v61 = vcombine.low %v6296_v62, %v6300_v63  ;;  %v6351_v63 = vld [vmem:[#allocation29 + $0x380] sm:$0xff] }
 0x886   :  { %6140 = vmatpush1.bf16.msra.mxu1 %v11192_v0  ;;  %6181 = vmatpush1.bf16.msra.mxu0 %v11195_v26  ;;  %v9693_v0 = vcombine.high %v6256_v21, %v6260_v22  ;;  %v6263_v26 = vld [vmem:[#allocation29 + $0xc0] sm:$0xff] }
 0x887   :  { %6141 = vmatprep.subr.bf16.mxu1 %v11200_v29  ;;  %6182 = vmatprep.subr.bf16.mxu0 %v11203_v56  ;;  %v6267_v29 = vld [vmem:[#allocation29 + $0xe0] sm:$0xff]  ;;  %v6264_v56 = vld [vmem:[#allocation29 + $0xc8] sm:$0xff] }
 0x88a   :  { %6142 = vmatpush1.bf16.msra.mxu1 %v11198_v31  ;;  %6183 = vmatpush1.bf16.msra.mxu0 %v11201_v32  ;;  %v6268_v31 = vld [vmem:[#allocation29 + $0xe8] sm:$0xff]  ;;  %v9690_v32 = vcombine.low %v6255_v40, %v6259_v20  ;;  %v6311_v20 = vld [vmem:[#allocation29 + $0x240] sm:$0xff] }
 0x88b   :  { %6143 = vmatprep.subr.bf16.mxu1 %v11206_v34  ;;  %6184 = vmatprep.subr.bf16.mxu0 %v11209_v60  ;;  %v9692_v34 = vcombine.low %v6256_v21, %v6260_v22  ;;  %v9699_v60 = vcombine.high %v6263_v26, %v6267_v29  ;;  %v6315_v21 = vld [vmem:[#allocation29 + $0x260] sm:$0xff]  ;;  %v6312_v22 = vld [vmem:[#allocation29 + $0x248] sm:$0xff] }
 0x88e   :  { %6144 = vmatpush1.bf16.msra.mxu1 %v11204_v37  ;;  %6185 = vmatpush1.bf16.msra.mxu0 %v11207_v35  ;;  %v9701_v37 = vcombine.high %v6264_v56, %v6268_v31  ;;  %v6271_v35 = vld [vmem:[#allocation29 + $0x100] sm:$0xff] }
 0x88f   :  { %6145 = vmatprep.subr.bf16.mxu1 %v11212_v36  ;;  %6186 = vmatprep.subr.bf16.mxu0 %v11215_v38  ;;  %v6275_v36 = vld [vmem:[#allocation29 + $0x120] sm:$0xff]  ;;  %v6272_v38 = vld [vmem:[#allocation29 + $0x108] sm:$0xff] }
 0x892   :  { %6146 = vmatpush1.bf16.msra.mxu1 %v11210_v39  ;;  %6187 = vmatpush1.bf16.msra.mxu0 %v11213_v59  ;;  %v6276_v39 = vld [vmem:[#allocation29 + $0x128] sm:$0xff]  ;;  %v9698_v59 = vcombine.low %v6263_v26, %v6267_v29  ;;  %v6319_v29 = vld [vmem:[#allocation29 + $0x280] sm:$0xff] }
 0x893   :  { %6147 = vmatprep.subr.bf16.mxu1 %v11218_v41  ;;  %6188 = vmatprep.subr.bf16.mxu0 %v11221_v42  ;;  %v9700_v41 = vcombine.low %v6264_v56, %v6268_v31  ;;  %v9707_v42 = vcombine.high %v6271_v35, %v6275_v36  ;;  %v9708_v45 = vcombine.low %v6272_v38, %v6276_v39  ;;  %v6323_v56 = vld [vmem:[#allocation29 + $0x2a0] sm:$0xff]  ;;  %v6320_v31 = vld [vmem:[#allocation29 + $0x288] sm:$0xff] }
 0x896   :  { %6148 = vmatpush1.bf16.msra.mxu1 %v11216_v43  ;;  %6189 = vmatpush1.bf16.msra.mxu0 %v11219_v14  ;;  %v9709_v43 = vcombine.high %v6272_v38, %v6276_v39  ;;  %v6279_v14 = vld [vmem:[#allocation29 + $0x140] sm:$0xff]  ;;  %v6328_v39 = vld [vmem:[#allocation29 + $0x2c8] sm:$0xff] }
 0x897   :  { %6149 = vmatprep.subr.bf16.mxu1 %v11224_v44  ;;  %6190 = vmatprep.subr.bf16.mxu0 %v11227_v5  ;;  %v6283_v44 = vld [vmem:[#allocation29 + $0x160] sm:$0xff]  ;;  %v6280_v5 = vld [vmem:[#allocation29 + $0x148] sm:$0xff] }
 0x898   :  { %v6331_v38 = vld [vmem:[#allocation29 + $0x2e0] sm:$0xff] }
 0x89a   :  { %6150 = vmatpush1.bf16.msra.mxu1 %v11222_v46  ;;  %6191 = vmatpush1.bf16.msra.mxu0 %v11225_v15  ;;  %v6284_v46 = vld [vmem:[#allocation29 + $0x168] sm:$0xff]  ;;  %v9706_v15 = vcombine.low %v6271_v35, %v6275_v36  ;;  %v6327_v36 = vld [vmem:[#allocation29 + $0x2c0] sm:$0xff] }
 0x89b   :  { %6151 = vmatprep.subr.bf16.mxu1 %v11230_v47  ;;  %6192 = vmatprep.subr.bf16.mxu0 %v11233_v48  ;;  %v9715_v47 = vcombine.high %v6279_v14, %v6283_v44  ;;  %v9717_v48 = vcombine.high %v6280_v5, %v6284_v46 }
 0x89e   :  { %6152 = vmatpush1.bf16.msra.mxu1 %v11228_v49  ;;  %6193 = vmatpush1.bf16.msra.mxu0 %v11231_v50  ;;  %v6287_v49 = vld [vmem:[#allocation29 + $0x180] sm:$0xff] }
 0x89f   :  { %6153 = vmatprep.subr.bf16.mxu1 %v11236_v27  ;;  %6194 = vmatprep.subr.bf16.mxu0 %v11239_v53  ;;  %v6291_v50 = vld [vmem:[#allocation29 + $0x1a0] sm:$0xff]  ;;  %v6292_v27 = vld [vmem:[#allocation29 + $0x1a8] sm:$0xff]  ;;  %v9714_v53 = vcombine.low %v6279_v14, %v6283_v44 }
 0x8a0   :  { %v9725_v57 = vcombine.high %v6288_v51, %v6292_v27  ;;  %v6335_v44 = vld [vmem:[#allocation29 + $0x300] sm:$0xff] }
 0x8a2   :  { %6154 = vmatpush1.bf16.msra.mxu1 %v11234_v54  ;;  %6195 = vmatpush1.bf16.msra.mxu0 %v11237_v55  ;;  %v9716_v54 = vcombine.low %v6280_v5, %v6284_v46  ;;  %v9723_v55 = vcombine.high %v6287_v49, %v6291_v50  ;;  %v6339_v5 = vld [vmem:[#allocation29 + $0x320] sm:$0xff]  ;;  %v6336_v46 = vld [vmem:[#allocation29 + $0x308] sm:$0xff] }
 0x8a3   :  { %7817 = vmatprep.subr.bf16.mxu1 %v9675_v1  ;;  %7899 = vmatprep.subr.bf16.mxu0 %v9677_v8  ;;  %v9724_v1 = vcombine.low %v6288_v51, %v6292_v27  ;;  %v6304_v8 = vld [vmem:[#allocation29 + $0x208] sm:$0xff]  ;;  %v6347_v51 = vld [vmem:[#allocation29 + $0x360] sm:$0xff] }
 0x8a4   :  { %v6344_v27 = vld [vmem:[#allocation29 + $0x348] sm:$0xff] }
 0x8a5   :  { %6156 = vmatmul.mubr.bf16.vlgmr.msra.gmra.mrb[40].mxu1 %v5118_v30  ;;  %6197 = vmatmul.mubr.bf16.vlgmr.msra.gmra.mrb[28].mxu0 %v5118_v30  ;;  %v6295_v30 = vld [vmem:[#allocation29 + $0x1c0] sm:$0xff] }
 0x8a6   :  { %7818 = vmatpush1.bf16.msra.mxu1 %v9674_v25  ;;  %7900 = vmatpush1.bf16.msra.mxu0 %v9676_v7  ;;  %v9722_v25 = vcombine.low %v6287_v49, %v6291_v50  ;;  %v9731_v3 = vcombine.high %v6295_v30, %v6299_v58  ;;  %v6307_v7 = vld [vmem:[#allocation29 + $0x220] sm:$0xff]  ;;  %v9730_v17 = vcombine.low %v6295_v30, %v6299_v58 }
 0x8a7   :  { %7819 = vmatprep.subr.bf16.mxu1 %v9683_v13  ;;  %7901 = vmatprep.subr.bf16.mxu0 %v9685_v19  ;;  %v6308_v13 = vld [vmem:[#allocation29 + $0x228] sm:$0xff]  ;;  %v9739_v40 = vcombine.high %v6303_v6, %v6307_v7  ;;  %v6343_v50 = vld [vmem:[#allocation29 + $0x340] sm:$0xff] }
 0x8a8   :  { %v9741_v19 = vcombine.high %v6304_v8, %v6308_v13  ;;  %v9778_v58 = vcombine.low %v6343_v50, %v6347_v51 }
 0x8aa   :  { %7820 = vmatpush1.bf16.msra.mxu1 %v9682_v23  ;;  %7902 = vmatpush1.bf16.msra.mxu0 %v9684_v24  ;;  %v6316_v23 = vld [vmem:[#allocation29 + $0x268] sm:$0xff]  ;;  %v9738_v24 = vcombine.low %v6303_v6, %v6307_v7 }
 0x8ab   :  { %7821 = vmatprep.subr.bf16.mxu1 %v9691_v2  ;;  %7903 = vmatprep.subr.bf16.mxu0 %v9693_v0  ;;  %v9740_v2 = vcombine.low %v6304_v8, %v6308_v13  ;;  %v9747_v0 = vcombine.high %v6311_v20, %v6315_v21  ;;  %v9749_v26 = vcombine.high %v6312_v22, %v6316_v23  ;;  %v6359_v13 = vld [vmem:[#allocation29 + $0x3c0] sm:$0xff] }
 0x8ae   :  { %7822 = vmatpush1.bf16.msra.mxu1 %v9690_v32  ;;  %7904 = vmatpush1.bf16.msra.mxu0 %v9692_v34  ;;  %v6324_v32 = vld [vmem:[#allocation29 + $0x2a8] sm:$0xff]  ;;  %v9746_v34 = vcombine.low %v6311_v20, %v6315_v21 }
 0x8af   :  { %7823 = vmatprep.subr.bf16.mxu1 %v9699_v60  ;;  %7905 = vmatprep.subr.bf16.mxu0 %v9701_v37  ;;  %v9748_v60 = vcombine.low %v6312_v22, %v6316_v23  ;;  %v9755_v37 = vcombine.high %v6319_v29, %v6323_v56  ;;  %v9757_v35 = vcombine.high %v6320_v31, %v6324_v32  ;;  %v6367_v23 = vld [vmem:[#allocation29 + $0x400] sm:$0xff] }
 0x8b2   :  { %7824 = vmatpush1.bf16.msra.mxu1 %v9698_v59  ;;  %7906 = vmatpush1.bf16.msra.mxu0 %v9700_v41  ;;  %v6332_v59 = vld [vmem:[#allocation29 + $0x2e8] sm:$0xff]  ;;  %v9754_v41 = vcombine.low %v6319_v29, %v6323_v56 }
 0x8b3   :  { %7825 = vmatprep.subr.bf16.mxu1 %v9707_v42  ;;  %7907 = vmatprep.subr.bf16.mxu0 %v9709_v43  ;;  %v9756_v42 = vcombine.low %v6320_v31, %v6324_v32  ;;  %v9763_v43 = vcombine.high %v6327_v36, %v6331_v38  ;;  %v9765_v14 = vcombine.high %v6328_v39, %v6332_v59 }
 0x8b6   :  { %7826 = vmatpush1.bf16.msra.mxu1 %v9706_v15  ;;  %7908 = vmatpush1.bf16.msra.mxu0 %v9708_v45  ;;  %v6340_v15 = vld [vmem:[#allocation29 + $0x328] sm:$0xff]  ;;  %v9762_v45 = vcombine.low %v6327_v36, %v6331_v38 }
 0x8b7   :  { %7827 = vmatprep.subr.bf16.mxu1 %v9715_v47  ;;  %7909 = vmatprep.subr.bf16.mxu0 %v9717_v48  ;;  %v9764_v47 = vcombine.low %v6328_v39, %v6332_v59  ;;  %v9771_v48 = vcombine.high %v6335_v44, %v6339_v5  ;;  %v9773_v49 = vcombine.high %v6336_v46, %v6340_v15  ;;  %v6205_v59 = vld [vmem:[#allocation28] sm:$0xf] }
 0x8ba   :  { %7828 = vmatpush1.bf16.msra.mxu1 %v9714_v53  ;;  %7910 = vmatpush1.bf16.msra.mxu0 %v9716_v54  ;;  %v6348_v53 = vld [vmem:[#allocation29 + $0x368] sm:$0xff]  ;;  %v9770_v54 = vcombine.low %v6335_v44, %v6339_v5  ;;  %v6214_v44 = vrot.slane %v6205_v59, %v12190_v12  ;;  %v6222_v5 = vrot.slane %v6205_v59, %v12197_v16 }
 0x8bb   :  { %7829 = vmatprep.subr.bf16.mxu1 %v9723_v55  ;;  %7911 = vmatprep.subr.bf16.mxu0 %v9725_v57  ;;  %v9772_v55 = vcombine.low %v6336_v46, %v6340_v15  ;;  %v9779_v57 = vcombine.high %v6343_v50, %v6347_v51  ;;  %v9781_v30 = vcombine.high %v6344_v27, %v6348_v53 }
 0x8bc   :  { %v9780_v62 = vcombine.low %v6344_v27, %v6348_v53 }
 0x8be   :  { %7830 = vmatpush1.bf16.msra.mxu1 %v9722_v25  ;;  %7912 = vmatpush1.bf16.msra.mxu0 %v9724_v1  ;;  %v6355_v25 = vld [vmem:[#allocation29 + $0x3a0] sm:$0xff]  ;;  %v6352_v1 = vld [vmem:[#allocation29 + $0x388] sm:$0xff] }
 0x8bf   :  { %7831 = vmatprep.subr.bf16.mxu1 %v9731_v3  ;;  %7913 = vmatprep.subr.bf16.mxu0 %v9733_v4  ;;  %v9787_v3 = vcombine.high %v6351_v63, %v6355_v25  ;;  %v6356_v4 = vld [vmem:[#allocation29 + $0x3a8] sm:$0xff]  ;;  %v9786_v6 = vcombine.low %v6351_v63, %v6355_v25  ;;  %v6375_v63 = vld [vmem:[#allocation29 + $0x440] sm:$0xff] }
 0x8c0   :  { %v9788_v7 = vcombine.low %v6352_v1, %v6356_v4  ;;  %v9789_v8 = vcombine.high %v6352_v1, %v6356_v4  ;;  %v6379_v1 = vld [vmem:[#allocation29 + $0x460] sm:$0xff]  ;;  %v6380_v4 = vld [vmem:[#allocation29 + $0x468] sm:$0xff] }
 0x8c2   :  { %7832 = vmatpush1.bf16.msra.mxu1 %v9730_v17  ;;  %7914 = vmatpush1.bf16.msra.mxu0 %v9732_v61  ;;  %v6363_v17 = vld [vmem:[#allocation29 + $0x3e0] sm:$0xff]  ;;  %v6360_v61 = vld [vmem:[#allocation29 + $0x3c8] sm:$0xff] }
 0x8c3   :  { %7833 = vmatprep.subr.bf16.mxu1 %v9739_v40  ;;  %7915 = vmatprep.subr.bf16.mxu0 %v9741_v19  ;;  %v9795_v40 = vcombine.high %v6359_v13, %v6363_v17  ;;  %v6364_v19 = vld [vmem:[#allocation29 + $0x3e8] sm:$0xff]  ;;  %v9794_v20 = vcombine.low %v6359_v13, %v6363_v17  ;;  %v9811_v13 = vcombine.high %v6375_v63, %v6379_v1 }
 0x8c4   :  { %v9796_v21 = vcombine.low %v6360_v61, %v6364_v19  ;;  %v9797_v22 = vcombine.high %v6360_v61, %v6364_v19  ;;  %v6387_v61 = vld [vmem:[#allocation29 + $0x4a0] sm:$0xff]  ;;  %v6388_v19 = vld [vmem:[#allocation29 + $0x4a8] sm:$0xff] }
 0x8c6   :  { %7834 = vmatpush1.bf16.msra.mxu1 %v9738_v24  ;;  %7916 = vmatpush1.bf16.msra.mxu0 %v9740_v2  ;;  %v6371_v24 = vld [vmem:[#allocation29 + $0x420] sm:$0xff]  ;;  %v6368_v2 = vld [vmem:[#allocation29 + $0x408] sm:$0xff] }
 0x8c7   :  { %7835 = vmatprep.subr.bf16.mxu1 %v9747_v0  ;;  %7917 = vmatprep.subr.bf16.mxu0 %v9749_v26  ;;  %v9803_v0 = vcombine.high %v6367_v23, %v6371_v24  ;;  %v6372_v26 = vld [vmem:[#allocation29 + $0x428] sm:$0xff]  ;;  %v9802_v29 = vcombine.low %v6367_v23, %v6371_v24 }
 0x8c8   :  { %v9804_v56 = vcombine.low %v6368_v2, %v6372_v26  ;;  %v9805_v31 = vcombine.high %v6368_v2, %v6372_v26  ;;  %v6391_v2 = vld [vmem:[#allocation29 + $0x4c0] sm:$0xff]  ;;  %v6392_v26 = vld [vmem:[#allocation29 + $0x4c8] sm:$0xff] }
 0x8ca   :  { %7836 = vmatpush1.bf16.msra.mxu1 %v9746_v34  ;;  %7918 = vmatpush1.bf16.msra.mxu0 %v9748_v60 }
 0x8cb   :  { %7837 = vmatprep.subr.bf16.mxu1 %v9755_v37  ;;  %7919 = vmatprep.subr.bf16.mxu0 %v9757_v35 }
 0x8ce   :  { %7838 = vmatpush1.bf16.msra.mxu1 %v9754_v41  ;;  %7920 = vmatpush1.bf16.msra.mxu0 %v9756_v42  ;;  %v6210_v41 = vrot.slane %v6205_v59, %v12184_v10  ;;  %v6218_v42 = vrot.slane %v6205_v59, %v12208_v28 }
 0x8cf   :  { %7839 = vmatprep.subr.bf16.mxu1 %v9763_v43  ;;  %7921 = vmatprep.subr.bf16.mxu0 %v9765_v14 }
 0x8d2   :  { %7840 = vmatpush1.bf16.msra.mxu1 %v9762_v45  ;;  %7922 = vmatpush1.bf16.msra.mxu0 %v9764_v47 }
 0x8d3   :  { %7841 = vmatprep.subr.bf16.mxu1 %v9771_v48  ;;  %7923 = vmatprep.subr.bf16.mxu0 %v9773_v49 }
 0x8d6   :  { %7842 = vmatpush1.bf16.msra.mxu1 %v9770_v54  ;;  %7924 = vmatpush1.bf16.msra.mxu0 %v9772_v55 }
 0x8d7   :  { %7843 = vmatprep.subr.bf16.mxu1 %v9779_v57  ;;  %7925 = vmatprep.subr.bf16.mxu0 %v9781_v30 }
 0x8da   :  { %7844 = vmatpush1.bf16.msra.mxu1 %v9778_v58  ;;  %7926 = vmatpush1.bf16.msra.mxu0 %v9780_v62 }
 0x8db   :  { %7845 = vmatprep.subr.bf16.mxu1 %v9787_v3  ;;  %7927 = vmatprep.subr.bf16.mxu0 %v9789_v8  ;;  %v6376_v3 = vld [vmem:[#allocation29 + $0x448] sm:$0xff]  ;;  %v6383_v8 = vld [vmem:[#allocation29 + $0x480] sm:$0xff] }
 0x8dc   :  { %v9813_v17 = vcombine.high %v6376_v3, %v6380_v4  ;;  %v9819_v23 = vcombine.high %v6383_v8, %v6387_v61 }
 0x8de   :  { %7846 = vmatpush1.bf16.msra.mxu1 %v9786_v6  ;;  %7928 = vmatpush1.bf16.msra.mxu0 %v9788_v7 }
 0x8df   :  { %7847 = vmatprep.subr.bf16.mxu1 %v9795_v40  ;;  %7929 = vmatprep.subr.bf16.mxu0 %v9797_v22  ;;  %v6384_v40 = vld [vmem:[#allocation29 + $0x488] sm:$0xff]  ;;  %v9812_v22 = vcombine.low %v6376_v3, %v6380_v4  ;;  %v6431_v4 = vld [vmem:[#allocation29 + $0x600] sm:$0xff] }
 0x8e0   :  { %v9821_v24 = vcombine.high %v6384_v40, %v6388_v19 }
 0x8e2   :  { %7848 = vmatpush1.bf16.msra.mxu1 %v9794_v20  ;;  %7930 = vmatpush1.bf16.msra.mxu0 %v9796_v21  ;;  %v9810_v21 = vcombine.low %v6375_v63, %v6379_v1 }
 0x8e3   :  { %7858 = vmatprep.subr.bf16.mxu1 %v9803_v0  ;;  %7940 = vmatprep.subr.bf16.mxu0 %v9805_v31  ;;  %v6395_v0 = vld [vmem:[#allocation29 + $0x4e0] sm:$0xff]  ;;  %v6396_v31 = vld [vmem:[#allocation29 + $0x4e8] sm:$0xff] }
 0x938   :  { %v5755_v32 = vpop.f32.mrb[36].mxu1  ;;  %v5796_v34 = vpop.f32.mrb[24].mxu0 }
 0x939   :  { %v5757_v60 = vpop.f32.mrb[37].mxu1  ;;  %v5798_v37 = vpop.f32.mrb[25].mxu0 }
 0x93a   :  { %v5759_v35 = vpop.f32.mrb[38].mxu1  ;;  %v5800_v36 = vpop.f32.mrb[26].mxu0 }
 0x93b   :  { %v5760_v38 = vpop.f32.mrb[39].mxu1  ;;  %v5801_v39 = vpop.f32.mrb[27].mxu0  ;;  %v6400_v35 = vld [vmem:[#allocation29 + $0x508] sm:$0xff] }
 0x93c   :  { %v6404_v36 = vld [vmem:[#allocation29 + $0x528] sm:$0xff]  ;;  %v9826_v38 = vcombine.low %v6391_v2, %v6395_v0  ;;  %v9828_v39 = vcombine.low %v6392_v26, %v6396_v31 }
 0x978   :  { %v6157_v43 = vpop.f32.mrb[40].mxu1  ;;  %v6198_v14 = vpop.f32.mrb[28].mxu0 }
 0x979   :  { %v6158_v46 = vadd.f32 %v6157_v43, %v5755_v32  ;;  %v6199_v15 = vadd.f32 %v6198_v14, %v5796_v34  ;;  %v6159_v45 = vpop.f32.mrb[41].mxu1  ;;  %v6200_v47 = vpop.f32.mrb[29].mxu0  ;;  %v9818_v32 = vcombine.low %v6383_v8, %v6387_v61  ;;  %v9820_v34 = vcombine.low %v6384_v40, %v6388_v19  ;;  %v6411_v43 = vld [vmem:[#allocation29 + $0x560] sm:$0xff]  ;;  %v6408_v14 = vld [vmem:[#allocation29 + $0x548] sm:$0xff] }
 0x97a   :  { %v6160_v48 = vadd.f32 %v6159_v45, %v5757_v60  ;;  %v6201_v49 = vadd.f32 %v6200_v47, %v5798_v37  ;;  %v6161_v50 = vpop.f32.mrb[42].mxu1  ;;  %v6202_v51 = vpop.f32.mrb[30].mxu0  ;;  %v6399_v60 = vld [vmem:[#allocation29 + $0x500] sm:$0xff] }
 0x97b   :  { %v6227_v27 = vadd.f32 %v6210_v41, %v6158_v46  ;;  %v12314_v53 = vadd.f32 %v6218_v42, %v6199_v15  ;;  %v6162_v54 = vpop.f32.mrb[43].mxu1  ;;  %v6203_v55 = vpop.f32.mrb[31].mxu0  ;;  %v6403_v37 = vld [vmem:[#allocation29 + $0x520] sm:$0xff]  ;;  %v9837_v41 = vcombine.high %v6400_v35, %v6404_v36  ;;  %v9836_v46 = vcombine.low %v6400_v35, %v6404_v36  ;;  %v6420_v50 = vld [vmem:[#allocation29 + $0x5a8] sm:$0xff] }
 0x97c   :  { %v6228_v57 = vadd.f32 %v6214_v44, %v6160_v48  ;;  %v6230_v30 = vadd.f32 %v6222_v5, %v6201_v49  ;;  %v9835_v59 = vcombine.high %v6399_v60, %v6403_v37  ;;  %v6407_v42 = vld [vmem:[#allocation29 + $0x540] sm:$0xff]  ;;  %v6412_v44 = vld [vmem:[#allocation29 + $0x568] sm:$0xff]  ;;  %v9834_v5 = vcombine.low %v6399_v60, %v6403_v37 }
 0x97d   :  { %v6231_v58 = vmax.f32 %v6227_v27, 0.0  ;;  %v9843_v15 = vcombine.high %v6407_v42, %v6411_v43  ;;  %v9845_v45 = vcombine.high %v6408_v14, %v6412_v44  ;;  %v6415_v47 = vld [vmem:[#allocation29 + $0x580] sm:$0xff]  ;;  %v6416_v49 = vld [vmem:[#allocation29 + $0x588] sm:$0xff]  ;;  %v9842_v51 = vcombine.low %v6407_v42, %v6411_v43 }
 0x97e   :  { %v6232_v62 = vmax.f32 %v6228_v57, 0.0  ;;  %v6234_v25 = vmax.f32 %v6230_v30, 0.0  ;;  %v6419_v48 = vld [vmem:[#allocation29 + $0x5a0] sm:$0xff]  ;;  %v9844_v27 = vcombine.low %v6408_v14, %v6412_v44  ;;  %v9853_v55 = vcombine.high %v6416_v49, %v6420_v50  ;;  %v6452_v60 = vld [vmem:[#allocation29 + $0x6a8] sm:$0xff] }
 0x97f   :  { %v12318_v7 = vpack.c.bf16 %v6231_v58, %v6231_v58  ;;  %v9851_v54 = vcombine.high %v6415_v47, %v6419_v48  ;;  %v6423_v57 = vld [vmem:[#allocation29 + $0x5c0] sm:$0xff]  ;;  %v6424_v58 = vld [vmem:[#allocation29 + $0x5c8] sm:$0xff]  ;;  %v9850_v63 = vcombine.low %v6415_v47, %v6419_v48 }
 0x980   :  { %v12316_v6 = vpack.c.bf16 %v6232_v62, %v6232_v62  ;;  %v12322_v20 = vpack.c.bf16 %v6234_v25, %v6234_v25  ;;  %v6427_v30 = vld [vmem:[#allocation29 + $0x5e0] sm:$0xff]  ;;  %v6428_v62 = vld [vmem:[#allocation29 + $0x5e8] sm:$0xff]  ;;  %v9852_v25 = vcombine.low %v6416_v49, %v6420_v50 }
 0x981   :  { %v9859_v1 = vcombine.high %v6423_v57, %v6427_v30  ;;  %v9861_v3 = vcombine.high %v6424_v58, %v6428_v62  ;;  %v6435_v8 = vld [vmem:[#allocation29 + $0x620] sm:$0xff]  ;;  %v9858_v61 = vcombine.low %v6423_v57, %v6427_v30  ;;  %v9860_v40 = vcombine.low %v6424_v58, %v6428_v62  ;;  %v6460_v42 = vld [vmem:[#allocation29 + $0x6e8] sm:$0xff] }
 0x982   :  { %7849 = vmatprep.mubr.bf16.mxu1 %v12316_v6  ;;  %7931 = vmatprep.mubr.bf16.mxu0 %v12316_v6  ;;  %v9867_v19 = vcombine.high %v6431_v4, %v6435_v8  ;;  %v6468_v47 = vld [vmem:[#allocation29 + $0x728] sm:$0xff] }
 0x983   :  { %7850 = vmatmul.mubr.bf16.vlgmr.msra.gmra.mrb[44].mxu1 %v12318_v7  ;;  %7932 = vmatmul.mubr.bf16.vlgmr.msra.gmra.mrb[32].mxu0 %v12318_v7  ;;  %v6476_v57 = vld [vmem:[#allocation29 + $0x768] sm:$0xff] }
 0x984   :  { %7859 = vmatpush1.bf16.msra.mxu1 %v9802_v29  ;;  %7941 = vmatpush1.bf16.msra.mxu0 %v9804_v56  ;;  %v9827_v29 = vcombine.high %v6391_v2, %v6395_v0  ;;  %v9829_v56 = vcombine.high %v6392_v26, %v6396_v31  ;;  %v6444_v2 = vld [vmem:[#allocation29 + $0x668] sm:$0xff]  ;;  %v9866_v0 = vcombine.low %v6431_v4, %v6435_v8 }
 0x985   :  { %7890 = vmatprep.mubr.bf16.mxu1 %v12322_v20  ;;  %7972 = vmatprep.mubr.bf16.mxu0 %v12322_v20  ;;  %v6484_v4 = vld [vmem:[#allocation29 + $0x7a8] sm:$0xff] }
 0x986   :  { %7860 = vmatprep.subr.bf16.mxu1 %v9811_v13  ;;  %7942 = vmatprep.subr.bf16.mxu0 %v9813_v17  ;;  %v6432_v13 = vld [vmem:[#allocation29 + $0x608] sm:$0xff] }
 0x987   :  { %v6436_v17 = vld [vmem:[#allocation29 + $0x628] sm:$0xff] }
 0x988   :  { %7861 = vmatpush1.bf16.msra.mxu1 %v9810_v21  ;;  %7943 = vmatpush1.bf16.msra.mxu0 %v9812_v22  ;;  %v9869_v21 = vcombine.high %v6432_v13, %v6436_v17  ;;  %v6439_v22 = vld [vmem:[#allocation29 + $0x640] sm:$0xff]  ;;  %v9868_v26 = vcombine.low %v6432_v13, %v6436_v17 }
 0x989   :  { %7862 = vmatprep.subr.bf16.mxu1 %v9819_v23  ;;  %7944 = vmatprep.subr.bf16.mxu0 %v9821_v24  ;;  %v6443_v23 = vld [vmem:[#allocation29 + $0x660] sm:$0xff]  ;;  %v6440_v24 = vld [vmem:[#allocation29 + $0x648] sm:$0xff] }
 0x98a   :  { %v9875_v31 = vcombine.high %v6439_v22, %v6443_v23  ;;  %v9874_v37 = vcombine.low %v6439_v22, %v6443_v23  ;;  %v9876_v35 = vcombine.low %v6440_v24, %v6444_v2  ;;  %v6492_v22 = vld [vmem:[#allocation29 + $0x7e8] sm:$0xff] }
 0x98c   :  { %7863 = vmatpush1.bf16.msra.mxu1 %v9818_v32  ;;  %7945 = vmatpush1.bf16.msra.mxu0 %v9820_v34  ;;  %v9877_v32 = vcombine.high %v6440_v24, %v6444_v2  ;;  %v6447_v34 = vld [vmem:[#allocation29 + $0x680] sm:$0xff] }
 0x98d   :  { %7864 = vmatprep.subr.bf16.mxu1 %v9827_v29  ;;  %7946 = vmatprep.subr.bf16.mxu0 %v9829_v56  ;;  %v6451_v29 = vld [vmem:[#allocation29 + $0x6a0] sm:$0xff]  ;;  %v6448_v56 = vld [vmem:[#allocation29 + $0x688] sm:$0xff] }
 0x98e   :  { %v9883_v36 = vcombine.high %v6447_v34, %v6451_v29  ;;  %v9882_v43 = vcombine.low %v6447_v34, %v6451_v29  ;;  %v9884_v14 = vcombine.low %v6448_v56, %v6452_v60  ;;  %v6246_v34 = vld [vmem:[#allocation29 + $0x38] sm:$0xff] }
 0x990   :  { %7865 = vmatpush1.bf16.msra.mxu1 %v9826_v38  ;;  %7947 = vmatpush1.bf16.msra.mxu0 %v9828_v39  ;;  %v9885_v38 = vcombine.high %v6448_v56, %v6452_v60  ;;  %v6455_v39 = vld [vmem:[#allocation29 + $0x6c0] sm:$0xff]  ;;  %v6233_v60 = vmax.f32 %v12314_v53, 0.0  ;;  %v6261_v53 = vld [vmem:[#allocation29 + $0xb0] sm:$0xff] }
 0x991   :  { %7866 = vmatprep.subr.bf16.mxu1 %v9835_v59  ;;  %7948 = vmatprep.subr.bf16.mxu0 %v9837_v41  ;;  %v6459_v59 = vld [vmem:[#allocation29 + $0x6e0] sm:$0xff]  ;;  %v6456_v41 = vld [vmem:[#allocation29 + $0x6c8] sm:$0xff] }
 0x992   :  { %v9891_v44 = vcombine.high %v6455_v39, %v6459_v59  ;;  %v9890_v48 = vcombine.low %v6455_v39, %v6459_v59  ;;  %v9892_v49 = vcombine.low %v6456_v41, %v6460_v42  ;;  %v6250_v39 = vld [vmem:[#allocation29 + $0x58] sm:$0xff] }
 0x993   :  { %v6254_v59 = vld [vmem:[#allocation29 + $0x78] sm:$0xff] }
 0x994   :  { %7867 = vmatpush1.bf16.msra.mxu1 %v9834_v5  ;;  %7949 = vmatpush1.bf16.msra.mxu0 %v9836_v46  ;;  %v9893_v5 = vcombine.high %v6456_v41, %v6460_v42  ;;  %v6463_v46 = vld [vmem:[#allocation29 + $0x700] sm:$0xff]  ;;  %v12329_v42 = vpack.c.bf16 %v6233_v60, %v6233_v60  ;;  %v6301_v60 = vld [vmem:[#allocation29 + $0x1f0] sm:$0xff] }
 0x995   :  { %7868 = vmatprep.subr.bf16.mxu1 %v9843_v15  ;;  %7950 = vmatprep.subr.bf16.mxu0 %v9845_v45  ;;  %v6467_v15 = vld [vmem:[#allocation29 + $0x720] sm:$0xff]  ;;  %v6464_v45 = vld [vmem:[#allocation29 + $0x708] sm:$0xff] }
 0x996   :  { %v9899_v50 = vcombine.high %v6463_v46, %v6467_v15  ;;  %v9898_v30 = vcombine.low %v6463_v46, %v6467_v15  ;;  %v9900_v58 = vcombine.low %v6464_v45, %v6468_v47  ;;  %v6258_v46 = vld [vmem:[#allocation29 + $0x98] sm:$0xff] }
 0x997   :  { %v6262_v15 = vld [vmem:[#allocation29 + $0xb8] sm:$0xff] }
 0x998   :  { %7869 = vmatpush1.bf16.msra.mxu1 %v9842_v51  ;;  %7951 = vmatpush1.bf16.msra.mxu0 %v9844_v27  ;;  %v9901_v51 = vcombine.high %v6464_v45, %v6468_v47  ;;  %v6471_v27 = vld [vmem:[#allocation29 + $0x740] sm:$0xff]  ;;  %v9688_v47 = vcombine.low %v6250_v39, %v6254_v59 }
 0x999   :  { %7870 = vmatprep.subr.bf16.mxu1 %v9851_v54  ;;  %7952 = vmatprep.subr.bf16.mxu0 %v9853_v55  ;;  %v6475_v54 = vld [vmem:[#allocation29 + $0x760] sm:$0xff]  ;;  %v6472_v55 = vld [vmem:[#allocation29 + $0x748] sm:$0xff] }
 0x99a   :  { %v9907_v62 = vcombine.high %v6471_v27, %v6475_v54  ;;  %v9906_v8 = vcombine.low %v6471_v27, %v6475_v54  ;;  %v9908_v13 = vcombine.low %v6472_v55, %v6476_v57  ;;  %v6266_v27 = vld [vmem:[#allocation29 + $0xd8] sm:$0xff] }
 0x99b   :  { %v6270_v54 = vld [vmem:[#allocation29 + $0xf8] sm:$0xff] }
 0x99c   :  { %7871 = vmatpush1.bf16.msra.mxu1 %v9850_v63  ;;  %7953 = vmatpush1.bf16.msra.mxu0 %v9852_v25  ;;  %v9909_v63 = vcombine.high %v6472_v55, %v6476_v57  ;;  %v6479_v25 = vld [vmem:[#allocation29 + $0x780] sm:$0xff]  ;;  %v9696_v57 = vcombine.low %v6258_v46, %v6262_v15 }
 0x99d   :  { %7872 = vmatprep.subr.bf16.mxu1 %v9859_v1  ;;  %7954 = vmatprep.subr.bf16.mxu0 %v9861_v3  ;;  %v6483_v1 = vld [vmem:[#allocation29 + $0x7a0] sm:$0xff]  ;;  %v6480_v3 = vld [vmem:[#allocation29 + $0x788] sm:$0xff] }
 0x99e   :  { %v9915_v17 = vcombine.high %v6479_v25, %v6483_v1  ;;  %v9914_v23 = vcombine.low %v6479_v25, %v6483_v1  ;;  %v9916_v24 = vcombine.low %v6480_v3, %v6484_v4  ;;  %v6278_v25 = vld [vmem:[#allocation29 + $0x138] sm:$0xff] }
 0x9a0   :  { %7873 = vmatpush1.bf16.msra.mxu1 %v9858_v61  ;;  %7955 = vmatpush1.bf16.msra.mxu0 %v9860_v40  ;;  %v9917_v61 = vcombine.high %v6480_v3, %v6484_v4  ;;  %v6487_v40 = vld [vmem:[#allocation29 + $0x7c0] sm:$0xff]  ;;  %v9704_v3 = vcombine.low %v6266_v27, %v6270_v54 }
 0x9a1   :  { %7874 = vmatprep.subr.bf16.mxu1 %v9867_v19  ;;  %7956 = vmatprep.subr.bf16.mxu0 %v9869_v21  ;;  %v6491_v19 = vld [vmem:[#allocation29 + $0x7e0] sm:$0xff]  ;;  %v6488_v21 = vld [vmem:[#allocation29 + $0x7c8] sm:$0xff] }
 0x9a2   :  { %v9923_v2 = vcombine.high %v6487_v40, %v6491_v19  ;;  %v9922_v29 = vcombine.low %v6487_v40, %v6491_v19  ;;  %v9924_v56 = vcombine.low %v6488_v21, %v6492_v22  ;;  %v6286_v40 = vld [vmem:[#allocation29 + $0x178] sm:$0xff] }
 0x9a4   :  { %7875 = vmatpush1.bf16.msra.mxu1 %v9866_v0  ;;  %7957 = vmatpush1.bf16.msra.mxu0 %v9868_v26  ;;  %v9925_v0 = vcombine.high %v6488_v21, %v6492_v22  ;;  %v6241_v26 = vld [vmem:[#allocation29 + $0x10] sm:$0xff] }
 0x9a5   :  { %7876 = vmatprep.subr.bf16.mxu1 %v9875_v31  ;;  %7958 = vmatprep.subr.bf16.mxu0 %v9877_v32  ;;  %v6245_v31 = vld [vmem:[#allocation29 + $0x30] sm:$0xff]  ;;  %v6242_v32 = vld [vmem:[#allocation29 + $0x18] sm:$0xff] }
 0x9a6   :  { %v9678_v41 = vcombine.low %v6241_v26, %v6245_v31 }
 0x9a8   :  { %7877 = vmatpush1.bf16.msra.mxu1 %v9874_v37  ;;  %7959 = vmatpush1.bf16.msra.mxu0 %v9876_v35  ;;  %v9679_v37 = vcombine.high %v6241_v26, %v6245_v31  ;;  %v9681_v35 = vcombine.high %v6242_v32, %v6246_v34  ;;  %v6294_v26 = vld [vmem:[#allocation29 + $0x1b8] sm:$0xff] }
 0x9a9   :  { %7878 = vmatprep.subr.bf16.mxu1 %v9883_v36  ;;  %7960 = vmatprep.subr.bf16.mxu0 %v9885_v38  ;;  %v6249_v36 = vld [vmem:[#allocation29 + $0x50] sm:$0xff] }
 0x9aa   :  { %v6253_v38 = vld [vmem:[#allocation29 + $0x70] sm:$0xff] }
 0x9ab   :  { %v9686_v45 = vcombine.low %v6249_v36, %v6253_v38 }
 0x9ac   :  { %7879 = vmatpush1.bf16.msra.mxu1 %v9882_v43  ;;  %7961 = vmatpush1.bf16.msra.mxu0 %v9884_v14  ;;  %v9680_v43 = vcombine.low %v6242_v32, %v6246_v34  ;;  %v9687_v14 = vcombine.high %v6249_v36, %v6253_v38 }
 0x9ad   :  { %7880 = vmatprep.subr.bf16.mxu1 %v9891_v44  ;;  %7962 = vmatprep.subr.bf16.mxu0 %v9893_v5  ;;  %v9689_v44 = vcombine.high %v6250_v39, %v6254_v59  ;;  %v6257_v5 = vld [vmem:[#allocation29 + $0x90] sm:$0xff] }
 0x9ae   :  { %v9694_v55 = vcombine.low %v6257_v5, %v6261_v53 }
 0x9b0   :  { %7881 = vmatpush1.bf16.msra.mxu1 %v9890_v48  ;;  %7963 = vmatpush1.bf16.msra.mxu0 %v9892_v49  ;;  %v9695_v48 = vcombine.high %v6257_v5, %v6261_v53  ;;  %v9697_v49 = vcombine.high %v6258_v46, %v6262_v15 }
 0x9b1   :  { %7882 = vmatprep.subr.bf16.mxu1 %v9899_v50  ;;  %7964 = vmatprep.subr.bf16.mxu0 %v9901_v51  ;;  %v6265_v50 = vld [vmem:[#allocation29 + $0xd0] sm:$0xff] }
 0x9b2   :  { %v6269_v51 = vld [vmem:[#allocation29 + $0xf0] sm:$0xff] }
 0x9b3   :  { %v9702_v1 = vcombine.low %v6265_v50, %v6269_v51 }
 0x9b4   :  { %7883 = vmatpush1.bf16.msra.mxu1 %v9898_v30  ;;  %7965 = vmatpush1.bf16.msra.mxu0 %v9900_v58  ;;  %v9703_v30 = vcombine.high %v6265_v50, %v6269_v51  ;;  %v9705_v58 = vcombine.high %v6266_v27, %v6270_v54 }
 0x9b5   :  { %7884 = vmatprep.subr.bf16.mxu1 %v9907_v62  ;;  %7966 = vmatprep.subr.bf16.mxu0 %v9909_v63  ;;  %v6273_v62 = vld [vmem:[#allocation29 + $0x110] sm:$0xff] }
 0x9b6   :  { %v6277_v63 = vld [vmem:[#allocation29 + $0x130] sm:$0xff] }
 0x9b7   :  { %v9711_v4 = vcombine.high %v6273_v62, %v6277_v63  ;;  %v9710_v19 = vcombine.low %v6273_v62, %v6277_v63 }
 0x9b8   :  { %7885 = vmatpush1.bf16.msra.mxu1 %v9906_v8  ;;  %7967 = vmatpush1.bf16.msra.mxu0 %v9908_v13  ;;  %v6281_v13 = vld [vmem:[#allocation29 + $0x150] sm:$0xff] }
 0x9b9   :  { %7886 = vmatprep.subr.bf16.mxu1 %v9915_v17  ;;  %7968 = vmatprep.subr.bf16.mxu0 %v9917_v61  ;;  %v6285_v17 = vld [vmem:[#allocation29 + $0x170] sm:$0xff]  ;;  %v6282_v61 = vld [vmem:[#allocation29 + $0x158] sm:$0xff] }
 0x9ba   :  { %v9719_v22 = vcombine.high %v6281_v13, %v6285_v17  ;;  %v9718_v31 = vcombine.low %v6281_v13, %v6285_v17  ;;  %v9720_v32 = vcombine.low %v6282_v61, %v6286_v40 }
 0x9bc   :  { %7887 = vmatpush1.bf16.msra.mxu1 %v9914_v23  ;;  %7969 = vmatpush1.bf16.msra.mxu0 %v9916_v24  ;;  %v9721_v23 = vcombine.high %v6282_v61, %v6286_v40  ;;  %v6289_v24 = vld [vmem:[#allocation29 + $0x190] sm:$0xff] }
 0x9bd   :  { %7888 = vmatprep.subr.bf16.mxu1 %v9923_v2  ;;  %7970 = vmatprep.subr.bf16.mxu0 %v9925_v0  ;;  %v6293_v2 = vld [vmem:[#allocation29 + $0x1b0] sm:$0xff]  ;;  %v6290_v0 = vld [vmem:[#allocation29 + $0x198] sm:$0xff] }
 0x9be   :  { %v9727_v34 = vcombine.high %v6289_v24, %v6293_v2  ;;  %v9726_v36 = vcombine.low %v6289_v24, %v6293_v2  ;;  %v9728_v38 = vcombine.low %v6290_v0, %v6294_v26 }
 0x9c0   :  { %7889 = vmatpush1.bf16.msra.mxu1 %v9922_v29  ;;  %7971 = vmatpush1.bf16.msra.mxu0 %v9924_v56  ;;  %v9729_v29 = vcombine.high %v6290_v0, %v6294_v26  ;;  %v6297_v56 = vld [vmem:[#allocation29 + $0x1d0] sm:$0xff] }
 0x9c1   :  { %7981 = vmatprep.subr.bf16.mxu1 %v9679_v37  ;;  %8063 = vmatprep.subr.bf16.mxu0 %v9681_v35  ;;  %v6298_v37 = vld [vmem:[#allocation29 + $0x1d8] sm:$0xff]  ;;  %v9735_v39 = vcombine.high %v6297_v56, %v6301_v60  ;;  %v9734_v5 = vcombine.low %v6297_v56, %v6301_v60 }
 0x9c2   :  { %v6302_v35 = vld [vmem:[#allocation29 + $0x1f8] sm:$0xff] }
 0x9c3   :  { %7891 = vmatmul.mubr.bf16.vlgmr.msra.gmra.mrb[44].mxu1 %v12329_v42  ;;  %7973 = vmatmul.mubr.bf16.vlgmr.msra.gmra.mrb[32].mxu0 %v12329_v42  ;;  %v9737_v59 = vcombine.high %v6298_v37, %v6302_v35  ;;  %v9736_v53 = vcombine.low %v6298_v37, %v6302_v35 }
 0x9c4   :  { %7982 = vmatpush1.bf16.msra.mxu1 %v9678_v41  ;;  %8013 = vmatprep.mubr.bf16.mxu1 %v12316_v6  ;;  %v6305_v41 = vld [vmem:[#allocation29 + $0x210] sm:$0xff] }
 0x9c5   :  { %8064 = vmatpush1.bf16.msra.mxu0 %v9680_v43  ;;  %8095 = vmatprep.mubr.bf16.mxu0 %v12316_v6  ;;  %v6274_v6 = vld [vmem:[#allocation29 + $0x118] sm:$0xff]  ;;  %v6309_v43 = vld [vmem:[#allocation29 + $0x230] sm:$0xff] }
 0x9c6   :  { %7983 = vmatprep.subr.bf16.mxu1 %v9687_v14  ;;  %8065 = vmatprep.subr.bf16.mxu0 %v9689_v44  ;;  %v9713_v8 = vcombine.high %v6274_v6, %v6278_v25  ;;  %v9712_v21 = vcombine.low %v6274_v6, %v6278_v25  ;;  %v6306_v14 = vld [vmem:[#allocation29 + $0x218] sm:$0xff]  ;;  %v9743_v46 = vcombine.high %v6305_v41, %v6309_v43 }
 0x9c7   :  { %v6310_v44 = vld [vmem:[#allocation29 + $0x238] sm:$0xff]  ;;  %v9742_v50 = vcombine.low %v6305_v41, %v6309_v43 }
 0x9c8   :  { %7984 = vmatpush1.bf16.msra.mxu1 %v9686_v45  ;;  %v9745_v15 = vcombine.high %v6306_v14, %v6310_v44  ;;  %v6313_v45 = vld [vmem:[#allocation29 + $0x250] sm:$0xff]  ;;  %v9744_v51 = vcombine.low %v6306_v14, %v6310_v44 }
 0x9c9   :  { %8066 = vmatpush1.bf16.msra.mxu0 %v9688_v47  ;;  %7985 = vmatprep.subr.bf16.mxu1 %v9695_v48  ;;  %v6317_v47 = vld [vmem:[#allocation29 + $0x270] sm:$0xff]  ;;  %v6314_v48 = vld [vmem:[#allocation29 + $0x258] sm:$0xff] }
 0x9ca   :  { %8067 = vmatprep.subr.bf16.mxu0 %v9697_v49  ;;  %v6318_v49 = vld [vmem:[#allocation29 + $0x278] sm:$0xff]  ;;  %v9751_v27 = vcombine.high %v6313_v45, %v6317_v47  ;;  %v9750_v62 = vcombine.low %v6313_v45, %v6317_v47 }
 0x9cb   :  { %v9753_v54 = vcombine.high %v6314_v48, %v6318_v49  ;;  %v9752_v63 = vcombine.low %v6314_v48, %v6318_v49 }
 0x9cc   :  { %7986 = vmatpush1.bf16.msra.mxu1 %v9694_v55  ;;  %v6321_v55 = vld [vmem:[#allocation29 + $0x290] sm:$0xff] }
 0x9cd   :  { %8068 = vmatpush1.bf16.msra.mxu0 %v9696_v57  ;;  %7987 = vmatprep.subr.bf16.mxu1 %v9703_v30  ;;  %v6325_v57 = vld [vmem:[#allocation29 + $0x2b0] sm:$0xff]  ;;  %v6322_v30 = vld [vmem:[#allocation29 + $0x298] sm:$0xff] }
 0x9ce   :  { %8069 = vmatprep.subr.bf16.mxu0 %v9705_v58  ;;  %v6326_v58 = vld [vmem:[#allocation29 + $0x2b8] sm:$0xff]  ;;  %v9759_v6 = vcombine.high %v6321_v55, %v6325_v57  ;;  %v9758_v13 = vcombine.low %v6321_v55, %v6325_v57 }
 0x9cf   :  { %v9761_v25 = vcombine.high %v6322_v30, %v6326_v58  ;;  %v9760_v17 = vcombine.low %v6322_v30, %v6326_v58 }
 0x9d0   :  { %7988 = vmatpush1.bf16.msra.mxu1 %v9702_v1  ;;  %v6329_v1 = vld [vmem:[#allocation29 + $0x2d0] sm:$0xff] }
 0x9d1   :  { %8070 = vmatpush1.bf16.msra.mxu0 %v9704_v3  ;;  %7989 = vmatprep.subr.bf16.mxu1 %v9711_v4  ;;  %v6333_v3 = vld [vmem:[#allocation29 + $0x2f0] sm:$0xff]  ;;  %v6330_v4 = vld [vmem:[#allocation29 + $0x2d8] sm:$0xff] }
 0x9d2   :  { %8071 = vmatprep.subr.bf16.mxu0 %v9713_v8  ;;  %v6334_v8 = vld [vmem:[#allocation29 + $0x2f8] sm:$0xff]  ;;  %v9767_v61 = vcombine.high %v6329_v1, %v6333_v3  ;;  %v9766_v24 = vcombine.low %v6329_v1, %v6333_v3 }
 0x9d3   :  { %v9769_v40 = vcombine.high %v6330_v4, %v6334_v8  ;;  %v9768_v2 = vcombine.low %v6330_v4, %v6334_v8  ;;  %v6382_v1 = vld [vmem:[#allocation29 + $0x478] sm:$0xff]  ;;  %v6385_v8 = vld [vmem:[#allocation29 + $0x490] sm:$0xff] }
 0x9d4   :  { %7990 = vmatpush1.bf16.msra.mxu1 %v9710_v19  ;;  %v6337_v19 = vld [vmem:[#allocation29 + $0x310] sm:$0xff] }
 0x9d5   :  { %8072 = vmatpush1.bf16.msra.mxu0 %v9712_v21  ;;  %7991 = vmatprep.subr.bf16.mxu1 %v9719_v22  ;;  %v6341_v21 = vld [vmem:[#allocation29 + $0x330] sm:$0xff]  ;;  %v6338_v22 = vld [vmem:[#allocation29 + $0x318] sm:$0xff] }
 0x9d6   :  { %8073 = vmatprep.subr.bf16.mxu0 %v9721_v23  ;;  %v6342_v23 = vld [vmem:[#allocation29 + $0x338] sm:$0xff]  ;;  %v9775_v0 = vcombine.high %v6337_v19, %v6341_v21  ;;  %v9774_v56 = vcombine.low %v6337_v19, %v6341_v21 }
 0x9d7   :  { %v9777_v26 = vcombine.high %v6338_v22, %v6342_v23  ;;  %v9776_v60 = vcombine.low %v6338_v22, %v6342_v23 }
 0x9d8   :  { %7992 = vmatpush1.bf16.msra.mxu1 %v9718_v31  ;;  %v6345_v31 = vld [vmem:[#allocation29 + $0x350] sm:$0xff] }
 0x9d9   :  { %8074 = vmatpush1.bf16.msra.mxu0 %v9720_v32  ;;  %7993 = vmatprep.subr.bf16.mxu1 %v9727_v34  ;;  %v6349_v32 = vld [vmem:[#allocation29 + $0x370] sm:$0xff]  ;;  %v6346_v34 = vld [vmem:[#allocation29 + $0x358] sm:$0xff] }
 0x9da   :  { %8075 = vmatprep.subr.bf16.mxu0 %v9729_v29  ;;  %v6350_v29 = vld [vmem:[#allocation29 + $0x378] sm:$0xff]  ;;  %v9783_v37 = vcombine.high %v6345_v31, %v6349_v32  ;;  %v9782_v41 = vcombine.low %v6345_v31, %v6349_v32 }
 0x9db   :  { %v9785_v35 = vcombine.high %v6346_v34, %v6350_v29  ;;  %v9784_v43 = vcombine.low %v6346_v34, %v6350_v29  ;;  %v6401_v29 = vld [vmem:[#allocation29 + $0x510] sm:$0xff] }
 0x9dc   :  { %7994 = vmatpush1.bf16.msra.mxu1 %v9726_v36  ;;  %v6353_v36 = vld [vmem:[#allocation29 + $0x390] sm:$0xff] }
 0x9dd   :  { %8076 = vmatpush1.bf16.msra.mxu0 %v9728_v38  ;;  %7995 = vmatprep.subr.bf16.mxu1 %v9735_v39  ;;  %v6357_v38 = vld [vmem:[#allocation29 + $0x3b0] sm:$0xff]  ;;  %v6354_v39 = vld [vmem:[#allocation29 + $0x398] sm:$0xff] }
 0x9de   :  { %8077 = vmatprep.subr.bf16.mxu0 %v9737_v59  ;;  %v6358_v59 = vld [vmem:[#allocation29 + $0x3b8] sm:$0xff]  ;;  %v9791_v14 = vcombine.high %v6353_v36, %v6357_v38  ;;  %v9790_v45 = vcombine.low %v6353_v36, %v6357_v38 }
 0x9df   :  { %v9793_v44 = vcombine.high %v6354_v39, %v6358_v59  ;;  %v9792_v47 = vcombine.low %v6354_v39, %v6358_v59  ;;  %v6409_v39 = vld [vmem:[#allocation29 + $0x550] sm:$0xff] }
 0x9e0   :  { %7996 = vmatpush1.bf16.msra.mxu1 %v9734_v5  ;;  %v6361_v5 = vld [vmem:[#allocation29 + $0x3d0] sm:$0xff] }
 0x9e1   :  { %8078 = vmatpush1.bf16.msra.mxu0 %v9736_v53  ;;  %7997 = vmatprep.subr.bf16.mxu1 %v9743_v46  ;;  %v6365_v53 = vld [vmem:[#allocation29 + $0x3f0] sm:$0xff]  ;;  %v6362_v46 = vld [vmem:[#allocation29 + $0x3d8] sm:$0xff] }
 0x9e2   :  { %8079 = vmatprep.subr.bf16.mxu0 %v9745_v15  ;;  %v6366_v15 = vld [vmem:[#allocation29 + $0x3f8] sm:$0xff]  ;;  %v9799_v48 = vcombine.high %v6361_v5, %v6365_v53  ;;  %v9798_v55 = vcombine.low %v6361_v5, %v6365_v53  ;;  %v6413_v59 = vld [vmem:[#allocation29 + $0x570] sm:$0xff] }
 0x9e3   :  { %v9801_v49 = vcombine.high %v6362_v46, %v6366_v15  ;;  %v9800_v57 = vcombine.low %v6362_v46, %v6366_v15  ;;  %v9847_v5 = vcombine.high %v6409_v39, %v6413_v59  ;;  %v6417_v46 = vld [vmem:[#allocation29 + $0x590] sm:$0xff] }
 0x9e4   :  { %7998 = vmatpush1.bf16.msra.mxu1 %v9742_v50  ;;  %v6369_v50 = vld [vmem:[#allocation29 + $0x410] sm:$0xff] }
 0x9e5   :  { %8080 = vmatpush1.bf16.msra.mxu0 %v9744_v51  ;;  %7999 = vmatprep.subr.bf16.mxu1 %v9751_v27  ;;  %v6373_v51 = vld [vmem:[#allocation29 + $0x430] sm:$0xff]  ;;  %v6370_v27 = vld [vmem:[#allocation29 + $0x418] sm:$0xff] }
 0x9e6   :  { %8081 = vmatprep.subr.bf16.mxu0 %v9753_v54  ;;  %v6374_v54 = vld [vmem:[#allocation29 + $0x438] sm:$0xff]  ;;  %v9807_v30 = vcombine.high %v6369_v50, %v6373_v51  ;;  %v6421_v15 = vld [vmem:[#allocation29 + $0x5b0] sm:$0xff] }
 0x9e7   :  { %v9809_v58 = vcombine.high %v6370_v27, %v6374_v54  ;;  %v9808_v3 = vcombine.low %v6370_v27, %v6374_v54  ;;  %v6425_v27 = vld [vmem:[#allocation29 + $0x5d0] sm:$0xff] }
 0x9e8   :  { %8000 = vmatpush1.bf16.msra.mxu1 %v9750_v62  ;;  %v6377_v62 = vld [vmem:[#allocation29 + $0x450] sm:$0xff] }
 0x9e9   :  { %8082 = vmatpush1.bf16.msra.mxu0 %v9752_v63  ;;  %8001 = vmatprep.subr.bf16.mxu1 %v9759_v6  ;;  %v6381_v63 = vld [vmem:[#allocation29 + $0x470] sm:$0xff]  ;;  %v9806_v6 = vcombine.low %v6369_v50, %v6373_v51  ;;  %v9855_v50 = vcombine.high %v6417_v46, %v6421_v15 }
 0x9ea   :  { %8083 = vmatprep.subr.bf16.mxu0 %v9761_v25  ;;  %v6378_v25 = vld [vmem:[#allocation29 + $0x458] sm:$0xff]  ;;  %v9815_v4 = vcombine.high %v6377_v62, %v6381_v63  ;;  %v9814_v19 = vcombine.low %v6377_v62, %v6381_v63  ;;  %v6429_v54 = vld [vmem:[#allocation29 + $0x5f0] sm:$0xff] }
 0x9eb   :  { %v9816_v21 = vcombine.low %v6378_v25, %v6382_v1  ;;  %v9863_v62 = vcombine.high %v6425_v27, %v6429_v54 }
 0x9ec   :  { %8002 = vmatpush1.bf16.msra.mxu1 %v9758_v13  ;;  %v6389_v13 = vld [vmem:[#allocation29 + $0x4b0] sm:$0xff] }
 0x9ed   :  { %8084 = vmatpush1.bf16.msra.mxu0 %v9760_v17  ;;  %8003 = vmatprep.subr.bf16.mxu1 %v9767_v61  ;;  %v9817_v17 = vcombine.high %v6378_v25, %v6382_v1  ;;  %v6386_v61 = vld [vmem:[#allocation29 + $0x498] sm:$0xff]  ;;  %v9823_v22 = vcombine.high %v6385_v8, %v6389_v13  ;;  %v9822_v31 = vcombine.low %v6385_v8, %v6389_v13  ;;  %v6437_v25 = vld [vmem:[#allocation29 + $0x630] sm:$0xff] }
 0x9ee   :  { %8085 = vmatprep.subr.bf16.mxu0 %v9769_v40  ;;  %v6390_v40 = vld [vmem:[#allocation29 + $0x4b8] sm:$0xff] }
 0x9ef   :  { %v9825_v23 = vcombine.high %v6386_v61, %v6390_v40  ;;  %v6434_v1 = vld [vmem:[#allocation29 + $0x618] sm:$0xff] }
 0x9f0   :  { %8004 = vmatpush1.bf16.msra.mxu1 %v9766_v24  ;;  %v6393_v24 = vld [vmem:[#allocation29 + $0x4d0] sm:$0xff] }
 0x9f1   :  { %8086 = vmatpush1.bf16.msra.mxu0 %v9768_v2  ;;  %8005 = vmatprep.subr.bf16.mxu1 %v9775_v0  ;;  %v6397_v2 = vld [vmem:[#allocation29 + $0x4f0] sm:$0xff]  ;;  %v6394_v0 = vld [vmem:[#allocation29 + $0x4d8] sm:$0xff] }
 0x9f2   :  { %8087 = vmatprep.subr.bf16.mxu0 %v9777_v26  ;;  %v6398_v26 = vld [vmem:[#allocation29 + $0x4f8] sm:$0xff]  ;;  %v9831_v32 = vcombine.high %v6393_v24, %v6397_v2 }
 0x9f3   :  { %v9833_v34 = vcombine.high %v6394_v0, %v6398_v26 }
 0x9f4   :  { %8006 = vmatpush1.bf16.msra.mxu1 %v9774_v56  ;;  %v6405_v56 = vld [vmem:[#allocation29 + $0x530] sm:$0xff] }
 0x9f5   :  { %8088 = vmatpush1.bf16.msra.mxu0 %v9776_v60  ;;  %8007 = vmatprep.subr.bf16.mxu1 %v9783_v37  ;;  %v6402_v60 = vld [vmem:[#allocation29 + $0x518] sm:$0xff]  ;;  %v9839_v36 = vcombine.high %v6401_v29, %v6405_v56 }
 0x9f6   :  { %8089 = vmatprep.subr.bf16.mxu0 %v9785_v35  ;;  %v6406_v37 = vld [vmem:[#allocation29 + $0x538] sm:$0xff]  ;;  %v9832_v35 = vcombine.low %v6394_v0, %v6398_v26  ;;  %v6449_v0 = vld [vmem:[#allocation29 + $0x690] sm:$0xff] }
 0x9f7   :  { %v9841_v38 = vcombine.high %v6402_v60, %v6406_v37  ;;  %v6453_v26 = vld [vmem:[#allocation29 + $0x6b0] sm:$0xff] }
 0x9f8   :  { %8008 = vmatpush1.bf16.msra.mxu1 %v9782_v41  ;;  %v6410_v41 = vld [vmem:[#allocation29 + $0x558] sm:$0xff] }
 0x9f9   :  { %8090 = vmatpush1.bf16.msra.mxu0 %v9784_v43  ;;  %8009 = vmatprep.subr.bf16.mxu1 %v9791_v14  ;;  %v6414_v43 = vld [vmem:[#allocation29 + $0x578] sm:$0xff]  ;;  %v9838_v14 = vcombine.low %v6401_v29, %v6405_v56  ;;  %v9887_v29 = vcombine.high %v6449_v0, %v6453_v26 }
 0x9fa   :  { %8091 = vmatprep.subr.bf16.mxu0 %v9793_v44  ;;  %v9840_v44 = vcombine.low %v6402_v60, %v6406_v37  ;;  %v9849_v53 = vcombine.high %v6410_v41, %v6414_v43  ;;  %v6457_v60 = vld [vmem:[#allocation29 + $0x6d0] sm:$0xff] }
 0x9fb   :  { %v6461_v37 = vld [vmem:[#allocation29 + $0x6f0] sm:$0xff] }
 0x9fc   :  { %8010 = vmatpush1.bf16.msra.mxu1 %v9790_v45  ;;  %v6418_v45 = vld [vmem:[#allocation29 + $0x598] sm:$0xff] }
 0x9fd   :  { %8092 = vmatpush1.bf16.msra.mxu0 %v9792_v47  ;;  %8011 = vmatprep.subr.bf16.mxu1 %v9799_v48  ;;  %v6422_v47 = vld [vmem:[#allocation29 + $0x5b8] sm:$0xff]  ;;  %v9846_v48 = vcombine.low %v6409_v39, %v6413_v59  ;;  %v9895_v39 = vcombine.high %v6457_v60, %v6461_v37 }
 0x9fe   :  { %8093 = vmatprep.subr.bf16.mxu0 %v9801_v49  ;;  %v9848_v49 = vcombine.low %v6410_v41, %v6414_v43  ;;  %v9857_v51 = vcombine.high %v6418_v45, %v6422_v47  ;;  %v6465_v41 = vld [vmem:[#allocation29 + $0x710] sm:$0xff] }
 0x9ff   :  { %v6469_v43 = vld [vmem:[#allocation29 + $0x730] sm:$0xff] }
 0xa00   :  { %8012 = vmatpush1.bf16.msra.mxu1 %v9798_v55  ;;  %v6426_v55 = vld [vmem:[#allocation29 + $0x5d8] sm:$0xff] }
 0xa01   :  { %8094 = vmatpush1.bf16.msra.mxu0 %v9800_v57  ;;  %8022 = vmatprep.subr.bf16.mxu1 %v9807_v30  ;;  %v6430_v57 = vld [vmem:[#allocation29 + $0x5f8] sm:$0xff]  ;;  %v9854_v30 = vcombine.low %v6417_v46, %v6421_v15  ;;  %v9903_v46 = vcombine.high %v6465_v41, %v6469_v43 }
 0xa02   :  { %8104 = vmatprep.subr.bf16.mxu0 %v9809_v58  ;;  %v9856_v58 = vcombine.low %v6418_v45, %v6422_v47  ;;  %v9865_v63 = vcombine.high %v6426_v55, %v6430_v57  ;;  %v9864_v8 = vcombine.low %v6426_v55, %v6430_v57  ;;  %v6473_v45 = vld [vmem:[#allocation29 + $0x750] sm:$0xff] }
 0xa03   :  { %8014 = vmatmul.mubr.bf16.vlgmr.msra.gmra.mrb[48].mxu1 %v12318_v7  ;;  %v6477_v47 = vld [vmem:[#allocation29 + $0x770] sm:$0xff] }
 0xa04   :  { %8096 = vmatmul.mubr.bf16.vlgmr.msra.gmra.mrb[36].mxu0 %v12318_v7  ;;  %8023 = vmatpush1.bf16.msra.mxu1 %v9806_v6  ;;  %v9824_v7 = vcombine.low %v6386_v61, %v6390_v40  ;;  %v6433_v6 = vld [vmem:[#allocation29 + $0x610] sm:$0xff] }
 0xa05   :  { %8054 = vmatprep.mubr.bf16.mxu1 %v12322_v20  ;;  %8105 = vmatpush1.bf16.msra.mxu0 %v9808_v3  ;;  %v6438_v3 = vld [vmem:[#allocation29 + $0x638] sm:$0xff]  ;;  %v9871_v13 = vcombine.high %v6433_v6, %v6437_v25  ;;  %v6441_v61 = vld [vmem:[#allocation29 + $0x650] sm:$0xff] }
 0xa06   :  { %8136 = vmatprep.mubr.bf16.mxu0 %v12322_v20  ;;  %8024 = vmatprep.subr.bf16.mxu1 %v9815_v4  ;;  %v9830_v20 = vcombine.low %v6393_v24, %v6397_v2  ;;  %v9862_v4 = vcombine.low %v6425_v27, %v6429_v54  ;;  %v6445_v40 = vld [vmem:[#allocation29 + $0x670] sm:$0xff]  ;;  %v9911_v27 = vcombine.high %v6473_v45, %v6477_v47 }
 0xa07   :  { %8106 = vmatprep.subr.bf16.mxu0 %v9817_v17  ;;  %v9873_v17 = vcombine.high %v6434_v1, %v6438_v3  ;;  %v9879_v24 = vcombine.high %v6441_v61, %v6445_v40  ;;  %v6481_v55 = vld [vmem:[#allocation29 + $0x790] sm:$0xff] }
 0xa08   :  { %8025 = vmatpush1.bf16.msra.mxu1 %v9814_v19  ;;  %v6442_v19 = vld [vmem:[#allocation29 + $0x658] sm:$0xff]  ;;  %v6485_v57 = vld [vmem:[#allocation29 + $0x7b0] sm:$0xff] }
 0xa09   :  { %8107 = vmatpush1.bf16.msra.mxu0 %v9816_v21  ;;  %8026 = vmatprep.subr.bf16.mxu1 %v9823_v22  ;;  %v6446_v21 = vld [vmem:[#allocation29 + $0x678] sm:$0xff]  ;;  %v9870_v22 = vcombine.low %v6433_v6, %v6437_v25  ;;  %v9919_v6 = vcombine.high %v6481_v55, %v6485_v57 }
 0xa0a   :  { %8108 = vmatprep.subr.bf16.mxu0 %v9825_v23  ;;  %v9872_v23 = vcombine.low %v6434_v1, %v6438_v3  ;;  %v9881_v2 = vcombine.high %v6442_v19, %v6446_v21  ;;  %v6489_v1 = vld [vmem:[#allocation29 + $0x7d0] sm:$0xff] }
 0xa0b   :  { %v6493_v3 = vld [vmem:[#allocation29 + $0x7f0] sm:$0xff] }
 0xa0c   :  { %8027 = vmatpush1.bf16.msra.mxu1 %v9822_v31  ;;  %v6450_v31 = vld [vmem:[#allocation29 + $0x698] sm:$0xff] }
 0xa0d   :  { %8109 = vmatpush1.bf16.msra.mxu0 %v9824_v7  ;;  %8028 = vmatprep.subr.bf16.mxu1 %v9831_v32  ;;  %v6454_v7 = vld [vmem:[#allocation29 + $0x6b8] sm:$0xff]  ;;  %v9878_v32 = vcombine.low %v6441_v61, %v6445_v40  ;;  %v9927_v61 = vcombine.high %v6489_v1, %v6493_v3 }
 0xa0e   :  { %8110 = vmatprep.subr.bf16.mxu0 %v9833_v34  ;;  %v9880_v34 = vcombine.low %v6442_v19, %v6446_v21  ;;  %v9889_v56 = vcombine.high %v6450_v31, %v6454_v7  ;;  %v9926_v19 = vcombine.low %v6489_v1, %v6493_v3 }
 0xa10   :  { %8029 = vmatpush1.bf16.msra.mxu1 %v9830_v20  ;;  %v6458_v20 = vld [vmem:[#allocation29 + $0x6d8] sm:$0xff] }
 0xa11   :  { %8111 = vmatpush1.bf16.msra.mxu0 %v9832_v35  ;;  %8030 = vmatprep.subr.bf16.mxu1 %v9839_v36  ;;  %v6462_v35 = vld [vmem:[#allocation29 + $0x6f8] sm:$0xff]  ;;  %v9886_v36 = vcombine.low %v6449_v0, %v6453_v26  ;;  %v11244_v0 = vld [vmem:[#allocation31 + $0x48] sm:$0xff]  }
 0xa12   :  { %8112 = vmatprep.subr.bf16.mxu0 %v9841_v38  ;;  %v9888_v38 = vcombine.low %v6450_v31, %v6454_v7  ;;  %v9897_v59 = vcombine.high %v6458_v20, %v6462_v35  ;;  %v11245_v26 = vld [vmem:[#allocation31 + $0xc8] sm:$0xff]  }
 0xa13   :  { %v11246_v31 = vld [vmem:[#allocation31 + $0x8] sm:$0xff]  }
 0xa14   :  { %8031 = vmatpush1.bf16.msra.mxu1 %v9838_v14  ;;  %v6466_v14 = vld [vmem:[#allocation29 + $0x718] sm:$0xff]  ;;  %v11247_v7 = vld [vmem:[#allocation31 + $0x88] sm:$0xff]  }
 0xa15   :  { %8113 = vmatpush1.bf16.msra.mxu0 %v9840_v44  ;;  %8032 = vmatprep.subr.bf16.mxu1 %v9847_v5  ;;  %v6470_v44 = vld [vmem:[#allocation29 + $0x738] sm:$0xff]  ;;  %v9894_v5 = vcombine.low %v6457_v60, %v6461_v37 }
 0xa16   :  { %8114 = vmatprep.subr.bf16.mxu0 %v9849_v53  ;;  %v9896_v53 = vcombine.low %v6458_v20, %v6462_v35  ;;  %v9905_v15 = vcombine.high %v6466_v14, %v6470_v44  ;;  %v11252_v60 = vld [vmem:[#allocation31 + $0x58] sm:$0xff]   ;;  %v11256_v35 = vld [vmem:[#allocation31 + $0x60] sm:$0xff]  }
 0xa17   :  { %v11253_v37 = vld [vmem:[#allocation31 + $0xd8] sm:$0xff]  }
 0xa18   :  { %8033 = vmatpush1.bf16.msra.mxu1 %v9846_v48  ;;  %v6474_v48 = vld [vmem:[#allocation29 + $0x758] sm:$0xff] }
 0xa19   :  { %8115 = vmatpush1.bf16.msra.mxu0 %v9848_v49  ;;  %8034 = vmatprep.subr.bf16.mxu1 %v9855_v50  ;;  %v6478_v49 = vld [vmem:[#allocation29 + $0x778] sm:$0xff]  ;;  %v9902_v50 = vcombine.low %v6465_v41, %v6469_v43  ;;  %v11261_v41 = vld [vmem:[#allocation31 + $0xe8] sm:$0xff]  }
 0xa1a   :  { %8116 = vmatprep.subr.bf16.mxu0 %v9857_v51  ;;  %v9904_v51 = vcombine.low %v6466_v14, %v6470_v44  ;;  %v9913_v54 = vcombine.high %v6474_v48, %v6478_v49  ;;  %v11254_v20 = vld [vmem:[#allocation31 + $0x18] sm:$0xff]   ;;  %v11262_v43 = vld [vmem:[#allocation31 + $0x28] sm:$0xff]   ;;  %v11264_v44 = vld [vmem:[#allocation31 + $0x70] sm:$0xff]  }
 0xa1b   :  { %v11263_v14 = vld [vmem:[#allocation31 + $0xa8] sm:$0xff]  }
 0xa1c   :  { %8035 = vmatpush1.bf16.msra.mxu1 %v9854_v30  ;;  %v6482_v30 = vld [vmem:[#allocation29 + $0x798] sm:$0xff] }
 0xa1d   :  { %8117 = vmatpush1.bf16.msra.mxu0 %v9856_v58  ;;  %8036 = vmatprep.subr.bf16.mxu1 %v9863_v62  ;;  %v6486_v58 = vld [vmem:[#allocation29 + $0x7b8] sm:$0xff]  ;;  %v9910_v62 = vcombine.low %v6473_v45, %v6477_v47 }
 0xa1e   :  { %8118 = vmatprep.subr.bf16.mxu0 %v9865_v63  ;;  %v9912_v63 = vcombine.low %v6474_v48, %v6478_v49  ;;  %v9921_v25 = vcombine.high %v6482_v30, %v6486_v58  ;;  %v11269_v45 = vld [vmem:[#allocation31 + $0xf8] sm:$0xff]   ;;  %v11272_v49 = vld [vmem:[#allocation31 + $0x140] sm:$0xff]  }
 0xa1f   :  { %v11270_v47 = vld [vmem:[#allocation31 + $0x38] sm:$0xff]  }
 0xa20   :  { %8037 = vmatpush1.bf16.msra.mxu1 %v9862_v4  ;;  %v6490_v4 = vld [vmem:[#allocation29 + $0x7d8] sm:$0xff] }
 0xa21   :  { %8119 = vmatpush1.bf16.msra.mxu0 %v9864_v8  ;;  %8038 = vmatprep.subr.bf16.mxu1 %v9871_v13  ;;  %v6494_v8 = vld [vmem:[#allocation29 + $0x7f8] sm:$0xff]  ;;  %v9918_v13 = vcombine.low %v6481_v55, %v6485_v57 }
 0xa22   :  { %8120 = vmatprep.subr.bf16.mxu0 %v9873_v17  ;;  %v9920_v17 = vcombine.low %v6482_v30, %v6486_v58  ;;  %v9929_v40 = vcombine.high %v6490_v4, %v6494_v8  ;;  %v9928_v21 = vcombine.low %v6490_v4, %v6494_v8  ;;  %v11271_v48 = vld [vmem:[#allocation31 + $0xb8] sm:$0xff]  }
 0xa24   :  { %8039 = vmatpush1.bf16.msra.mxu1 %v9870_v22  ;;  %v11240_v22 = vld [vmem:[#allocation31 + $0x40] sm:$0xff]  }
 0xa25   :  { %8121 = vmatpush1.bf16.msra.mxu0 %v9872_v23  ;;  %8040 = vmatprep.subr.bf16.mxu1 %v9879_v24  ;;  %v11241_v23 = vld [vmem:[#allocation31 + $0xc0] sm:$0xff]  }
 0xa26   :  { %8122 = vmatprep.subr.bf16.mxu0 %v9881_v2  ;;  %v11242_v24 = vld [vmem:[#allocation31] sm:$0xff]  }
 0xa27   :  { %v11243_v2 = vld [vmem:[#allocation31 + $0x80] sm:$0xff]  }
 0xa28   :  { %8041 = vmatpush1.bf16.msra.mxu1 %v9878_v32  ;;  %v11248_v32 = vld [vmem:[#allocation31 + $0x50] sm:$0xff]  }
 0xa29   :  { %8123 = vmatpush1.bf16.msra.mxu0 %v9880_v34  ;;  %8042 = vmatprep.subr.bf16.mxu1 %v9887_v29  ;;  %v11249_v34 = vld [vmem:[#allocation31 + $0xd0] sm:$0xff]  }
 0xa2a   :  { %8124 = vmatprep.subr.bf16.mxu0 %v9889_v56  ;;  %v11250_v29 = vld [vmem:[#allocation31 + $0x10] sm:$0xff]  }
 0xa2b   :  { %v11251_v56 = vld [vmem:[#allocation31 + $0x90] sm:$0xff]  }
 0xa2c   :  { %8043 = vmatpush1.bf16.msra.mxu1 %v9886_v36  ;;  %v11257_v36 = vld [vmem:[#allocation31 + $0xe0] sm:$0xff]  }
 0xa2d   :  { %8125 = vmatpush1.bf16.msra.mxu0 %v9888_v38  ;;  %8044 = vmatprep.subr.bf16.mxu1 %v9895_v39  ;;  %v11258_v38 = vld [vmem:[#allocation31 + $0x20] sm:$0xff]  }
 0xa2e   :  { %8126 = vmatprep.subr.bf16.mxu0 %v9897_v59  ;;  %v11259_v39 = vld [vmem:[#allocation31 + $0xa0] sm:$0xff]   ;;  %v11260_v59 = vld [vmem:[#allocation31 + $0x68] sm:$0xff]  }
 0xa30   :  { %8045 = vmatpush1.bf16.msra.mxu1 %v9894_v5  ;;  %v11265_v5 = vld [vmem:[#allocation31 + $0xf0] sm:$0xff]  }
 0xa31   :  { %8127 = vmatpush1.bf16.msra.mxu0 %v9896_v53  ;;  %8046 = vmatprep.subr.bf16.mxu1 %v9903_v46  ;;  %v11266_v53 = vld [vmem:[#allocation31 + $0x30] sm:$0xff]  }
 0xa32   :  { %8128 = vmatprep.subr.bf16.mxu0 %v9905_v15  ;;  %v11267_v46 = vld [vmem:[#allocation31 + $0xb0] sm:$0xff]   ;;  %v11268_v15 = vld [vmem:[#allocation31 + $0x78] sm:$0xff]  }
 0xa34   :  { %8047 = vmatpush1.bf16.msra.mxu1 %v9902_v50  ;;  %v11273_v50 = vld [vmem:[#allocation31 + $0x1c0] sm:$0xff]  }
 0xa35   :  { %8129 = vmatpush1.bf16.msra.mxu0 %v9904_v51  ;;  %8048 = vmatprep.subr.bf16.mxu1 %v9911_v27  ;;  %v12342_v51 = vld [vmem:[%s12408_s25] sm:$0xff] }
 0xa36   :  { %8130 = vmatprep.subr.bf16.mxu0 %v9913_v54  ;;  %v6500_v27 = vrot.slane %v12342_v51, %v12184_v10  ;;  %v6508_v54 = vrot.slane %v12342_v51, %v12208_v28  ;;  %v6504_v55 = vrot.slane %v12342_v51, %v12190_v12  ;;  %v6512_v57 = vrot.slane %v12342_v51, %v12197_v16  ;;  %v11275_v16 = vld [vmem:[#allocation31 + $0x180] sm:$0xff]  }
 0xa38   :  { %8049 = vmatpush1.bf16.msra.mxu1 %v9910_v62 }
 0xa39   :  { %8131 = vmatpush1.bf16.msra.mxu0 %v9912_v63  ;;  %8050 = vmatprep.subr.bf16.mxu1 %v9919_v6 }
 0xa3a   :  { %8132 = vmatprep.subr.bf16.mxu0 %v9921_v25 }
 0xa3c   :  { %8051 = vmatpush1.bf16.msra.mxu1 %v9918_v13 }
 0xa3d   :  { %8133 = vmatpush1.bf16.msra.mxu0 %v9920_v17  ;;  %8052 = vmatprep.subr.bf16.mxu1 %v9927_v61 }
 0xa3e   :  { %8134 = vmatprep.subr.bf16.mxu0 %v9929_v40 }
 0xa40   :  { %8053 = vmatpush1.bf16.msra.mxu1 %v9926_v19 }
 0xa41   :  { %8135 = vmatpush1.bf16.msra.mxu0 %v9928_v21  ;;  %9995 = vmatprep.subr.bf16.mxu1 %v11240_v22  ;;  %v11274_v21 = vld [vmem:[#allocation31 + $0x100] sm:$0xff]  }
 0xa42   :  { %10017 = vmatprep.subr.bf16.mxu0 %v11241_v23 }
 0xa43   :  { %8055 = vmatmul.mubr.bf16.vlgmr.msra.gmra.mrb[48].mxu1 %v12329_v42 }
 0xa44   :  { %8137 = vmatmul.mubr.bf16.vlgmr.msra.gmra.mrb[36].mxu0 %v12329_v42  ;;  %9996 = vmatpush3.bf16.msra.mxu1 %v11242_v24  ;;  %v11255_v42 = vld [vmem:[#allocation31 + $0x98] sm:$0xff]   ;;  %v11276_v24 = vld [vmem:[#allocation31 + $0x148] sm:$0xff]  }
 0xa45   :  { %10018 = vmatpush3.bf16.msra.mxu0 %v11243_v2  ;;  %9997 = vmatprep.subr.bf16.mxu1 %v11244_v0  ;;  %v11277_v2 = vld [vmem:[#allocation31 + $0x1c8] sm:$0xff]  }
 0xa46   :  { %10019 = vmatprep.subr.bf16.mxu0 %v11245_v26  ;;  %v11278_v0 = vld [vmem:[#allocation31 + $0x108] sm:$0xff]  }
 0xa47   :  { %v11279_v26 = vld [vmem:[#allocation31 + $0x188] sm:$0xff]  }
 0xa48   :  { %9998 = vmatpush3.bf16.msra.mxu1 %v11246_v31  ;;  %v11280_v31 = vld [vmem:[#allocation31 + $0x150] sm:$0xff]  }
 0xa49   :  { %10020 = vmatpush3.bf16.msra.mxu0 %v11247_v7  ;;  %9999 = vmatprep.subr.bf16.mxu1 %v11248_v32  ;;  %v11281_v7 = vld [vmem:[#allocation31 + $0x1d0] sm:$0xff]  }
 0xa4a   :  { %10021 = vmatprep.subr.bf16.mxu0 %v11249_v34  ;;  %v11282_v32 = vld [vmem:[#allocation31 + $0x110] sm:$0xff]  }
 0xa4b   :  { %v11283_v34 = vld [vmem:[#allocation31 + $0x190] sm:$0xff]  }
 0xa4c   :  { %10000 = vmatpush3.bf16.msra.mxu1 %v11250_v29  ;;  %v11284_v29 = vld [vmem:[#allocation31 + $0x158] sm:$0xff]  }
 0xa4d   :  { %10022 = vmatpush3.bf16.msra.mxu0 %v11251_v56  ;;  %10001 = vmatprep.subr.bf16.mxu1 %v11252_v60  ;;  %v11285_v56 = vld [vmem:[#allocation31 + $0x1d8] sm:$0xff]  }
 0xa4e   :  { %10023 = vmatprep.subr.bf16.mxu0 %v11253_v37  ;;  %v11286_v60 = vld [vmem:[#allocation31 + $0x118] sm:$0xff]  }
 0xa4f   :  { %v11287_v37 = vld [vmem:[#allocation31 + $0x198] sm:$0xff]  }
 0xa50   :  { %10002 = vmatpush3.bf16.msra.mxu1 %v11254_v20  ;;  %v11288_v20 = vld [vmem:[#allocation31 + $0x160] sm:$0xff]  }
 0xa51   :  { %10024 = vmatpush3.bf16.msra.mxu0 %v11255_v42  ;;  %10003 = vmatprep.subr.bf16.mxu1 %v11256_v35  ;;  %v11289_v42 = vld [vmem:[#allocation31 + $0x1e0] sm:$0xff]  }
 0xa52   :  { %10025 = vmatprep.subr.bf16.mxu0 %v11257_v36  ;;  %v11290_v35 = vld [vmem:[#allocation31 + $0x120] sm:$0xff]  }
 0xa53   :  { %v11291_v36 = vld [vmem:[#allocation31 + $0x1a0] sm:$0xff]  }
 0xa54   :  { %10004 = vmatpush3.bf16.msra.mxu1 %v11258_v38  ;;  %v11292_v38 = vld [vmem:[#allocation31 + $0x168] sm:$0xff]  }
 0xa55   :  { %10026 = vmatpush3.bf16.msra.mxu0 %v11259_v39  ;;  %10005 = vmatprep.subr.bf16.mxu1 %v11260_v59  ;;  %v11293_v39 = vld [vmem:[#allocation31 + $0x1e8] sm:$0xff]  }
 0xa56   :  { %10027 = vmatprep.subr.bf16.mxu0 %v11261_v41  ;;  %v11294_v59 = vld [vmem:[#allocation31 + $0x128] sm:$0xff]  }
 0xa57   :  { %v11295_v41 = vld [vmem:[#allocation31 + $0x1a8] sm:$0xff]  }
 0xa58   :  { %10006 = vmatpush3.bf16.msra.mxu1 %v11262_v43  ;;  %v11296_v43 = vld [vmem:[#allocation31 + $0x170] sm:$0xff]  }
 0xa59   :  { %10028 = vmatpush3.bf16.msra.mxu0 %v11263_v14  ;;  %10007 = vmatprep.subr.bf16.mxu1 %v11264_v44  ;;  %v11297_v14 = vld [vmem:[#allocation31 + $0x1f0] sm:$0xff]  }
 0xa5a   :  { %10029 = vmatprep.subr.bf16.mxu0 %v11265_v5  ;;  %v11298_v44 = vld [vmem:[#allocation31 + $0x130] sm:$0xff]  }
 0xa5b   :  { %v11299_v5 = vld [vmem:[#allocation31 + $0x1b0] sm:$0xff]  }
 0xa5c   :  { %10008 = vmatpush3.bf16.msra.mxu1 %v11266_v53  ;;  %v11300_v53 = vld [vmem:[#allocation31 + $0x178] sm:$0xff]  }
 0xa5d   :  { %10030 = vmatpush3.bf16.msra.mxu0 %v11267_v46  ;;  %10009 = vmatprep.subr.bf16.mxu1 %v11268_v15  ;;  %v11301_v46 = vld [vmem:[#allocation31 + $0x1f8] sm:$0xff]  }
 0xa5e   :  { %10031 = vmatprep.subr.bf16.mxu0 %v11269_v45  ;;  %v11302_v15 = vld [vmem:[#allocation31 + $0x138] sm:$0xff]  }
 0xa5f   :  { %v11303_v45 = vld [vmem:[#allocation31 + $0x1b8] sm:$0xff]  }
 0xa60   :  { %10010 = vmatpush3.bf16.msra.mxu1 %v11270_v47  ;;  %v6516_v47 = vrot.slane %v12342_v51, %v463_v52 }
 0xa61   :  { %10032 = vmatpush3.bf16.msra.mxu0 %v11271_v48  ;;  %10039 = vmatprep.subr.bf16.mxu1 %v11272_v49  ;;  %v6524_v48 = vrot.slane %v12342_v51, %v471_v18  ;;  %v6520_v49 = vrot.slane %v12342_v51, %v467_v33 }
 0xa62   :  { %10061 = vmatprep.subr.bf16.mxu0 %v11273_v50  ;;  %v6528_v50 = vrot.slane %v12342_v51, %v475_v11 }
 0xa96   :  { %v7892_v30 = vpop.f32.mrb[44].mxu1  ;;  %v7974_v58 = vpop.f32.mrb[32].mxu0 }
 0xa97   :  { %v10091_v62 = vadd.f32 %v7892_v30, %v6500_v27  ;;  %v10093_v63 = vadd.f32 %v7974_v58, %v6508_v54  ;;  %v7894_v6 = vpop.f32.mrb[45].mxu1  ;;  %v7976_v25 = vpop.f32.mrb[33].mxu0 }
 0xa98   :  { %v10092_v1 = vadd.f32 %v7894_v6, %v6504_v55  ;;  %v10094_v3 = vadd.f32 %v7976_v25, %v6512_v57  ;;  %v7896_v4 = vpop.f32.mrb[46].mxu1  ;;  %v7978_v8 = vpop.f32.mrb[34].mxu0 }
 0xa99   :  { %v8145_v10 = vmax.f32 %v10091_v62, 0.0  ;;  %v8147_v13 = vmax.f32 %v10093_v63, 0.0  ;;  %v7897_v17 = vpop.f32.mrb[47].mxu1  ;;  %v7979_v28 = vpop.f32.mrb[35].mxu0 }
 0xa9a   :  { %v8146_v61 = vmax.f32 %v10092_v1, 0.0  ;;  %v8148_v40 = vmax.f32 %v10094_v3, 0.0  ;;  %v9930_v17 = vld [vmem:[#allocation32] ss:$0 sm:$0xff] }
 0xa9b   :  { %v8153_v22 = vpack.c.bf16 %v8145_v10, %v8145_v10  ;;  %v8155_v23 = vpack.c.bf16 %v8147_v13, %v8147_v13 }
 0xa9c   :  { %v8154_v12 = vpack.c.bf16 %v8146_v61, %v8146_v61  ;;  %v8156_v19 = vpack.c.bf16 %v8148_v40, %v8148_v40 }
 0xa9e   :  { %8712 = vmatprep.mubr.bf16.mxu1 %v8154_v12  ;;  %8752 = vmatprep.mubr.bf16.mxu0 %v8156_v19 }
 0xa9f   :  { %8713 = vmatmul.mubr.bf16.vlgmr.msra.gmra.mrb[52].mxu1 %v8153_v22  ;;  %8753 = vmatmul.mubr.bf16.vlgmr.msra.gmra.mrb[40].mxu0 %v8155_v23 }
 0xaa0   :  { %10040 = vmatpush3.bf16.msra.mxu1 %v11274_v21  ;;  %10062 = vmatpush3.bf16.msra.mxu0 %v11275_v16 }
 0xaa1   :  { %10041 = vmatprep.subr.bf16.mxu1 %v11276_v24  ;;  %10063 = vmatprep.subr.bf16.mxu0 %v11277_v2 }
 0xaa4   :  { %10042 = vmatpush3.bf16.msra.mxu1 %v11278_v0  ;;  %10064 = vmatpush3.bf16.msra.mxu0 %v11279_v26 }
 0xaa5   :  { %10043 = vmatprep.subr.bf16.mxu1 %v11280_v31  ;;  %10065 = vmatprep.subr.bf16.mxu0 %v11281_v7 }
 0xaa8   :  { %10044 = vmatpush3.bf16.msra.mxu1 %v11282_v32  ;;  %10066 = vmatpush3.bf16.msra.mxu0 %v11283_v34 }
 0xaa9   :  { %10045 = vmatprep.subr.bf16.mxu1 %v11284_v29  ;;  %10067 = vmatprep.subr.bf16.mxu0 %v11285_v56 }
 0xaac   :  { %10046 = vmatpush3.bf16.msra.mxu1 %v11286_v60  ;;  %10068 = vmatpush3.bf16.msra.mxu0 %v11287_v37 }
 0xaad   :  { %10047 = vmatprep.subr.bf16.mxu1 %v11288_v20  ;;  %10069 = vmatprep.subr.bf16.mxu0 %v11289_v42 }
 0xab0   :  { %10048 = vmatpush3.bf16.msra.mxu1 %v11290_v35  ;;  %10070 = vmatpush3.bf16.msra.mxu0 %v11291_v36 }
 0xab1   :  { %10049 = vmatprep.subr.bf16.mxu1 %v11292_v38  ;;  %10071 = vmatprep.subr.bf16.mxu0 %v11293_v39 }
 0xab4   :  { %10050 = vmatpush3.bf16.msra.mxu1 %v11294_v59  ;;  %10072 = vmatpush3.bf16.msra.mxu0 %v11295_v41 }
 0xab5   :  { %10051 = vmatprep.subr.bf16.mxu1 %v11296_v43  ;;  %10073 = vmatprep.subr.bf16.mxu0 %v11297_v14 }
 0xab8   :  { %10052 = vmatpush3.bf16.msra.mxu1 %v11298_v44  ;;  %10074 = vmatpush3.bf16.msra.mxu0 %v11299_v5 }
 0xab9   :  { %10053 = vmatprep.subr.bf16.mxu1 %v11300_v53  ;;  %10075 = vmatprep.subr.bf16.mxu0 %v11301_v46 }
 0xabc   :  { %10054 = vmatpush3.bf16.msra.mxu1 %v11302_v15  ;;  %10076 = vmatpush3.bf16.msra.mxu0 %v11303_v45 }
 0xb16   :  { %v8056_v27 = vpop.f32.mrb[48].mxu1 }
 0xb17   :  { %v10095_v54 = vadd.f32 %v8056_v27, %v6516_v47  ;;  %v8138_v55 = vpop.f32.mrb[36].mxu0  ;;  %v8058_v57 = vpop.f32.mrb[49].mxu1 }
 0xb18   :  { %v10097_v30 = vadd.f32 %v8138_v55, %v6524_v48  ;;  %v10096_v58 = vadd.f32 %v8058_v57, %v6520_v49  ;;  %v8140_v62 = vpop.f32.mrb[37].mxu0  ;;  %v8060_v52 = vpop.f32.mrb[50].mxu1 }
 0xb19   :  { %v8149_v63 = vmax.f32 %v10095_v54, 0.0  ;;  %v10098_v6 = vadd.f32 %v8140_v62, %v6528_v50  ;;  %v8142_v25 = vpop.f32.mrb[38].mxu0  ;;  %v8061_v18 = vpop.f32.mrb[51].mxu1 }
 0xb1a   :  { %v8151_v1 = vmax.f32 %v10097_v30, 0.0  ;;  %v8150_v3 = vmax.f32 %v10096_v58, 0.0  ;;  %v8143_v4 = vpop.f32.mrb[39].mxu0 }
 0xb1b   :  { %v8152_v33 = vmax.f32 %v10098_v6, 0.0  ;;  %v8157_v9 = vpack.c.bf16 %v8149_v63, %v8149_v63 }
 0xb1c   :  { %v8158_v8 = vpack.c.bf16 %v8150_v3, %v8150_v3  ;;  %v8159_v11 = vpack.c.bf16 %v8151_v1, %v8151_v1 }
 0xb1d   :  { %v8160_v10 = vpack.c.bf16 %v8152_v33, %v8152_v33 }
 0xb1e   :  { %8792 = vmatprep.mubr.bf16.mxu1 %v8158_v8 }
 0xb1f   :  { %8832 = vmatprep.mubr.bf16.mxu0 %v8160_v10  ;;  %8793 = vmatmul.mubr.bf16.vlgmr.msra.gmra.mrb[56].mxu1 %v8157_v9 }
 0xb20   :  { %8833 = vmatmul.mubr.bf16.vlgmr.msra.gmra.mrb[44].mxu0 %v8159_v11 }
 0xb72   :  { %v10011_v51 = vpop.f32.mrb[52].mxu1  ;;  %v10033_v13 = vpop.f32.mrb[40].mxu0 }
 0xb73   :  { %v10012_v28 = vpop.f32.mrb[53].mxu1  ;;  %v10034_v61 = vpop.f32.mrb[41].mxu0 }
 0xb74   :  { %v10013_v40 = vadd.f32 %v10012_v28, %v10011_v51  ;;  %v10035_v12 = vadd.f32 %v10034_v61, %v10033_v13  ;;  %v10014_v19 = vpop.f32.mrb[54].mxu1  ;;  %v10036_v21 = vpop.f32.mrb[42].mxu0 }
 0xb75   :  { %v10015_v16 = vpop.f32.mrb[55].mxu1  ;;  %v10037_v22 = vpop.f32.mrb[43].mxu0 }
 0xb76   :  { %v8715_v23 = vadd.f32 %v10013_v40, %v9930_v17 }
 0xb78   :  { %v8755_v24 = vadd.f32 %v10035_v12, %v8715_v23 }
 0xb79   :  { %11759 = shalt.err (!%p11756_p10)
}
 0xb7a   :  { %s11760_s20 = scalar_lea.hbm %s12049_s9, 128 }
 0xb7b   :  { %p11761_p11 = scmp.ne.s32.totalorder %s12049_s9, %s11760_s20  ;;  %p11764_p12 = scmp.lt.u32.totalorder %s11760_s20, %s12049_s9 }
 0xb7d   :  { %p11766_p13 = pnand %p11764_p12, %p11761_p11 }
 0xb7f   :  { %11769 = shalt.err (!%p11766_p13)
}
 0xb80   :  { %8860 = dma.vmem_to_hbm [thread:$0]  %s8858_s8, 128, %s12049_s9, [#allocation36]  }
 0xb81   :  { %s11770_s17 = scalar_lea.vmem %s8848_s7, 128  ;;  %p11775_p1 = scmp.lt.s32.totalorder %s8848_s7, %s8848_s7 }
 0xb82   :  { %p11771_p0 = scmp.ne.s32.totalorder %s8848_s7, %s11770_s17  ;;  %p11776_p2 = scmp.lt.s32.totalorder %s11770_s17, %s11770_s17 }
 0xb84   :  { %p11777_p3 = por %p11776_p2, %p11775_p1 }
 0xb86   :  { %p11778_p4 = pnand %p11777_p3, %p11771_p0 }
 0xb88   :  { %11781 = shalt.err (!%p11778_p4)
}
 0xb89   :  { %s11782_s29 = scalar_lea.hbm %s12044_s27, 128 }
 0xb8a   :  { %p11783_p5 = scmp.ne.s32.totalorder %s12044_s27, %s11782_s29  ;;  %p11786_p6 = scmp.lt.u32.totalorder %s11782_s29, %s12044_s27 }
 0xb8c   :  { %p11788_p7 = pnand %p11786_p6, %p11783_p5 }
 0xb8e   :  { %11791 = shalt.err (!%p11788_p7)
}
 0xb8f   :  { %8850 = dma.vmem_to_hbm [thread:$0]  %s8848_s7, 128, %s12044_s27, [#allocation4]  }
 0xb90   :  { %s11900_s9 = smov [#allocation37]  }
 0xb91   :  { %s8867_s3 = sshll.u32 %s11900_s9, 4  ;;  %s8868_s3 = int_to_ptr.vmem [resolvable:$true] %s8867_s3 }
 0xb92   :  { %s11792_s0 = scalar_lea.vmem %s8868_s3, 128  ;;  %p11797_p9 = scmp.lt.s32.totalorder %s8868_s3, %s8868_s3 }
 0xb93   :  { %p11793_p8 = scmp.ne.s32.totalorder %s8868_s3, %s11792_s0  ;;  %p11798_p10 = scmp.lt.s32.totalorder %s11792_s0, %s11792_s0 }
 0xb95   :  { %p11799_p11 = por %p11798_p10, %p11797_p9 }
 0xb97   :  { %p11800_p12 = pnand %p11799_p11, %p11793_p8 }
 0xbf2   :  { %v10055_v2 = vpop.f32.mrb[56].mxu1 }
 0xbf3   :  { %v10077_v0 = vpop.f32.mrb[44].mxu0  ;;  %v10056_v26 = vpop.f32.mrb[57].mxu1 }
 0xbf4   :  { %v10057_v31 = vadd.f32 %v10056_v26, %v10055_v2  ;;  %v10078_v7 = vpop.f32.mrb[45].mxu0  ;;  %v10058_v32 = vpop.f32.mrb[58].mxu1 }
 0xbf5   :  { %v10079_v34 = vadd.f32 %v10078_v7, %v10077_v0  ;;  %v10080_v29 = vpop.f32.mrb[46].mxu0  ;;  %v10059_v56 = vpop.f32.mrb[59].mxu1 }
 0xbf6   :  { %v8795_v60 = vadd.f32 %v10057_v31, %v8755_v24  ;;  %v10081_v37 = vpop.f32.mrb[47].mxu0 }
 0xbf8   :  { %v8835_v20 = vadd.f32 %v10079_v34, %v8795_v60 }
 0xbfa   :  { %8840 = vst [vmem:[#allocation37] sm:$0xff] %v8835_v20 }
 0xbfb   :  { %11803 = shalt.err (!%p11800_p12)
}
 0xbfc   :  { %s11804_s27 = scalar_lea.hbm %s12054_s13, 128 }
 0xbfd   :  { %p11805_p13 = scmp.ne.s32.totalorder %s12054_s13, %s11804_s27  ;;  %p11808_p0 = scmp.lt.u32.totalorder %s11804_s27, %s12054_s13 }
 0xbff   :  { %p11810_p1 = pnand %p11808_p0, %p11805_p13 }
 0xc01   :  { %11813 = shalt.err (!%p11810_p1)
}
 0xc02   :  { %8870 = dma.vmem_to_hbm [thread:$0]  %s8868_s3, 128, %s12054_s13, [#allocation36]  }
 0xc03   :  { %11836 = dma.done.wait [#allocation4], 128  }
 0xc04   :  { %11837 = vsyncadd [#allocation4], 4294967168 }
 0xc05   :  { %11838 = dma.done.wait [#allocation36], 256  }
 0xc06   :  { %11839 = vsyncadd [#allocation36], 4294967040 }
 0xc07   :  { %8880 = vsyncpa [#allocation3], 1 }
 0xc08   :  { %8881 = vsyncpa [#allocation6], 1 }
 0xc09   :  { %8882 = vsyncpa [#allocation9], 1 }
 0xc0a   :  { %8883 = vsyncpa [#allocation12], 1 }
 0xc0b   :  { %8884 = vsyncpa [#allocation15], 1 }
 0xc0c   :  { %8885 = vsyncpa [#allocation18], 1 }
 0xc0d   :  { %8886 = vsyncpa [#allocation21], 1 }
 0xc0e   :  { %8887 = vsyncpa [#allocation24], 1 }
 0xc0f   :  { %8888 = vsyncpa [#allocation27], 1 }
 0xc10   :  { %8889 = vsyncpa [#allocation30], 1 }
 0xc11   :  { %8890 = vsyncpa [#allocation33], 1 }
 0xc12   :  { %8891 = vsyncpa [#allocation4], 1 }
 0xc13   :  { %8892 = vsyncpa [#allocation36], 1 }

</bundles_post_ra>
